<compile_context>
chip_gen: v7x
topology: tpu7x:2x2x1
jax: 0.10.0
libtpu: 0.0.40
codegen_flags: <defaults>
</compile_context>

<pallas_src>
import jax
import jax.numpy as jnp
from jax.experimental import pallas as pl
from jax.experimental.pallas import tpu as pltpu


FC1_K = 7 * 7 * 64       # 3136  (PyTorch fc1 input features)
FC2_N_PAD = 128          # fc2 output columns padded 10 -> 128 (lane-dense store)


def _round_up(x, m):
    return (x + m - 1) // m * m


# ----------------------------------------------------------------------------
# Pallas kernels
# ----------------------------------------------------------------------------
def conv_bn_relu_pool_kernel(c_ref, w_ref, s_ref, b_ref, o_ref):
    """Fused 3x3 'same' conv (im2col) + folded BN + ReLU + 2x2 max-pool.

    c_ref: (1, 4*Pp, K)  bf16  im2col rows; rows [t*Pp : t*Pp+P] are pool tap t
    w_ref: (K, Cout)     bf16  conv weight as (kh*kw*cin, cout)
    s_ref: (1, Cout)     f32   folded BN scale
    b_ref: (1, Cout)     f32   folded BN bias (includes conv bias)
    o_ref: (1, Pp, Cout) bf16  pooled output for one image (rows >= P are junk)
    """
    pp = o_ref.shape[1]
    # Single MXU dispatch over all 4 pooling taps (M = 4*Pp).
    y = jnp.dot(c_ref[0], w_ref[...], preferred_element_type=jnp.float32)
    # Folded BN + ReLU applied once (before the pool max: BN scale may be <0).
    y = jnp.maximum(y * s_ref[...] + b_ref[...], 0.0)
    # 2x2 max-pool = max over the 4 sublane-aligned tap row-blocks.
    pooled = jnp.maximum(jnp.maximum(y[0 * pp:1 * pp], y[1 * pp:2 * pp]),
                         jnp.maximum(y[2 * pp:3 * pp], y[3 * pp:4 * pp]))
    o_ref[0] = pooled.astype(o_ref.dtype)


def fc_stack_kernel(x_ref, w1_ref, b1_ref, w2_ref, b2_ref, o_ref):
    """Fused fc1 + ReLU + fc2 (+ biases) for one batch row, single step.

    x_ref:  (1, 1, K)     bf16
    w1_ref: (K, 512)      bf16 (VMEM resident, constant index map)
    b1_ref: (1, 512)      f32
    w2_ref: (512, 128)    bf16 (columns >= 10 are zero padding)
    b2_ref: (1, 128)      f32
    o_ref:  (1, 1, 128)   f32
    """
    h = jnp.dot(x_ref[0], w1_ref[...], preferred_element_type=jnp.float32)
    h = jnp.maximum(h + b1_ref[...], 0.0).astype(jnp.bfloat16)
    out = jnp.dot(h, w2_ref[...], preferred_element_type=jnp.float32) + b2_ref[...]
    o_ref[0] = out.astype(o_ref.dtype)


# ----------------------------------------------------------------------------
# Wrappers around pallas_call
# ----------------------------------------------------------------------------
def _im2col_pool_taps(x_nhwc, pp):
    """(N,H,W,C) -> (N, 4*Pp, 9*C): per 2x2-pool tap, its im2col rows.

    Row index = tap*Pp + (oh*Wo + ow), tap = 2*sy + sx.  Feature order is
    (kh, kw, cin), matching conv_weight_to_matrix.  Pure XLA layout prep.
    """
    N, H, W, C = x_nhwc.shape
    Ho, Wo = H // 2, W // 2
    P = Ho * Wo
    xp = jnp.pad(x_nhwc, ((0, 0), (1, 1), (1, 1), (0, 0)))
    patches = [xp[:, dy:dy + H, dx:dx + W, :]
               for dy in range(3) for dx in range(3)]
    cols = jnp.concatenate(patches, axis=-1)             # (N, H, W, 9C)
    cols = cols.reshape(N, Ho, 2, Wo, 2, 9 * C)
    cols = jnp.transpose(cols, (0, 2, 4, 1, 3, 5))       # (N, 2, 2, Ho, Wo, 9C)
    cols = cols.reshape(N, 4, P, 9 * C)
    cols = jnp.pad(cols, ((0, 0), (0, 0), (0, pp - P), (0, 0)))
    return cols.reshape(N, 4 * pp, 9 * C)


def conv_bn_relu_pool(x_nhwc, w_mat, scale, bias):
    """3x3 conv + BN + ReLU + 2x2 max-pool, one Pallas kernel, grid over batch."""
    N, H, W, C = x_nhwc.shape
    Ho, Wo = H // 2, W // 2
    P = Ho * Wo
    Pp = _round_up(P, 8)                                 # sublane-aligned tap blocks
    K, Cout = w_mat.shape
    cols = _im2col_pool_taps(x_nhwc, Pp)                 # (N, 4*Pp, K) bf16

    out = pl.pallas_call(
        conv_bn_relu_pool_kernel,
        out_shape=jax.ShapeDtypeStruct((N, Pp, Cout), jnp.bfloat16),
        grid=(N,),
        in_specs=[
            pl.BlockSpec((1, 4 * Pp, K), lambda i: (i, 0, 0)),
            pl.BlockSpec((K, Cout), lambda i: (0, 0)),
            pl.BlockSpec((1, Cout), lambda i: (0, 0)),
            pl.BlockSpec((1, Cout), lambda i: (0, 0)),
        ],
        out_specs=pl.BlockSpec((1, Pp, Cout), lambda i: (i, 0, 0)),
        compiler_params=pltpu.CompilerParams(
            dimension_semantics=("parallel",)),
    )(cols, w_mat, scale, bias)
    return out[:, :P, :].reshape(N, Ho, Wo, Cout)


def fc_stack(x_flat, w1, b1, w2, b2):
    """Fused fc1 + ReLU + fc2 in one single-step kernel body, grid over batch."""
    M, K = x_flat.shape
    N1 = w1.shape[1]
    N2 = w2.shape[1]
    x3 = x_flat.reshape(M, 1, K)                         # (M,1,K): full last-2 dims

    out = pl.pallas_call(
        fc_stack_kernel,
        out_shape=jax.ShapeDtypeStruct((M, 1, N2), jnp.float32),
        grid=(M,),
        in_specs=[
            pl.BlockSpec((1, 1, K), lambda i: (i, 0, 0)),
            pl.BlockSpec((K, N1), lambda i: (0, 0)),
            pl.BlockSpec((1, N1), lambda i: (0, 0)),
            pl.BlockSpec((N1, N2), lambda i: (0, 0)),
            pl.BlockSpec((1, N2), lambda i: (0, 0)),
        ],
        out_specs=pl.BlockSpec((1, 1, N2), lambda i: (i, 0, 0)),
        compiler_params=pltpu.CompilerParams(
            dimension_semantics=("parallel",)),
    )(x3, w1, b1, w2, b2)
    return out.reshape(M, N2)


# ----------------------------------------------------------------------------
# Parameter preparation (PyTorch layout -> kernel layout, BN folding, bf16)
# ----------------------------------------------------------------------------
def fold_bn(conv_bias, gamma, beta, running_mean, running_var, eps=1e-5):
    """Fold Conv bias + BatchNorm (eval mode) into per-channel scale & bias."""
    scale = gamma / jnp.sqrt(running_var + eps)
    bias = beta + (conv_bias - running_mean) * scale
    return scale[None, :].astype(jnp.float32), bias[None, :].astype(jnp.float32)


def conv_weight_to_matrix(w_oihw):
    """Torch conv weight (Cout, Cin, kh, kw) -> (kh*kw*Cin, Cout)."""
    cout, cin, kh, kw = w_oihw.shape
    return jnp.transpose(w_oihw, (2, 3, 1, 0)).reshape(kh * kw * cin, cout)


def init_params(key):
    k = jax.random.split(key, 8)
    p = {}
    # conv1: Conv2d(1, 32, 3, padding=1) + BN(32)
    p["w1"] = jax.random.normal(k[0], (32, 1, 3, 3), jnp.float32) * 0.1
    p["b1"] = jax.random.normal(k[1], (32,), jnp.float32) * 0.05
    p["bn1"] = (jnp.ones((32,)), jnp.zeros((32,)), jnp.zeros((32,)), jnp.ones((32,)))
    # conv2: Conv2d(32, 64, 3, padding=1) + BN(64)
    p["w2"] = jax.random.normal(k[2], (64, 32, 3, 3), jnp.float32) * 0.05
    p["b2"] = jax.random.normal(k[3], (64,), jnp.float32) * 0.05
    p["bn2"] = (jnp.ones((64,)), jnp.zeros((64,)), jnp.zeros((64,)), jnp.ones((64,)))
    # fc1: Linear(3136, 512), fc2: Linear(512, 10)
    p["wf1"] = jax.random.normal(k[4], (512, 3136), jnp.float32) * 0.02
    p["bf1"] = jax.random.normal(k[5], (512,), jnp.float32) * 0.02
    p["wf2"] = jax.random.normal(k[6], (10, 512), jnp.float32) * 0.02
    p["bf2"] = jax.random.normal(k[7], (10,), jnp.float32) * 0.02
    return p


def prepare_params(p):
    s1, c1 = fold_bn(p["b1"], *p["bn1"])
    s2, c2 = fold_bn(p["b2"], *p["bn2"])
    w1 = conv_weight_to_matrix(p["w1"]).astype(jnp.bfloat16)      # (9, 32)
    w2 = conv_weight_to_matrix(p["w2"]).astype(jnp.bfloat16)      # (288, 64)
    # fc1 weight columns are in PyTorch's (C, H, W) flatten order; permute to
    # the NHWC (H, W, C) flatten this implementation produces; transpose for
    # x @ W.  No K padding -- the kernel consumes the full K=3136 in one step.
    wf1 = p["wf1"].reshape(512, 64, 7, 7)
    wf1 = jnp.transpose(wf1, (0, 2, 3, 1)).reshape(512, FC1_K).T  # (3136, 512)
    wf1 = wf1.astype(jnp.bfloat16)
    # fc2: transpose for x @ W and zero-pad output columns 10 -> 128 so the
    # kernel's store is lane-dense; sliced back to 10 outside the kernel.
    wf2 = jnp.pad(p["wf2"].T, ((0, 0), (0, FC2_N_PAD - 10))).astype(jnp.bfloat16)
    bf2 = jnp.pad(p["bf2"], (0, FC2_N_PAD - 10))[None, :].astype(jnp.float32)
    return {
        "w1": w1, "s1": s1, "c1": c1,
        "w2": w2, "s2": s2, "c2": c2,
        "wf1": wf1, "bf1": p["bf1"][None, :].astype(jnp.float32),
        "wf2": wf2, "bf2": bf2,
    }


# ----------------------------------------------------------------------------
# SimpleNet forward
# ----------------------------------------------------------------------------
def simplenet_forward(x_nchw, prep):
    N = x_nchw.shape[0]
    x = jnp.transpose(x_nchw, (0, 2, 3, 1)).astype(jnp.bfloat16)      # NCHW -> NHWC

    # conv1 + BN + ReLU + pool: (N,28,28,1) -> (N,14,14,32)
    y1 = conv_bn_relu_pool(x, prep["w1"], prep["s1"], prep["c1"])
    # conv2 + BN + ReLU + pool: (N,14,14,32) -> (N,7,7,64)
    y2 = conv_bn_relu_pool(y1, prep["w2"], prep["s2"], prep["c2"])

    # NHWC flatten; fc1 weight columns were permuted to match this order.
    flat = y2.reshape(N, FC1_K)

    # fused fc1 + ReLU + fc2 (output padded to 128 cols inside the kernel)
    logits_padded = fc_stack(flat, prep["wf1"], prep["bf1"],
                             prep["wf2"], prep["bf2"])
    return logits_padded[:, :10]


if __name__ == "__main__":
    key = jax.random.PRNGKey(0)
    kx, kp = jax.random.split(key)
    # The 7*7*64 FC layer implies 28x28 single-channel input; small batch=2.
    x = jax.random.normal(kx, (2, 1, 28, 28), jnp.float32)
    params = init_params(kp)
    prep = prepare_params(params)

    fwd = jax.jit(simplenet_forward)
    logits = fwd(x, prep)
    jax.block_until_ready(logits)
    assert logits.shape == (2, 10)
    print("KERNEL_OK")
</pallas_src>

<mosaic_0001>
module attributes {stable_mosaic.version = 11 : i64} {
  func.func @conv_bn_relu_pool_kernel(%arg0: i32, %arg1: memref<1x800x9xbf16, #tpu.memory_space<vmem>>, %arg2: memref<9x32xbf16, #tpu.memory_space<vmem>>, %arg3: memref<1x32xf32, #tpu.memory_space<vmem>>, %arg4: memref<1x32xf32, #tpu.memory_space<vmem>>, %arg5: memref<1x200x32xbf16, #tpu.memory_space<vmem>>) attributes {dimension_semantics = [#tpu.dimension_semantics<parallel>], iteration_bounds = array<i64: 2>, scalar_prefetch = 0 : i64, scratch_operands = 0 : i64, tpu.core_type = #tpu.core_type<tc>, window_params = [{transform_indices = @transform_0, window_bounds = array<i64: 1, 800, 9>}, {pipeline_mode = #tpu.pipeline_mode<synchronous>, transform_indices = @transform_1, window_bounds = array<i64: 9, 32>}, {pipeline_mode = #tpu.pipeline_mode<synchronous>, transform_indices = @transform_2, window_bounds = array<i64: 1, 32>}, {pipeline_mode = #tpu.pipeline_mode<synchronous>, transform_indices = @transform_3, window_bounds = array<i64: 1, 32>}, {transform_indices = @transform_4, window_bounds = array<i64: 1, 200, 32>}]} {
    %c0 = arith.constant 0 : index
    %c0_0 = arith.constant 0 : index
    %c0_1 = arith.constant 0 : index
    %0 = vector.load %arg1[%c0, %c0_0, %c0_1] : memref<1x800x9xbf16, #tpu.memory_space<vmem>>, vector<1x800x9xbf16>
    %1 = vector.shape_cast %0 : vector<1x800x9xbf16> to vector<800x9xbf16>
    %c0_2 = arith.constant 0 : index
    %c0_3 = arith.constant 0 : index
    %2 = vector.load %arg2[%c0_2, %c0_3] : memref<9x32xbf16, #tpu.memory_space<vmem>>, vector<9x32xbf16>
    %cst = arith.constant dense<0.000000e+00> : vector<800x32xf32>
    %3 = tpu.matmul %1, %2, %cst {dimension_numbers = #tpu.dot_dimension_numbers<[1], [0], [0], [1], [0, 0, 1, 1], [], []>} : vector<800x9xbf16>, vector<9x32xbf16>, vector<800x32xf32> -> vector<800x32xf32>
    %c0_4 = arith.constant 0 : index
    %c0_5 = arith.constant 0 : index
    %4 = vector.load %arg3[%c0_4, %c0_5] : memref<1x32xf32, #tpu.memory_space<vmem>>, vector<1x32xf32>
    %5 = vector.broadcast %4 : vector<1x32xf32> to vector<800x32xf32>
    %6 = arith.mulf %3, %5 : vector<800x32xf32>
    %c0_6 = arith.constant 0 : index
    %c0_7 = arith.constant 0 : index
    %7 = vector.load %arg4[%c0_6, %c0_7] : memref<1x32xf32, #tpu.memory_space<vmem>>, vector<1x32xf32>
    %8 = vector.broadcast %7 : vector<1x32xf32> to vector<800x32xf32>
    %9 = arith.addf %6, %8 : vector<800x32xf32>
    %cst_8 = arith.constant 0.000000e+00 : f32
    %10 = vector.broadcast %cst_8 : f32 to vector<800x32xf32>
    %11 = arith.maximumf %9, %10 : vector<800x32xf32>
    %12 = vector.extract_strided_slice %11 {offsets = [0, 0], sizes = [200, 32], strides = [1, 1]} : vector<800x32xf32> to vector<200x32xf32>
    %13 = vector.extract_strided_slice %11 {offsets = [200, 0], sizes = [200, 32], strides = [1, 1]} : vector<800x32xf32> to vector<200x32xf32>
    %14 = arith.maximumf %12, %13 : vector<200x32xf32>
    %15 = vector.extract_strided_slice %11 {offsets = [400, 0], sizes = [200, 32], strides = [1, 1]} : vector<800x32xf32> to vector<200x32xf32>
    %16 = vector.extract_strided_slice %11 {offsets = [600, 0], sizes = [200, 32], strides = [1, 1]} : vector<800x32xf32> to vector<200x32xf32>
    %17 = arith.maximumf %15, %16 : vector<200x32xf32>
    %18 = arith.maximumf %14, %17 : vector<200x32xf32>
    %19 = arith.truncf %18 : vector<200x32xf32> to vector<200x32xbf16>
    %c0_9 = arith.constant 0 : index
    %c0_10 = arith.constant 0 : index
    %c0_11 = arith.constant 0 : index
    %20 = vector.load %arg5[%c0_9, %c0_10, %c0_11] : memref<1x200x32xbf16, #tpu.memory_space<vmem>>, vector<1x200x32xbf16>
    %21 = vector.shape_cast %20 : vector<1x200x32xbf16> to vector<200x32xbf16>
    %22 = vector.shape_cast %19 : vector<200x32xbf16> to vector<1x200x32xbf16>
    tpu.vector_store %arg5[%c0_9, %c0_10, %c0_11], %22 {strides = array<i32>} : memref<1x200x32xbf16, #tpu.memory_space<vmem>>, vector<1x200x32xbf16>,
    return
  }
  func.func @transform_0(%arg0: i32) -> (i32, i32, i32) {
    %c0_i32 = arith.constant 0 : i32
    %c0_i32_0 = arith.constant 0 : i32
    %c0_i32_1 = arith.constant 0 : i32
    return %arg0, %c0_i32, %c0_i32_0 : i32, i32, i32
  }
  func.func @transform_1(%arg0: i32) -> (i32, i32) {
    %c0_i32 = arith.constant 0 : i32
    %c0_i32_0 = arith.constant 0 : i32
    %c0_i32_1 = arith.constant 0 : i32
    return %c0_i32, %c0_i32_0 : i32, i32
  }
  func.func @transform_2(%arg0: i32) -> (i32, i32) {
    %c0_i32 = arith.constant 0 : i32
    %c0_i32_0 = arith.constant 0 : i32
    %c0_i32_1 = arith.constant 0 : i32
    return %c0_i32, %c0_i32_0 : i32, i32
  }
  func.func @transform_3(%arg0: i32) -> (i32, i32) {
    %c0_i32 = arith.constant 0 : i32
    %c0_i32_0 = arith.constant 0 : i32
    %c0_i32_1 = arith.constant 0 : i32
    return %c0_i32, %c0_i32_0 : i32, i32
  }
  func.func @transform_4(%arg0: i32) -> (i32, i32, i32) {
    %c0_i32 = arith.constant 0 : i32
    %c0_i32_0 = arith.constant 0 : i32
    %c0_i32_1 = arith.constant 0 : i32
    return %arg0, %c0_i32, %c0_i32_0 : i32, i32, i32
  }
}

module attributes {stable_mosaic.version = 11 : i64} {
  func.func @fc_stack_kernel(%arg0: i32, %arg1: memref<1x1x3136xbf16, #tpu.memory_space<vmem>>, %arg2: memref<3136x512xbf16, #tpu.memory_space<vmem>>, %arg3: memref<1x512xf32, #tpu.memory_space<vmem>>, %arg4: memref<512x128xbf16, #tpu.memory_space<vmem>>, %arg5: memref<1x128xf32, #tpu.memory_space<vmem>>, %arg6: memref<1x1x128xf32, #tpu.memory_space<vmem>>) attributes {dimension_semantics = [#tpu.dimension_semantics<parallel>], iteration_bounds = array<i64: 2>, scalar_prefetch = 0 : i64, scratch_operands = 0 : i64, tpu.core_type = #tpu.core_type<tc>, window_params = [{transform_indices = @transform_0, window_bounds = array<i64: 1, 1, 3136>}, {pipeline_mode = #tpu.pipeline_mode<synchronous>, transform_indices = @transform_1, window_bounds = array<i64: 3136, 512>}, {pipeline_mode = #tpu.pipeline_mode<synchronous>, transform_indices = @transform_2, window_bounds = array<i64: 1, 512>}, {pipeline_mode = #tpu.pipeline_mode<synchronous>, transform_indices = @transform_3, window_bounds = array<i64: 512, 128>}, {pipeline_mode = #tpu.pipeline_mode<synchronous>, transform_indices = @transform_4, window_bounds = array<i64: 1, 128>}, {transform_indices = @transform_5, window_bounds = array<i64: 1, 1, 128>}]} {
    %c0 = arith.constant 0 : index
    %c0_0 = arith.constant 0 : index
    %c0_1 = arith.constant 0 : index
    %0 = vector.load %arg1[%c0, %c0_0, %c0_1] : memref<1x1x3136xbf16, #tpu.memory_space<vmem>>, vector<1x1x3136xbf16>
    %1 = vector.shape_cast %0 : vector<1x1x3136xbf16> to vector<1x3136xbf16>
    %c0_2 = arith.constant 0 : index
    %c0_3 = arith.constant 0 : index
    %2 = vector.load %arg2[%c0_2, %c0_3] : memref<3136x512xbf16, #tpu.memory_space<vmem>>, vector<3136x512xbf16>
    %cst = arith.constant dense<0.000000e+00> : vector<1x512xf32>
    %3 = tpu.matmul %1, %2, %cst {dimension_numbers = #tpu.dot_dimension_numbers<[1], [0], [0], [1], [0, 0, 1, 1], [], []>} : vector<1x3136xbf16>, vector<3136x512xbf16>, vector<1x512xf32> -> vector<1x512xf32>
    %c0_4 = arith.constant 0 : index
    %c0_5 = arith.constant 0 : index
    %4 = vector.load %arg3[%c0_4, %c0_5] : memref<1x512xf32, #tpu.memory_space<vmem>>, vector<1x512xf32>
    %5 = arith.addf %3, %4 : vector<1x512xf32>
    %cst_6 = arith.constant 0.000000e+00 : f32
    %6 = vector.broadcast %cst_6 : f32 to vector<1x512xf32>
    %7 = arith.maximumf %5, %6 : vector<1x512xf32>
    %8 = arith.truncf %7 : vector<1x512xf32> to vector<1x512xbf16>
    %c0_7 = arith.constant 0 : index
    %c0_8 = arith.constant 0 : index
    %9 = vector.load %arg4[%c0_7, %c0_8] : memref<512x128xbf16, #tpu.memory_space<vmem>>, vector<512x128xbf16>
    %cst_9 = arith.constant dense<0.000000e+00> : vector<1x128xf32>
    %10 = tpu.matmul %8, %9, %cst_9 {dimension_numbers = #tpu.dot_dimension_numbers<[1], [0], [0], [1], [0, 0, 1, 1], [], []>} : vector<1x512xbf16>, vector<512x128xbf16>, vector<1x128xf32> -> vector<1x128xf32>
    %c0_10 = arith.constant 0 : index
    %c0_11 = arith.constant 0 : index
    %11 = vector.load %arg5[%c0_10, %c0_11] : memref<1x128xf32, #tpu.memory_space<vmem>>, vector<1x128xf32>
    %12 = arith.addf %10, %11 : vector<1x128xf32>
    %c0_12 = arith.constant 0 : index
    %c0_13 = arith.constant 0 : index
    %c0_14 = arith.constant 0 : index
    %13 = vector.load %arg6[%c0_12, %c0_13, %c0_14] : memref<1x1x128xf32, #tpu.memory_space<vmem>>, vector<1x1x128xf32>
    %14 = vector.shape_cast %13 : vector<1x1x128xf32> to vector<1x128xf32>
    %15 = vector.shape_cast %12 : vector<1x128xf32> to vector<1x1x128xf32>
    tpu.vector_store %arg6[%c0_12, %c0_13, %c0_14], %15 {strides = array<i32>} : memref<1x1x128xf32, #tpu.memory_space<vmem>>, vector<1x1x128xf32>,
    return
  }
  func.func @transform_0(%arg0: i32) -> (i32, i32, i32) {
    %c0_i32 = arith.constant 0 : i32
    %c0_i32_0 = arith.constant 0 : i32
    %c0_i32_1 = arith.constant 0 : i32
    return %arg0, %c0_i32, %c0_i32_0 : i32, i32, i32
  }
  func.func @transform_1(%arg0: i32) -> (i32, i32) {
    %c0_i32 = arith.constant 0 : i32
    %c0_i32_0 = arith.constant 0 : i32
    %c0_i32_1 = arith.constant 0 : i32
    return %c0_i32, %c0_i32_0 : i32, i32
  }
  func.func @transform_2(%arg0: i32) -> (i32, i32) {
    %c0_i32 = arith.constant 0 : i32
    %c0_i32_0 = arith.constant 0 : i32
    %c0_i32_1 = arith.constant 0 : i32
    return %c0_i32, %c0_i32_0 : i32, i32
  }
  func.func @transform_3(%arg0: i32) -> (i32, i32) {
    %c0_i32 = arith.constant 0 : i32
    %c0_i32_0 = arith.constant 0 : i32
    %c0_i32_1 = arith.constant 0 : i32
    return %c0_i32, %c0_i32_0 : i32, i32
  }
  func.func @transform_4(%arg0: i32) -> (i32, i32) {
    %c0_i32 = arith.constant 0 : i32
    %c0_i32_0 = arith.constant 0 : i32
    %c0_i32_1 = arith.constant 0 : i32
    return %c0_i32, %c0_i32_0 : i32, i32
  }
  func.func @transform_5(%arg0: i32) -> (i32, i32, i32) {
    %c0_i32 = arith.constant 0 : i32
    %c0_i32_0 = arith.constant 0 : i32
    %c0_i32_1 = arith.constant 0 : i32
    return %arg0, %c0_i32, %c0_i32_0 : i32, i32, i32
  }
}

module attributes {stable_mosaic.version = 11 : i64} {
  func.func @conv_bn_relu_pool_kernel(%arg0: i32, %arg1: memref<1x224x288xbf16, #tpu.memory_space<vmem>>, %arg2: memref<288x64xbf16, #tpu.memory_space<vmem>>, %arg3: memref<1x64xf32, #tpu.memory_space<vmem>>, %arg4: memref<1x64xf32, #tpu.memory_space<vmem>>, %arg5: memref<1x56x64xbf16, #tpu.memory_space<vmem>>) attributes {dimension_semantics = [#tpu.dimension_semantics<parallel>], iteration_bounds = array<i64: 2>, scalar_prefetch = 0 : i64, scratch_operands = 0 : i64, tpu.core_type = #tpu.core_type<tc>, window_params = [{transform_indices = @transform_0, window_bounds = array<i64: 1, 224, 288>}, {pipeline_mode = #tpu.pipeline_mode<synchronous>, transform_indices = @transform_1, window_bounds = array<i64: 288, 64>}, {pipeline_mode = #tpu.pipeline_mode<synchronous>, transform_indices = @transform_2, window_bounds = array<i64: 1, 64>}, {pipeline_mode = #tpu.pipeline_mode<synchronous>, transform_indices = @transform_3, window_bounds = array<i64: 1, 64>}, {transform_indices = @transform_4, window_bounds = array<i64: 1, 56, 64>}]} {
    %c0 = arith.constant 0 : index
    %c0_0 = arith.constant 0 : index
    %c0_1 = arith.constant 0 : index
    %0 = vector.load %arg1[%c0, %c0_0, %c0_1] : memref<1x224x288xbf16, #tpu.memory_space<vmem>>, vector<1x224x288xbf16>
    %1 = vector.shape_cast %0 : vector<1x224x288xbf16> to vector<224x288xbf16>
    %c0_2 = arith.constant 0 : index
    %c0_3 = arith.constant 0 : index
    %2 = vector.load %arg2[%c0_2, %c0_3] : memref<288x64xbf16, #tpu.memory_space<vmem>>, vector<288x64xbf16>
    %cst = arith.constant dense<0.000000e+00> : vector<224x64xf32>
    %3 = tpu.matmul %1, %2, %cst {dimension_numbers = #tpu.dot_dimension_numbers<[1], [0], [0], [1], [0, 0, 1, 1], [], []>} : vector<224x288xbf16>, vector<288x64xbf16>, vector<224x64xf32> -> vector<224x64xf32>
    %c0_4 = arith.constant 0 : index
    %c0_5 = arith.constant 0 : index
    %4 = vector.load %arg3[%c0_4, %c0_5] : memref<1x64xf32, #tpu.memory_space<vmem>>, vector<1x64xf32>
    %5 = vector.broadcast %4 : vector<1x64xf32> to vector<224x64xf32>
    %6 = arith.mulf %3, %5 : vector<224x64xf32>
    %c0_6 = arith.constant 0 : index
    %c0_7 = arith.constant 0 : index
    %7 = vector.load %arg4[%c0_6, %c0_7] : memref<1x64xf32, #tpu.memory_space<vmem>>, vector<1x64xf32>
    %8 = vector.broadcast %7 : vector<1x64xf32> to vector<224x64xf32>
    %9 = arith.addf %6, %8 : vector<224x64xf32>
    %cst_8 = arith.constant 0.000000e+00 : f32
    %10 = vector.broadcast %cst_8 : f32 to vector<224x64xf32>
    %11 = arith.maximumf %9, %10 : vector<224x64xf32>
    %12 = vector.extract_strided_slice %11 {offsets = [0, 0], sizes = [56, 64], strides = [1, 1]} : vector<224x64xf32> to vector<56x64xf32>
    %13 = vector.extract_strided_slice %11 {offsets = [56, 0], sizes = [56, 64], strides = [1, 1]} : vector<224x64xf32> to vector<56x64xf32>
    %14 = arith.maximumf %12, %13 : vector<56x64xf32>
    %15 = vector.extract_strided_slice %11 {offsets = [112, 0], sizes = [56, 64], strides = [1, 1]} : vector<224x64xf32> to vector<56x64xf32>
    %16 = vector.extract_strided_slice %11 {offsets = [168, 0], sizes = [56, 64], strides = [1, 1]} : vector<224x64xf32> to vector<56x64xf32>
    %17 = arith.maximumf %15, %16 : vector<56x64xf32>
    %18 = arith.maximumf %14, %17 : vector<56x64xf32>
    %19 = arith.truncf %18 : vector<56x64xf32> to vector<56x64xbf16>
    %c0_9 = arith.constant 0 : index
    %c0_10 = arith.constant 0 : index
    %c0_11 = arith.constant 0 : index
    %20 = vector.load %arg5[%c0_9, %c0_10, %c0_11] : memref<1x56x64xbf16, #tpu.memory_space<vmem>>, vector<1x56x64xbf16>
    %21 = vector.shape_cast %20 : vector<1x56x64xbf16> to vector<56x64xbf16>
    %22 = vector.shape_cast %19 : vector<56x64xbf16> to vector<1x56x64xbf16>
    tpu.vector_store %arg5[%c0_9, %c0_10, %c0_11], %22 {strides = array<i32>} : memref<1x56x64xbf16, #tpu.memory_space<vmem>>, vector<1x56x64xbf16>,
    return
  }
  func.func @transform_0(%arg0: i32) -> (i32, i32, i32) {
    %c0_i32 = arith.constant 0 : i32
    %c0_i32_0 = arith.constant 0 : i32
    %c0_i32_1 = arith.constant 0 : i32
    return %arg0, %c0_i32, %c0_i32_0 : i32, i32, i32
  }
  func.func @transform_1(%arg0: i32) -> (i32, i32) {
    %c0_i32 = arith.constant 0 : i32
    %c0_i32_0 = arith.constant 0 : i32
    %c0_i32_1 = arith.constant 0 : i32
    return %c0_i32, %c0_i32_0 : i32, i32
  }
  func.func @transform_2(%arg0: i32) -> (i32, i32) {
    %c0_i32 = arith.constant 0 : i32
    %c0_i32_0 = arith.constant 0 : i32
    %c0_i32_1 = arith.constant 0 : i32
    return %c0_i32, %c0_i32_0 : i32, i32
  }
  func.func @transform_3(%arg0: i32) -> (i32, i32) {
    %c0_i32 = arith.constant 0 : i32
    %c0_i32_0 = arith.constant 0 : i32
    %c0_i32_1 = arith.constant 0 : i32
    return %c0_i32, %c0_i32_0 : i32, i32
  }
  func.func @transform_4(%arg0: i32) -> (i32, i32, i32) {
    %c0_i32 = arith.constant 0 : i32
    %c0_i32_0 = arith.constant 0 : i32
    %c0_i32_1 = arith.constant 0 : i32
    return %arg0, %c0_i32, %c0_i32_0 : i32, i32, i32
  }
}

</mosaic_0001>

<bundles_post_ra>
// kernel: simplenet_forward.3
= control target key start
LH: loop header
LB: loop body
LE: loop exit
PB: predicated region body
PF: predicated region fallthrough
CT: control target
= control target key end

     0   :  { %s2131_s15 = smov 0   ;;  %s2789_s0 = inlined_call_operand.vmem [shape: bf16[2,800,9], index: 0, kind: input, shape index: {}]   ;;  %s2790_s1 = inlined_call_operand.vmem [shape: bf16[9,32], index: 1, kind: input, shape index: {}]   ;;  %s2791_s2 = inlined_call_operand.vmem [shape: f32[1,32], index: 2, kind: input, shape index: {}]   ;;  %s2792_s3 = inlined_call_operand.vmem [shape: f32[1,32], index: 3, kind: input, shape index: {}]   ;;  %s2793_s4 = inlined_call_operand.vmem [shape: bf16[2,200,32], index: 4, kind: output, shape index: {}]  }
   0x1 LB: > { %s1718_s16 = sadd.s32 4294967295, %s2103_s15   ;;  %p1722_p0 = scmp.ge.s32.totalorder %s2103_s15, 1  ;;  %s2103_s15 = sphi %s2131_s15, %s14_s15  }
   0x2   : > { %p162_p1 = scmp.lt.s32.totalorder %s2103_s15, 3 }
   0x4   : > { %p163_p2 = pnand %p1722_p0, %p162_p1 }
   0x6   : > { %166 = sbr.rel (%p163_p2) target bundleno = 364 (0x16c), region = 36 }
   0xd   : > { %v2046_v0 = vld [vmem:[%s2790_s1] sm:$0x1f]   ;;  %vm707_vm0 = vcmask 1043456   ;;  %vm708_vm1 = vcmask 1044480   ;;  %p188_p3 = scmp.lt.s32.totalorder %s1718_s16, 1  ;;  %v2105_v1 = vmov 65535  }
   0xe   : > { %v709_v2 = vsel %vm707_vm0, 4294967295, %v2105_v1  ;;  %vm556_vm2 = vcmask 72704   ;;  %vm1637_vm3 = vcmask 257024  }
   0xf   : > { %v710_v3 = vsel %vm708_vm1, %v709_v2, 0  ;;  %s2869_s16 = smov (!%p188_p3, %s1718_s16), 1  ;;  %v2253_v2 = vld [vmem:[%s2791_s2] ss:$0 sm:$0xff] }
  0x10   : > { %v712_v4 = vand.u32 %v2046_v0, %v710_v3  ;;  %s2035_s19 = smul.u32 400, %s2869_s16 }
  0x11   : > { %s2036_s27 = smul.u32 100, %s2869_s16 }
  0x12   : > { %1931 = vmatprep.subr.bf16.mxu0 %v712_v4  ;;  %2033 = vmatprep.subr.bf16.mxu1 %v712_v4  ;;  %s2148_s22 = scalar_lea.vmem %s2789_s0, %s2035_s19 }
  0x13   : > { %1932 = vmatpush3.bf16.msra.mxu0 %v712_v4  ;;  %2034 = vmatpush3.bf16.msra.mxu1 %v712_v4  ;;  %v2047_v5 = vld [vmem:[%s2148_s22] sm:$0xff]   ;;  %v2048_v6 = vld [vmem:[%s2148_s22 + $0xd0] sm:$0xff]   ;;  %v2049_v7 = vld [vmem:[%s2148_s22 + $0x8] sm:$0xff]   ;;  %s2552_s30 = scalar_lea.vmem %s2793_s4, %s2036_s27 }
  0x14   : > { %1933 = vmatprep.mubr.msk.bf16.mxu0 %vm556_vm2, %v2047_v5  ;;  %1985 = vmatprep.mubr.msk.bf16.mxu1 %vm556_vm2, %v2048_v6  ;;  %v2050_v8 = vld [vmem:[%s2148_s22 + $0xd8] sm:$0xff]   ;;  %v2051_v9 = vld [vmem:[%s2148_s22 + $0x10] sm:$0xff]   ;;  %v2052_v10 = vld [vmem:[%s2148_s22 + $0xe0] sm:$0xff]  }
  0x15   : > { %v2053_v11 = vld [vmem:[%s2148_s22 + $0x18] sm:$0xff]   ;;  %v2054_v12 = vld [vmem:[%s2148_s22 + $0xe8] sm:$0xff]   ;;  %v2055_v13 = vld [vmem:[%s2148_s22 + $0x20] sm:$0xff]  }
  0x16   : > { %1934 = vmatmul.mubr.msk.bf16.vlgmr.msra.gmra.mrb[0].mxu0 %vm556_vm2, %v2049_v7  ;;  %1986 = vmatmul.mubr.msk.bf16.vlgmr.msra.gmra.mrb[0].mxu1 %vm556_vm2, %v2050_v8  ;;  %v2056_v14 = vld [vmem:[%s2148_s22 + $0xf0] sm:$0xff]   ;;  %v2057_v15 = vld [vmem:[%s2148_s22 + $0x28] sm:$0xff]   ;;  %v2058_v16 = vld [vmem:[%s2148_s22 + $0xf8] sm:$0xff]  }
  0x17   : > { %1937 = vmatprep.mubr.msk.bf16.mxu0 %vm556_vm2, %v2051_v9  ;;  %1989 = vmatprep.mubr.msk.bf16.mxu1 %vm556_vm2, %v2052_v10  ;;  %v2059_v17 = vld [vmem:[%s2148_s22 + $0x30] sm:$0xff]   ;;  %v2060_v18 = vld [vmem:[%s2148_s22 + $0x100] sm:$0xff]   ;;  %v2061_v19 = vld [vmem:[%s2148_s22 + $0x38] sm:$0xff]  }
  0x18   : > { %v2062_v20 = vld [vmem:[%s2148_s22 + $0x108] sm:$0xff]   ;;  %v2063_v21 = vld [vmem:[%s2148_s22 + $0x40] sm:$0xff]   ;;  %v2064_v22 = vld [vmem:[%s2148_s22 + $0x110] sm:$0xff]  }
  0x19   : > { %v2065_v23 = vld [vmem:[%s2148_s22 + $0x48] sm:$0xff]   ;;  %v2066_v24 = vld [vmem:[%s2148_s22 + $0x118] sm:$0xff]   ;;  %v2067_v25 = vld [vmem:[%s2148_s22 + $0x50] sm:$0xff]  }
  0x1a   : > { %v2068_v26 = vld [vmem:[%s2148_s22 + $0x120] sm:$0xff]   ;;  %v2069_v27 = vld [vmem:[%s2148_s22 + $0x58] sm:$0xff]   ;;  %v2070_v28 = vld [vmem:[%s2148_s22 + $0x128] sm:$0xff]  }
  0x1b   : > { %v2071_v29 = vld [vmem:[%s2148_s22 + $0x60] sm:$0xff]   ;;  %v2072_v30 = vld [vmem:[%s2148_s22 + $0x130] sm:$0xff]   ;;  %v2073_v31 = vld [vmem:[%s2148_s22 + $0x68] sm:$0xff]  }
  0x1c   : > { %v2074_v32 = vld [vmem:[%s2148_s22 + $0x138] sm:$0xff]   ;;  %v2075_v33 = vld [vmem:[%s2148_s22 + $0x70] sm:$0xff]   ;;  %v2076_v34 = vld [vmem:[%s2148_s22 + $0x140] sm:$0xff]  }
  0x1d   : > { %v2077_v35 = vld [vmem:[%s2148_s22 + $0x78] sm:$0xff]   ;;  %v2078_v36 = vld [vmem:[%s2148_s22 + $0x148] sm:$0xff]   ;;  %v2079_v37 = vld [vmem:[%s2148_s22 + $0x80] sm:$0xff]  }
  0x1e   : > { %1938 = vmatmul.mubr.msk.bf16.gmra.mrb[4].mxu0 %vm556_vm2, %v2053_v11  ;;  %1990 = vmatmul.mubr.msk.bf16.gmra.mrb[4].mxu1 %vm556_vm2, %v2054_v12  ;;  %v2080_v38 = vld [vmem:[%s2148_s22 + $0x150] sm:$0xff]   ;;  %v2081_v39 = vld [vmem:[%s2148_s22 + $0x88] sm:$0xff]   ;;  %v2082_v40 = vld [vmem:[%s2148_s22 + $0x158] sm:$0xff]  }
  0x1f   : > { %1941 = vmatprep.mubr.msk.bf16.mxu0 %vm556_vm2, %v2055_v13  ;;  %1993 = vmatprep.mubr.msk.bf16.mxu1 %vm556_vm2, %v2056_v14  ;;  %v2083_v41 = vld [vmem:[%s2148_s22 + $0x90] sm:$0xff]   ;;  %v2084_v42 = vld [vmem:[%s2148_s22 + $0x160] sm:$0xff]   ;;  %v2085_v43 = vld [vmem:[%s2148_s22 + $0x98] sm:$0xff]  }
  0x20   : > { %v2086_v44 = vld [vmem:[%s2148_s22 + $0x168] sm:$0xff]   ;;  %v2087_v45 = vld [vmem:[%s2148_s22 + $0xa0] sm:$0xff]   ;;  %v2088_v46 = vld [vmem:[%s2148_s22 + $0x170] sm:$0xff]  }
  0x21   : > { %v2089_v47 = vld [vmem:[%s2148_s22 + $0xa8] sm:$0xff]   ;;  %v2090_v48 = vld [vmem:[%s2148_s22 + $0x178] sm:$0xff]   ;;  %v2091_v49 = vld [vmem:[%s2148_s22 + $0xb0] sm:$0xff]  }
  0x22   : > { %v2092_v50 = vld [vmem:[%s2148_s22 + $0x180] sm:$0xff]   ;;  %v2093_v51 = vld [vmem:[%s2148_s22 + $0xb8] sm:$0xff]   ;;  %v2094_v52 = vld [vmem:[%s2148_s22 + $0x188] sm:$0xff]  }
  0x23   : > { %v2095_v53 = vld [vmem:[%s2148_s22 + $0xc0] sm:$0xff]   ;;  %v2096_v54 = vld [vmem:[%s2148_s22 + $0xc8] sm:$0xff]  }
  0x24   : > { %v2259_v9 = vld [vmem:[%s2792_s3] ss:$0 sm:$0xff] }
  0x26   : > { %1942 = vmatmul.mubr.msk.bf16.gmra.mrb[8].mxu0 %vm556_vm2, %v2057_v15  ;;  %1994 = vmatmul.mubr.msk.bf16.gmra.mrb[8].mxu1 %vm556_vm2, %v2058_v16 }
  0x27   : > { %1945 = vmatprep.mubr.msk.bf16.mxu0 %vm556_vm2, %v2059_v17  ;;  %1997 = vmatprep.mubr.msk.bf16.mxu1 %vm556_vm2, %v2060_v18 }
  0x2e   : > { %1946 = vmatmul.mubr.msk.bf16.gmra.mrb[12].mxu0 %vm556_vm2, %v2061_v19  ;;  %1998 = vmatmul.mubr.msk.bf16.gmra.mrb[12].mxu1 %vm556_vm2, %v2062_v20 }
  0x2f   : > { %1949 = vmatprep.mubr.msk.bf16.mxu0 %vm556_vm2, %v2063_v21  ;;  %2001 = vmatprep.mubr.msk.bf16.mxu1 %vm556_vm2, %v2064_v22 }
  0x36   : > { %1950 = vmatmul.mubr.msk.bf16.gmra.mrb[16].mxu0 %vm556_vm2, %v2065_v23  ;;  %2002 = vmatmul.mubr.msk.bf16.gmra.mrb[16].mxu1 %vm556_vm2, %v2066_v24 }
  0x37   : > { %1953 = vmatprep.mubr.msk.bf16.mxu0 %vm556_vm2, %v2067_v25  ;;  %2005 = vmatprep.mubr.msk.bf16.mxu1 %vm556_vm2, %v2068_v26 }
  0x3e   : > { %1954 = vmatmul.mubr.msk.bf16.gmra.mrb[20].mxu0 %vm556_vm2, %v2069_v27  ;;  %2006 = vmatmul.mubr.msk.bf16.gmra.mrb[20].mxu1 %vm556_vm2, %v2070_v28 }
  0x3f   : > { %1957 = vmatprep.mubr.msk.bf16.mxu0 %vm556_vm2, %v2071_v29  ;;  %2009 = vmatprep.mubr.msk.bf16.mxu1 %vm556_vm2, %v2072_v30 }
  0x46   : > { %1958 = vmatmul.mubr.msk.bf16.gmra.mrb[24].mxu0 %vm556_vm2, %v2073_v31  ;;  %2010 = vmatmul.mubr.msk.bf16.gmra.mrb[24].mxu1 %vm556_vm2, %v2074_v32 }
  0x47   : > { %1961 = vmatprep.mubr.msk.bf16.mxu0 %vm556_vm2, %v2075_v33  ;;  %2013 = vmatprep.mubr.msk.bf16.mxu1 %vm556_vm2, %v2076_v34 }
  0x4e   : > { %1962 = vmatmul.mubr.msk.bf16.gmra.mrb[28].mxu0 %vm556_vm2, %v2077_v35  ;;  %2014 = vmatmul.mubr.msk.bf16.gmra.mrb[28].mxu1 %vm556_vm2, %v2078_v36 }
  0x4f   : > { %1965 = vmatprep.mubr.msk.bf16.mxu0 %vm556_vm2, %v2079_v37  ;;  %2017 = vmatprep.mubr.msk.bf16.mxu1 %vm556_vm2, %v2080_v38 }
  0x56   : > { %1966 = vmatmul.mubr.msk.bf16.gmra.mrb[32].mxu0 %vm556_vm2, %v2081_v39  ;;  %2018 = vmatmul.mubr.msk.bf16.gmra.mrb[32].mxu1 %vm556_vm2, %v2082_v40 }
  0x57   : > { %1969 = vmatprep.mubr.msk.bf16.mxu0 %vm556_vm2, %v2083_v41  ;;  %2021 = vmatprep.mubr.msk.bf16.mxu1 %vm556_vm2, %v2084_v42 }
  0x5e   : > { %1970 = vmatmul.mubr.msk.bf16.gmra.mrb[36].mxu0 %vm556_vm2, %v2085_v43  ;;  %2022 = vmatmul.mubr.msk.bf16.gmra.mrb[36].mxu1 %vm556_vm2, %v2086_v44 }
  0x5f   : > { %1973 = vmatprep.mubr.msk.bf16.mxu0 %vm556_vm2, %v2087_v45  ;;  %2025 = vmatprep.mubr.msk.bf16.mxu1 %vm556_vm2, %v2088_v46 }
  0x66   : > { %1974 = vmatmul.mubr.msk.bf16.gmra.mrb[40].mxu0 %vm556_vm2, %v2089_v47  ;;  %2026 = vmatmul.mubr.msk.bf16.gmra.mrb[40].mxu1 %vm556_vm2, %v2090_v48 }
  0x67   : > { %1977 = vmatprep.mubr.msk.bf16.mxu0 %vm556_vm2, %v2091_v49  ;;  %2029 = vmatprep.mubr.msk.bf16.mxu1 %vm556_vm2, %v2092_v50 }
  0x6e   : > { %1978 = vmatmul.mubr.msk.bf16.gmra.mrb[44].mxu0 %vm556_vm2, %v2093_v51  ;;  %2030 = vmatmul.mubr.msk.bf16.gmra.mrb[44].mxu1 %vm556_vm2, %v2094_v52 }
  0x6f   : > { %1981 = vmatprep.mubr.msk.bf16.mxu0 %vm556_vm2, %v2095_v53 }
  0x76   : > { %1982 = vmatmul.mubr.msk.bf16.gmra.mrb[48].mxu0 %vm556_vm2, %v2096_v54 }
  0xe9   : > { %v1935_v55 = vpop.f32.mrb[0].mxu0  ;;  %v1987_v57 = vpop.f32.mrb[0].mxu1 }
  0xea   : > { %v748_v56 = vpop.f32.mrb[1].mxu0  ;;  %v956_v59 = vpop.f32.mrb[1].mxu1  ;;  %v1156_v8 = vmul.f32 %v1935_v55, %v2253_v2  ;;  %v1208_v11 = vmul.f32 %v1987_v57, %v2253_v2 }
  0xeb   : > { %v1936_v58 = vpop.f32.mrb[2].mxu0  ;;  %v1988_v61 = vpop.f32.mrb[2].mxu1  ;;  %v1154_v10 = vmul.f32 %v2253_v2, %v748_v56  ;;  %v1206_v13 = vmul.f32 %v2253_v2, %v956_v59 }
  0xec   : > { %v751_v60 = vpop.f32.mrb[3].mxu0  ;;  %v959_v62 = vpop.f32.mrb[3].mxu1  ;;  %v1157_v12 = vmul.f32 %v1936_v58, %v2253_v2  ;;  %v1209_v15 = vmul.f32 %v1988_v61, %v2253_v2  ;;  %v2269_v18 = vadd.f32 %v2259_v9, %v1156_v8  ;;  %v2276_v23 = vadd.f32 %v2259_v9, %v1208_v11 }
  0xed   : > { %v1155_v14 = vmul.f32 %v2253_v2, %v751_v60  ;;  %v1207_v16 = vmul.f32 %v2253_v2, %v959_v62  ;;  %v2273_v22 = vadd.f32 %v2259_v9, %v1154_v10  ;;  %v2284_v29 = vadd.f32 %v2259_v9, %v1206_v13 }
  0xee   : > { %v2281_v28 = vadd.f32 %v2259_v9, %v1157_v12  ;;  %v2292_v35 = vadd.f32 %v2259_v9, %v1209_v15 }
  0xef   : > { %v2289_v34 = vadd.f32 %v2259_v9, %v1155_v14  ;;  %v2295_v36 = vadd.f32 %v2259_v9, %v1207_v16 }
  0xf1   : > { %v1939_v63 = vpop.f32.mrb[4].mxu0  ;;  %v1991_v1 = vpop.f32.mrb[4].mxu1 }
  0xf2   : > { %v764_v0 = vpop.f32.mrb[5].mxu0  ;;  %v972_v4 = vpop.f32.mrb[5].mxu1  ;;  %v1160_v19 = vmul.f32 %v1939_v63, %v2253_v2  ;;  %v1212_v25 = vmul.f32 %v1991_v1, %v2253_v2 }
  0xf3   : > { %v1940_v3 = vpop.f32.mrb[6].mxu0  ;;  %v1992_v6 = vpop.f32.mrb[6].mxu1  ;;  %v1158_v24 = vmul.f32 %v2253_v2, %v764_v0  ;;  %v1210_v31 = vmul.f32 %v2253_v2, %v972_v4 }
  0xf4   : > { %v767_v5 = vpop.f32.mrb[7].mxu0  ;;  %v975_v7 = vpop.f32.mrb[7].mxu1  ;;  %v1161_v30 = vmul.f32 %v1940_v3, %v2253_v2  ;;  %v2300_v40 = vadd.f32 %v2259_v9, %v1160_v19  ;;  %v1213_v41 = vmul.f32 %v1992_v6, %v2253_v2  ;;  %v2310_v46 = vadd.f32 %v2259_v9, %v1212_v25 }
  0xf5   : > { %v1159_v37 = vmul.f32 %v2253_v2, %v767_v5  ;;  %v1211_v42 = vmul.f32 %v2253_v2, %v975_v7  ;;  %v2307_v45 = vadd.f32 %v2259_v9, %v1158_v24  ;;  %v2318_v50 = vadd.f32 %v2259_v9, %v1210_v31 }
  0xf6   : > { %v2315_v49 = vadd.f32 %v2259_v9, %v1161_v30  ;;  %v2328_v57 = vadd.f32 %v2259_v9, %v1213_v41 }
  0xf7   : > { %v2324_v54 = vadd.f32 %v2259_v9, %v1159_v37  ;;  %v2332_v59 = vadd.f32 %v2259_v9, %v1211_v42 }
  0xf9   : > { %v1943_v17 = vpop.f32.mrb[8].mxu0  ;;  %v1995_v21 = vpop.f32.mrb[8].mxu1 }
  0xfa   : > { %v780_v20 = vpop.f32.mrb[9].mxu0  ;;  %v988_v27 = vpop.f32.mrb[9].mxu1  ;;  %v1164_v58 = vmul.f32 %v1943_v17, %v2253_v2  ;;  %v1216_v1 = vmul.f32 %v1995_v21, %v2253_v2 }
  0xfb   : > { %v1944_v26 = vpop.f32.mrb[10].mxu0  ;;  %v1996_v33 = vpop.f32.mrb[10].mxu1  ;;  %v1162_v0 = vmul.f32 %v2253_v2, %v780_v20  ;;  %v1214_v8 = vmul.f32 %v2253_v2, %v988_v27 }
  0xfc   : > { %v783_v32 = vpop.f32.mrb[11].mxu0  ;;  %v991_v38 = vpop.f32.mrb[11].mxu1  ;;  %v1165_v7 = vmul.f32 %v1944_v26, %v2253_v2  ;;  %v1217_v14 = vmul.f32 %v1996_v33, %v2253_v2  ;;  %v2348_v19 = vadd.f32 %v2259_v9, %v1164_v58  ;;  %v2356_v25 = vadd.f32 %v2259_v9, %v1216_v1 }
  0xfd   : > { %v1163_v13 = vmul.f32 %v2253_v2, %v783_v32  ;;  %v1215_v15 = vmul.f32 %v2253_v2, %v991_v38  ;;  %v2353_v24 = vadd.f32 %v2259_v9, %v1162_v0  ;;  %v2364_v31 = vadd.f32 %v2259_v9, %v1214_v8 }
  0xfe   : > { %v2361_v30 = vadd.f32 %v2259_v9, %v1165_v7  ;;  %v2372_v38 = vadd.f32 %v2259_v9, %v1217_v14 }
  0xff   : > { %v2369_v37 = vadd.f32 %v2259_v9, %v1163_v13  ;;  %v2375_v41 = vadd.f32 %v2259_v9, %v1215_v15 }
 0x101   : > { %v1947_v55 = vpop.f32.mrb[12].mxu0  ;;  %v1999_v61 = vpop.f32.mrb[12].mxu1 }
 0x102   : > { %v796_v60 = vpop.f32.mrb[13].mxu0  ;;  %v1004_v4 = vpop.f32.mrb[13].mxu1  ;;  %v1168_v21 = vmul.f32 %v1947_v55, %v2253_v2  ;;  %v1220_v27 = vmul.f32 %v1999_v61, %v2253_v2 }
 0x103   : > { %v1948_v3 = vpop.f32.mrb[14].mxu0  ;;  %v2000_v11 = vpop.f32.mrb[14].mxu1  ;;  %v1166_v26 = vmul.f32 %v2253_v2, %v796_v60  ;;  %v1218_v33 = vmul.f32 %v2253_v2, %v1004_v4 }
 0x104   : > { %v799_v10 = vpop.f32.mrb[15].mxu0  ;;  %v1007_v16 = vpop.f32.mrb[15].mxu1  ;;  %v1169_v32 = vmul.f32 %v1948_v3, %v2253_v2  ;;  %v2380_v60 = vadd.f32 %v2259_v9, %v1168_v21  ;;  %v1221_v61 = vmul.f32 %v2000_v11, %v2253_v2 }
 0x105   : > { %v1167_v42 = vmul.f32 %v2253_v2, %v799_v10  ;;  %v1219_v0 = vmul.f32 %v2253_v2, %v1007_v16  ;;  %v2387_v8 = vadd.f32 %v2259_v9, %v1166_v26  ;;  %v2390_v10 = vadd.f32 %v2259_v9, %v1220_v27 }
 0x106   : > { %v2395_v16 = vadd.f32 %v2259_v9, %v1169_v32  ;;  %v2398_v21 = vadd.f32 %v2259_v9, %v1218_v33  ;;  %v2408_v32 = vadd.f32 %v2259_v9, %v1221_v61 }
 0x107   : > { %v2404_v17 = vadd.f32 %v2259_v9, %v1167_v42  ;;  %v2412_v5 = vadd.f32 %v2259_v9, %v1219_v0 }
 0x109   : > { %v1951_v55 = vpop.f32.mrb[16].mxu0  ;;  %v2003_v3 = vpop.f32.mrb[16].mxu1 }
 0x10a   : > { %v812_v1 = vpop.f32.mrb[17].mxu0  ;;  %v1020_v14 = vpop.f32.mrb[17].mxu1  ;;  %v1172_v33 = vmul.f32 %v1951_v55, %v2253_v2  ;;  %v1224_v42 = vmul.f32 %v2003_v3, %v2253_v2 }
 0x10b   : > { %v1952_v13 = vpop.f32.mrb[18].mxu0  ;;  %v2004_v7 = vpop.f32.mrb[18].mxu1  ;;  %v1170_v27 = vmul.f32 %v2253_v2, %v812_v1  ;;  %v1222_v62 = vmul.f32 %v2253_v2, %v1020_v14 }
 0x10c   : > { %v815_v4 = vpop.f32.mrb[19].mxu0  ;;  %v1023_v15 = vpop.f32.mrb[19].mxu1  ;;  %v1173_v61 = vmul.f32 %v1952_v13, %v2253_v2  ;;  %v1225_v26 = vmul.f32 %v2004_v7, %v2253_v2  ;;  %v2428_v3 = vadd.f32 %v2259_v9, %v1172_v33 }
 0x10d   : > { %v1171_v0 = vmul.f32 %v2253_v2, %v815_v4  ;;  %v1223_v58 = vmul.f32 %v2253_v2, %v1023_v15  ;;  %v2433_v55 = vadd.f32 %v2259_v9, %v1170_v27  ;;  %v2436_v4 = vadd.f32 %v2259_v9, %v1224_v42 }
 0x10e   : > { %v2441_v33 = vadd.f32 %v2259_v9, %v1173_v61  ;;  %v2444_v6 = vadd.f32 %v2259_v9, %v1222_v62 }
 0x10f   : > { %v2449_v42 = vadd.f32 %v2259_v9, %v1171_v0 }
 0x111   : > { %v1955_v63 = vpop.f32.mrb[20].mxu0  ;;  %v2007_v14 = vpop.f32.mrb[20].mxu1 }
 0x112   : > { %v1176_v13 = vmul.f32 %v1955_v63, %v2253_v2  ;;  %v828_v11 = vpop.f32.mrb[21].mxu0  ;;  %v1228_v1 = vmul.f32 %v2007_v14, %v2253_v2  ;;  %v1036_v56 = vpop.f32.mrb[21].mxu1  ;;  %v2455_v14 = vadd.f32 %v2259_v9, %v1223_v58 }
 0x113   : > { %v1174_v7 = vmul.f32 %v2253_v2, %v828_v11  ;;  %v1956_v15 = vpop.f32.mrb[22].mxu0  ;;  %v1226_v27 = vmul.f32 %v2253_v2, %v1036_v56  ;;  %v2008_v47 = vpop.f32.mrb[22].mxu1  ;;  %v2452_v11 = vadd.f32 %v2259_v9, %v1225_v26 }
 0x114   : > { %v1177_v63 = vmul.f32 %v1956_v15, %v2253_v2  ;;  %v831_v52 = vpop.f32.mrb[23].mxu0  ;;  %v1039_v20 = vpop.f32.mrb[23].mxu1  ;;  %v2460_v15 = vadd.f32 %v2259_v9, %v1176_v13  ;;  %v2466_v0 = vadd.f32 %v2259_v9, %v1228_v1 }
 0x115   : > { %v1175_v61 = vmul.f32 %v2253_v2, %v831_v52  ;;  %v2463_v56 = vadd.f32 %v2259_v9, %v1174_v7  ;;  %v2473_v58 = vadd.f32 %v2259_v9, %v1226_v27  ;;  %v1229_v52 = vmul.f32 %v2008_v47, %v2253_v2 }
 0x116   : > { %2800 = vst [vmem:[#allocation2_spill] sm:$0xff] %v2460_v15  ;;  %2802 = vst [vmem:[#allocation4_spill] sm:$0xff] %v2466_v0  ;;  %v2470_v12 = vadd.f32 %v2259_v9, %v1177_v63  ;;  %v1227_v1 = vmul.f32 %v2253_v2, %v1039_v20 }
 0x117   : > { %2801 = vst [vmem:[#allocation3_spill] sm:$0xff] %v2463_v56  ;;  %2804 = vst [vmem:[#allocation6_spill] sm:$0xff] %v2473_v58  ;;  %v2479_v7 = vadd.f32 %v2259_v9, %v1175_v61  ;;  %v2493_v26 = vadd.f32 %v2259_v9, %v1229_v52 }
 0x118   : > { %2803 = vst [vmem:[#allocation5_spill] sm:$0xff] %v2470_v12  ;;  %v2498_v62 = vadd.f32 %v2259_v9, %v1227_v1 }
 0x119   : > { %v1959_v43 = vpop.f32.mrb[24].mxu0  ;;  %v2011_v44 = vpop.f32.mrb[24].mxu1  ;;  %2805 = vst [vmem:[#allocation7_spill] sm:$0xff] %v2493_v26 }
 0x11a   : > { %v1180_v61 = vmul.f32 %v1959_v43, %v2253_v2  ;;  %v844_v39 = vpop.f32.mrb[25].mxu0  ;;  %v1232_v63 = vmul.f32 %v2011_v44, %v2253_v2  ;;  %v1052_v27 = vpop.f32.mrb[25].mxu1 }
 0x11b   : > { %v1960_v53 = vpop.f32.mrb[26].mxu0  ;;  %v2012_v51 = vpop.f32.mrb[26].mxu1  ;;  %v1178_v52 = vmul.f32 %v2253_v2, %v844_v39  ;;  %v1230_v47 = vmul.f32 %v2253_v2, %v1052_v27 }
 0x11c   : > { %v1287_v43 = vadd.f32 %v2259_v9, %v1180_v61  ;;  %v1181_v13 = vmul.f32 %v1960_v53, %v2253_v2  ;;  %v847_v20 = vpop.f32.mrb[27].mxu0  ;;  %v1339_v48 = vadd.f32 %v2259_v9, %v1232_v63  ;;  %v1233_v12 = vmul.f32 %v2012_v51, %v2253_v2  ;;  %v1055_v58 = vpop.f32.mrb[27].mxu1 }
 0x11d   : > { %v1179_v44 = vmul.f32 %v2253_v2, %v847_v20  ;;  %v1231_v61 = vmul.f32 %v2253_v2, %v1055_v58  ;;  %v2806_v51 = vmax.f32 %v2289_v34, 0.0  ;;  %v2808_v58 = vmax.f32 %v2295_v36, 0.0 }
 0x11e   : > { %v1387_v56 = vmax.f32 %v1287_v43, 0.0  ;;  %v1288_v1 = vadd.f32 %v2259_v9, %v1181_v13  ;;  %v1439_v0 = vmax.f32 %v1339_v48, 0.0  ;;  %v1340_v15 = vadd.f32 %v2259_v9, %v1233_v12 }
 0x11f   : > { %v1286_v63 = vadd.f32 %v2259_v9, %v1179_v44  ;;  %v1338_v13 = vadd.f32 %v2259_v9, %v1231_v61  ;;  %v2521_v48 = vadd.f32 %v2259_v9, %v1178_v52  ;;  %v2524_v26 = vadd.f32 %v2259_v9, %v1230_v47 }
 0x120   : > { %v2515_v20 = vmax.f32 %v2806_v51, %v1387_v56  ;;  %v1388_v27 = vmax.f32 %v1288_v1, 0.0  ;;  %v1489_v43 = vmax.f32 %v2808_v58, %v1439_v0  ;;  %v1440_v12 = vmax.f32 %v1340_v15, 0.0 }
 0x121   : > { %2809 = vst [vmem:[#allocation9_spill] sm:$0xff] %v2521_v48  ;;  %v1386_v53 = vmax.f32 %v1286_v63, 0.0  ;;  %v1963_v44 = vpop.f32.mrb[28].mxu0  ;;  %2810 = vst [vmem:[#allocation10_spill] sm:$0xff] %v2524_v26  ;;  %v2811_v34 = vmax.f32 %v2269_v18, 0.0  ;;  %v1438_v51 = vmax.f32 %v1338_v13, 0.0 }
 0x122   : > { %2807 = vst [vmem:[#allocation8_spill] sm:$0xff] %v2515_v20  ;;  %v1184_v1 = vmul.f32 %v1963_v44, %v2253_v2  ;;  %v2015_v39 = vpop.f32.mrb[28].mxu1  ;;  %v860_v61 = vpop.f32.mrb[29].mxu0  ;;  %v2812_v36 = vmax.f32 %v2276_v23, 0.0  ;;  %v2813_v52 = vmax.f32 %v2273_v22, 0.0 }
 0x123   : > { %v1463_v56 = vmax.f32 %v2811_v34, %v1388_v27  ;;  %v1236_v15 = vmul.f32 %v2015_v39, %v2253_v2  ;;  %v1182_v47 = vmul.f32 %v2253_v2, %v860_v61  ;;  %v1068_v63 = vpop.f32.mrb[29].mxu1  ;;  %v1964_v18 = vpop.f32.mrb[30].mxu0  ;;  %v2815_v27 = vmax.f32 %v2284_v29, 0.0 }
 0x124   : > { %v1490_v0 = vmax.f32 %v2812_v36, %v1440_v12  ;;  %v2533_v58 = vmax.f32 %v2813_v52, %v1386_v53  ;;  %v1291_v44 = vadd.f32 %v2259_v9, %v1184_v1  ;;  %v1234_v34 = vmul.f32 %v2253_v2, %v1068_v63  ;;  %v2016_v12 = vpop.f32.mrb[30].mxu1  ;;  %v863_v22 = vpop.f32.mrb[31].mxu0 }
 0x125   : > { %v1488_v13 = vmax.f32 %v2815_v27, %v1438_v51  ;;  %v1185_v23 = vmul.f32 %v1964_v18, %v2253_v2  ;;  %v1343_v53 = vadd.f32 %v2259_v9, %v1236_v15  ;;  %v1289_v36 = vadd.f32 %v2259_v9, %v1182_v47  ;;  %v1071_v52 = vpop.f32.mrb[31].mxu1 }
 0x126   : > { %2814 = vst [vmem:[#allocation11_spill] sm:$0xff] %v2533_v58  ;;  %v1237_v39 = vmul.f32 %v2016_v12, %v2253_v2  ;;  %v1183_v61 = vmul.f32 %v2253_v2, %v863_v22  ;;  %v1391_v29 = vmax.f32 %v1291_v44, 0.0  ;;  %v1341_v51 = vadd.f32 %v2259_v9, %v1234_v34 }
 0x127   : > { %v1513_v20 = vmax.f32 %v1463_v56, %v1488_v13  ;;  %v1292_v1 = vadd.f32 %v2259_v9, %v1185_v23  ;;  %v1443_v15 = vmax.f32 %v1343_v53, 0.0  ;;  %v1389_v63 = vmax.f32 %v1289_v36, 0.0 }
 0x128   : > { %v1344_v47 = vadd.f32 %v2259_v9, %v1237_v39  ;;  %v1290_v18 = vadd.f32 %v2259_v9, %v1183_v61  ;;  %v2816_v56 = vmax.f32 %v2324_v54, 0.0  ;;  %v1441_v44 = vmax.f32 %v1341_v51, 0.0 }
 0x129   : > { %v1857_v27 = vpack.c.bf16 %v1513_v20, %v1513_v20  ;;  %v1392_v34 = vmax.f32 %v1292_v1, 0.0  ;;  %v2817_v23 = vmax.f32 %v2332_v59, 0.0  ;;  %v2818_v22 = vmax.f32 %v2281_v28, 0.0  ;;  %v1967_v53 = vpop.f32.mrb[32].mxu0  ;;  %v2019_v59 = vpop.f32.mrb[32].mxu1 }
 0x12a   : > { %v1466_v13 = vmax.f32 %v2816_v56, %v1391_v29  ;;  %v1444_v48 = vmax.f32 %v1344_v47, 0.0  ;;  %v1390_v26 = vmax.f32 %v1290_v18, 0.0  ;;  %v2819_v36 = vmax.f32 %v2292_v35, 0.0  ;;  %v876_v51 = vpop.f32.mrb[33].mxu0  ;;  %v1084_v18 = vpop.f32.mrb[33].mxu1 }
 0x12b   : > { %v1493_v12 = vmax.f32 %v2817_v23, %v1443_v15  ;;  %v1464_v58 = vmax.f32 %v2818_v22, %v1389_v63  ;;  %1640 = vst.msk [vmem:[%s2552_s30 + $0x8] sm:$0xf] %vm1637_vm3, %v1857_v27  ;;  %v2820_v20 = vmax.f32 %v2300_v40, 0.0  ;;  %v1235_v61 = vmul.f32 %v2253_v2, %v1071_v52  ;;  %v1968_v27 = vpop.f32.mrb[34].mxu0 }
 0x12c   : > { %v1491_v39 = vmax.f32 %v2819_v36, %v1441_v44  ;;  %v1188_v29 = vmul.f32 %v1967_v53, %v2253_v2  ;;  %v2821_v28 = vmax.f32 %v2310_v46, 0.0  ;;  %v2822_v63 = vmax.f32 %v2307_v45, 0.0  ;;  %v879_v46 = vpop.f32.mrb[35].mxu0 }
 0x12d   : > { %v1467_v54 = vmax.f32 %v2820_v20, %v1392_v34  ;;  %v1514_v1 = vmax.f32 %v1464_v58, %v1489_v43  ;;  %v1240_v35 = vmul.f32 %v2019_v59, %v2253_v2  ;;  %v1342_v52 = vadd.f32 %v2259_v9, %v1235_v61  ;;  %v2020_v43 = vpop.f32.mrb[34].mxu1 }
 0x12e   : > { %v2572_v15 = vmax.f32 %v2821_v28, %v1444_v48  ;;  %v1465_v47 = vmax.f32 %v2822_v63, %v1390_v26  ;;  %v1516_v40 = vmax.f32 %v1466_v13, %v1491_v39  ;;  %v1295_v56 = vadd.f32 %v2259_v9, %v1188_v29  ;;  %v1087_v34 = vpop.f32.mrb[35].mxu1 }
 0x12f   : > { %v1186_v44 = vmul.f32 %v2253_v2, %v876_v51  ;;  %v1858_v48 = vpack.c.bf16 %v1514_v1, %v1514_v1  ;;  %v1347_v45 = vadd.f32 %v2259_v9, %v1240_v35  ;;  %v1238_v26 = vmul.f32 %v2253_v2, %v1084_v18 }
 0x130   : > { %v1515_v58 = vmax.f32 %v1465_v47, %v1490_v0  ;;  %v1860_v23 = vpack.c.bf16 %v1516_v40, %v1516_v40  ;;  %v1442_v22 = vmax.f32 %v1342_v52, 0.0  ;;  %v1395_v13 = vmax.f32 %v1295_v56, 0.0 }
 0x131   : > { %v1293_v53 = vadd.f32 %v2259_v9, %v1186_v44  ;;  %1641 = vst.msk [vmem:[%s2552_s30 + $0xc] sm:$0xf] %vm1637_vm3, %v1858_v48  ;;  %v1447_v39 = vmax.f32 %v1347_v45, 0.0  ;;  %v1345_v20 = vadd.f32 %v2259_v9, %v1238_v26  ;;  %v1189_v61 = vmul.f32 %v1968_v27, %v2253_v2  ;;  %v1971_v40 = vpop.f32.mrb[36].mxu0 }
 0x132   : > { %v1859_v36 = vpack.c.bf16 %v1515_v58, %v1515_v58  ;;  %1643 = vst.msk [vmem:[%s2552_s30 + $0x14] sm:$0xf] %vm1637_vm3, %v1860_v23  ;;  %v2823_v0 = vmax.f32 %v2318_v50, 0.0  ;;  %v2824_v59 = vmax.f32 %v2369_v37, 0.0  ;;  %v1241_v28 = vmul.f32 %v2020_v43, %v2253_v2  ;;  %v2023_v43 = vpop.f32.mrb[36].mxu1  ;;  %v892_v48 = vpop.f32.mrb[37].mxu0 }
 0x133   : > { %v1393_v1 = vmax.f32 %v1293_v53, 0.0  ;;  %v2825_v63 = vmax.f32 %v2375_v41, 0.0  ;;  %v1445_v35 = vmax.f32 %v1345_v20, 0.0  ;;  %v1296_v18 = vadd.f32 %v2259_v9, %v1189_v61  ;;  %v1100_v23 = vpop.f32.mrb[37].mxu1 }
 0x134   : > { %v1492_v29 = vmax.f32 %v2823_v0, %v1442_v22  ;;  %v1470_v51 = vmax.f32 %v2824_v59, %v1395_v13  ;;  %1642 = vst.msk [vmem:[%s2552_s30 + $0x10] sm:$0xf] %vm1637_vm3, %v1859_v36  ;;  %v1187_v27 = vmul.f32 %v2253_v2, %v879_v46  ;;  %v2826_v52 = vmax.f32 %v2315_v49, 0.0  ;;  %v2024_v36 = vpop.f32.mrb[38].mxu1 }
 0x135   : > { %v2598_v47 = vmax.f32 %v2825_v63, %v1447_v39  ;;  %v1348_v56 = vadd.f32 %v2259_v9, %v1241_v28  ;;  %v1239_v44 = vmul.f32 %v2253_v2, %v1087_v34  ;;  %v2827_v41 = vmax.f32 %v2328_v57, 0.0 }
 0x136   : > { %v1517_v50 = vmax.f32 %v1467_v54, %v1492_v29  ;;  %v1468_v37 = vmax.f32 %v2826_v52, %v1393_v1  ;;  %v1396_v45 = vmax.f32 %v1296_v18, 0.0  ;;  %v1294_v26 = vadd.f32 %v2259_v9, %v1187_v27  ;;  %v1972_v54 = vpop.f32.mrb[38].mxu0  ;;  %v1103_v29 = vpop.f32.mrb[39].mxu1 }
 0x137   : > { %v1495_v58 = vmax.f32 %v2827_v41, %v1445_v35  ;;  %v1192_v46 = vmul.f32 %v1971_v40, %v2253_v2  ;;  %v1448_v13 = vmax.f32 %v1348_v56, 0.0  ;;  %v1346_v53 = vadd.f32 %v2259_v9, %v1239_v44  ;;  %v895_v34 = vpop.f32.mrb[39].mxu0 }
 0x138   : > { %v1861_v22 = vpack.c.bf16 %v1517_v50, %v1517_v50  ;;  %v1518_v49 = vmax.f32 %v1468_v37, %v1493_v12  ;;  %v2828_v57 = vmax.f32 %v2348_v19, 0.0  ;;  %v1394_v61 = vmax.f32 %v1294_v26, 0.0 }
 0x139   : > { %v1520_v39 = vmax.f32 %v1470_v51, %v1495_v58  ;;  %v1299_v0 = vadd.f32 %v2259_v9, %v1192_v46  ;;  %v2829_v12 = vmax.f32 %v2356_v25, 0.0  ;;  %v1446_v28 = vmax.f32 %v1346_v53, 0.0  ;;  %v1975_v41 = vpop.f32.mrb[40].mxu0  ;;  %v2027_v46 = vpop.f32.mrb[40].mxu1 }
 0x13a   : > { %v1471_v20 = vmax.f32 %v2828_v57, %v1396_v45  ;;  %1644 = vst.msk [vmem:[%s2552_s30 + $0x18] sm:$0xf] %vm1637_vm3, %v1861_v22  ;;  %v1862_v59 = vpack.c.bf16 %v1518_v49, %v1518_v49  ;;  %v1244_v63 = vmul.f32 %v2023_v43, %v2253_v2  ;;  %v2830_v51 = vmax.f32 %v2353_v24, 0.0  ;;  %v1116_v49 = vpop.f32.mrb[41].mxu1 }
 0x13b   : > { %v2618_v1 = vmax.f32 %v2829_v12, %v1448_v13  ;;  %v1864_v35 = vpack.c.bf16 %v1520_v39, %v1520_v39  ;;  %v1399_v18 = vmax.f32 %v1299_v0, 0.0  ;;  %v1190_v27 = vmul.f32 %v2253_v2, %v892_v48 }
 0x13c   : > { %v1469_v19 = vmax.f32 %v2830_v51, %v1394_v61  ;;  %1645 = vst.msk [vmem:[%s2552_s30 + $0x1c] sm:$0xf] %vm1637_vm3, %v1862_v59  ;;  %v2831_v40 = vmax.f32 %v2364_v31, 0.0  ;;  %v1351_v52 = vadd.f32 %v2259_v9, %v1244_v63  ;;  %v1242_v25 = vmul.f32 %v2253_v2, %v1100_v23  ;;  %v908_v23 = vpop.f32.mrb[41].mxu0  ;;  %v2028_v61 = vpop.f32.mrb[42].mxu1 }
 0x13d   : > { %v1193_v37 = vmul.f32 %v1972_v54, %v2253_v2  ;;  %1647 = vst.msk [vmem:[%s2552_s30 + $0x24] sm:$0xf] %vm1637_vm3, %v1864_v35  ;;  %v2832_v24 = vmax.f32 %v2404_v17, 0.0  ;;  %v1297_v43 = vadd.f32 %v2259_v9, %v1190_v27  ;;  %v1245_v48 = vmul.f32 %v2024_v36, %v2253_v2  ;;  %v1976_v13 = vpop.f32.mrb[42].mxu0  ;;  %v1119_v35 = vpop.f32.mrb[43].mxu1 }
 0x13e   : > { %v1496_v50 = vmax.f32 %v2831_v40, %v1446_v28  ;;  %v1519_v56 = vmax.f32 %v1469_v19, %v2572_v15  ;;  %v1451_v58 = vmax.f32 %v1351_v52, 0.0  ;;  %v1349_v45 = vadd.f32 %v2259_v9, %v1242_v25  ;;  %v911_v0 = vpop.f32.mrb[43].mxu0 }
 0x13f   : > { %v1474_v44 = vmax.f32 %v2832_v24, %v1399_v18  ;;  %v1300_v26 = vadd.f32 %v2259_v9, %v1193_v37  ;;  %v1397_v22 = vmax.f32 %v1297_v43, 0.0  ;;  %v1352_v15 = vadd.f32 %v2259_v9, %v1245_v48 }
 0x140   : > { %v1521_v31 = vmax.f32 %v1471_v20, %v1496_v50  ;;  %v1863_v54 = vpack.c.bf16 %v1519_v56, %v1519_v56  ;;  %v1191_v17 = vmul.f32 %v2253_v2, %v895_v34  ;;  %v2833_v36 = vmax.f32 %v2412_v5, 0.0 }
 0x141   : > { %v1449_v57 = vmax.f32 %v1349_v45, 0.0  ;;  %v1400_v20 = vmax.f32 %v1300_v26, 0.0  ;;  %v2834_v59 = vmax.f32 %v2361_v30, 0.0  ;;  %v1452_v28 = vmax.f32 %v1352_v15, 0.0  ;;  %v2031_v26 = vpop.f32.mrb[44].mxu1 }
 0x142   : > { %v1865_v53 = vpack.c.bf16 %v1521_v31, %v1521_v31  ;;  %v2644_v39 = vmax.f32 %v2833_v36, %v1451_v58  ;;  %1646 = vst.msk [vmem:[%s2552_s30 + $0x20] sm:$0xf] %vm1637_vm3, %v1863_v54  ;;  %v1298_v63 = vadd.f32 %v2259_v9, %v1191_v17  ;;  %v1243_v34 = vmul.f32 %v2253_v2, %v1103_v29  ;;  %v1132_v17 = vpop.f32.mrb[45].mxu1 }
 0x143   : > { %v1472_v12 = vmax.f32 %v2834_v59, %v1397_v22  ;;  %v2835_v5 = vmax.f32 %v2372_v38, 0.0  ;;  %v2836_v19 = vmax.f32 %v2380_v60, 0.0  ;;  %v1196_v27 = vmul.f32 %v1975_v41, %v2253_v2  ;;  %v1979_v41 = vpop.f32.mrb[44].mxu0  ;;  %v2032_v59 = vpop.f32.mrb[46].mxu1 }
 0x144   : > { %1648 = vst.msk [vmem:[%s2552_s30 + $0x28] sm:$0xf] %vm1637_vm3, %v1865_v53  ;;  %v1248_v40 = vmul.f32 %v2027_v46, %v2253_v2  ;;  %v2837_v50 = vmax.f32 %v2390_v10, 0.0  ;;  %v1398_v29 = vmax.f32 %v1298_v63, 0.0  ;;  %v1350_v25 = vadd.f32 %v2259_v9, %v1243_v34  ;;  %v924_v46 = vpop.f32.mrb[45].mxu0 }
 0x145   : > { %v1499_v51 = vmax.f32 %v2835_v5, %v1449_v57  ;;  %v1475_v18 = vmax.f32 %v2836_v19, %v1400_v20  ;;  %v1522_v30 = vmax.f32 %v1472_v12, %v2598_v47  ;;  %v1303_v38 = vadd.f32 %v2259_v9, %v1196_v27  ;;  %v1135_v5 = vpop.f32.mrb[47].mxu1 }
 0x146   : > { %v2663_v52 = vmax.f32 %v2837_v50, %v1452_v28  ;;  %v1355_v60 = vadd.f32 %v2259_v9, %v1248_v40  ;;  %v1194_v56 = vmul.f32 %v2253_v2, %v908_v23  ;;  %v2838_v43 = vmax.f32 %v2387_v8, 0.0 }
 0x147   : > { %v1524_v37 = vmax.f32 %v1474_v44, %v1499_v51  ;;  %v1866_v24 = vpack.c.bf16 %v1522_v30, %v1522_v30  ;;  %v1450_v47 = vmax.f32 %v1350_v25, 0.0  ;;  %v1246_v10 = vmul.f32 %v2253_v2, %v1116_v49  ;;  %v1980_v49 = vpop.f32.mrb[46].mxu0 }
 0x148   : > { %v1473_v48 = vmax.f32 %v2838_v43, %v1398_v29  ;;  %v1403_v58 = vmax.f32 %v1303_v38, 0.0  ;;  %v1455_v45 = vmax.f32 %v1355_v60, 0.0  ;;  %v1301_v44 = vadd.f32 %v2259_v9, %v1194_v56  ;;  %v927_v12 = vpop.f32.mrb[47].mxu0 }
 0x149   : > { %v1868_v31 = vpack.c.bf16 %v1524_v37, %v1524_v37  ;;  %1649 = vst.msk [vmem:[%s2552_s30 + $0x2c] sm:$0xf] %vm1637_vm3, %v1866_v24  ;;  %v2839_v54 = vmax.f32 %v2398_v21, 0.0  ;;  %v1353_v22 = vadd.f32 %v2259_v9, %v1246_v10  ;;  %v1197_v15 = vmul.f32 %v1976_v13, %v2253_v2  ;;  %v1983_v56 = vpop.f32.mrb[48].mxu0 }
 0x14a   : > { %v1523_v23 = vmax.f32 %v1473_v48, %v2618_v1  ;;  %v2840_v53 = vmax.f32 %v2449_v42, 0.0  ;;  %v2841_v57 = vmax.f32 %v2455_v14, 0.0  ;;  %v1401_v1 = vmax.f32 %v1301_v44, 0.0  ;;  %v940_v10 = vpop.f32.mrb[49].mxu0 }
 0x14b   : > { %v1500_v8 = vmax.f32 %v2839_v54, %v1450_v47  ;;  %1651 = vst.msk [vmem:[%s2552_s30 + $0x34] sm:$0xf] %vm1637_vm3, %v1868_v31  ;;  %v1249_v21 = vmul.f32 %v2028_v61, %v2253_v2  ;;  %v1453_v13 = vmax.f32 %v1353_v22, 0.0  ;;  %v1304_v34 = vadd.f32 %v2259_v9, %v1197_v15 }
 0x14c   : > { %v1478_v36 = vmax.f32 %v2840_v53, %v1403_v58  ;;  %v2686_v20 = vmax.f32 %v2841_v57, %v1455_v45  ;;  %v1867_v28 = vpack.c.bf16 %v1523_v23, %v1523_v23  ;;  %v2842_v42 = vmax.f32 %v2395_v16, 0.0  ;;  %v1984_v45 = vpop.f32.mrb[50].mxu0 }
 0x14d   : > { %v1525_v63 = vmax.f32 %v1475_v18, %v1500_v8  ;;  %v1356_v19 = vadd.f32 %v2259_v9, %v1249_v21  ;;  %v1195_v14 = vmul.f32 %v2253_v2, %v911_v0  ;;  %v1247_v27 = vmul.f32 %v2253_v2, %v1119_v35  ;;  %v943_v22 = vpop.f32.mrb[51].mxu0 }
 0x14e   : > { %v1476_v51 = vmax.f32 %v2842_v42, %v1401_v1  ;;  %1650 = vst.msk [vmem:[%s2552_s30 + $0x30] sm:$0xf] %vm1637_vm3, %v1867_v28  ;;  %v2843_v40 = vmax.f32 %v2408_v32, 0.0  ;;  %v1404_v30 = vmax.f32 %v1304_v34, 0.0  ;;  %v1200_v50 = vmul.f32 %v1979_v41, %v2253_v2 }
 0x14f   : > { %v1869_v61 = vpack.c.bf16 %v1525_v63, %v1525_v63  ;;  %v1456_v25 = vmax.f32 %v1356_v19, 0.0  ;;  %v1302_v16 = vadd.f32 %v2259_v9, %v1195_v14  ;;  %v1354_v37 = vadd.f32 %v2259_v9, %v1247_v27 }
 0x150   : > { %v1503_v18 = vmax.f32 %v2843_v40, %v1453_v13  ;;  %v1526_v29 = vmax.f32 %v1476_v51, %v2644_v39  ;;  %v2844_v35 = vmax.f32 %v2428_v3, 0.0  ;;  %v1307_v32 = vadd.f32 %v2259_v9, %v1200_v50 }
 0x151   : > { %1652 = vst.msk [vmem:[%s2552_s30 + $0x38] sm:$0xf] %vm1637_vm3, %v1869_v61  ;;  %v1252_v60 = vmul.f32 %v2031_v26, %v2253_v2  ;;  %v2845_v39 = vmax.f32 %v2436_v4, 0.0  ;;  %v1402_v48 = vmax.f32 %v1302_v16, 0.0  ;;  %v1454_v47 = vmax.f32 %v1354_v37, 0.0 }
 0x152   : > { %v1528_v0 = vmax.f32 %v1478_v36, %v1503_v18  ;;  %v1479_v38 = vmax.f32 %v2844_v35, %v1404_v30  ;;  %v1870_v24 = vpack.c.bf16 %v1526_v29, %v1526_v29  ;;  %v1407_v31 = vmax.f32 %v1307_v32, 0.0  ;;  %v2854_v29 = vld [vmem:[#allocation4_spill] sm:$0xff] }
 0x153   : > { %v1506_v43 = vmax.f32 %v2845_v39, %v1456_v25  ;;  %v1359_v58 = vadd.f32 %v2259_v9, %v1252_v60  ;;  %v1198_v3 = vmul.f32 %v2253_v2, %v924_v46  ;;  %v2846_v44 = vmax.f32 %v2433_v55, 0.0  ;;  %v2856_v60 = vld [vmem:[#allocation3_spill] sm:$0xff] }
 0x154   : > { %v1872_v41 = vpack.c.bf16 %v1528_v0, %v1528_v0  ;;  %1653 = vst.msk [vmem:[%s2552_s30 + $0x3c] sm:$0xf] %vm1637_vm3, %v1870_v24  ;;  %v2847_v23 = vmax.f32 %v2444_v6, 0.0  ;;  %v1250_v54 = vmul.f32 %v2253_v2, %v1132_v17  ;;  %v1201_v8 = vmul.f32 %v1980_v49, %v2253_v2 }
 0x155   : > { %v1477_v26 = vmax.f32 %v2846_v44, %v1402_v48  ;;  %v2848_v15 = vmax.f32 %v2479_v7, 0.0  ;;  %v1459_v46 = vmax.f32 %v1359_v58, 0.0  ;;  %v1305_v36 = vadd.f32 %v2259_v9, %v1198_v3  ;;  %v2858_v58 = vld [vmem:[#allocation6_spill] sm:$0xff] }
 0x156   : > { %v1504_v4 = vmax.f32 %v2847_v23, %v1454_v47  ;;  %1655 = vst.msk [vmem:[%s2552_s30 + $0x44] sm:$0xf] %vm1637_vm3, %v1872_v41  ;;  %v1253_v57 = vmul.f32 %v2032_v59, %v2253_v2  ;;  %v1357_v17 = vadd.f32 %v2259_v9, %v1250_v54  ;;  %v1308_v49 = vadd.f32 %v2259_v9, %v1201_v8  ;;  %v2863_v8 = vld [vmem:[#allocation5_spill] sm:$0xff] }
 0x157   : > { %v1482_v53 = vmax.f32 %v2848_v15, %v1407_v31  ;;  %v1527_v55 = vmax.f32 %v1477_v26, %v2663_v52  ;;  %v2849_v1 = vmax.f32 %v2498_v62, 0.0  ;;  %v1405_v28 = vmax.f32 %v1305_v36, 0.0  ;;  %v2860_v26 = vld [vmem:[#allocation10_spill] sm:$0xff] }
 0x158   : > { %v1529_v6 = vmax.f32 %v1479_v38, %v1504_v4  ;;  %v1360_v7 = vadd.f32 %v2259_v9, %v1253_v57  ;;  %v1199_v63 = vmul.f32 %v2253_v2, %v927_v12  ;;  %v1457_v59 = vmax.f32 %v1357_v17, 0.0  ;;  %v2852_v12 = vld [vmem:[#allocation2_spill] sm:$0xff]  ;;  %v2861_v4 = vld [vmem:[#allocation7_spill] sm:$0xff] }
 0x159   : > { %v1509_v21 = vmax.f32 %v2849_v1, %v1459_v46  ;;  %v1871_v13 = vpack.c.bf16 %v1527_v55, %v1527_v55  ;;  %v1408_v42 = vmax.f32 %v1308_v49, 0.0  ;;  %v2850_v52 = vmax.f32 %v2441_v33, 0.0  ;;  %v2865_v46 = vld [vmem:[#allocation9_spill] sm:$0xff] }
 0x15a   : > { %v1873_v34 = vpack.c.bf16 %v1529_v6, %v1529_v6  ;;  %v1460_v19 = vmax.f32 %v1360_v7, 0.0  ;;  %v1306_v14 = vadd.f32 %v2259_v9, %v1199_v63  ;;  %v1251_v27 = vmul.f32 %v2253_v2, %v1135_v5 }
 0x15b   : > { %v1480_v51 = vmax.f32 %v2850_v52, %v1405_v28  ;;  %1654 = vst.msk [vmem:[%s2552_s30 + $0x40] sm:$0xf] %vm1637_vm3, %v1871_v13  ;;  %v2851_v62 = vmax.f32 %v2452_v11, 0.0  ;;  %v2853_v40 = vmax.f32 %v2852_v12, 0.0  ;;  %v1204_v30 = vmul.f32 %v1983_v56, %v2253_v2  ;;  %v2867_v13 = vld [vmem:[#allocation8_spill] sm:$0xff] }
 0x15c   : > { %1656 = vst.msk [vmem:[%s2552_s30 + $0x48] sm:$0xf] %vm1637_vm3, %v1873_v34  ;;  %v1202_v33 = vmul.f32 %v2253_v2, %v940_v10  ;;  %v2855_v25 = vmax.f32 %v2854_v29, 0.0  ;;  %v1406_v16 = vmax.f32 %v1306_v14, 0.0  ;;  %v1358_v37 = vadd.f32 %v2259_v9, %v1251_v27 }
 0x15d   : > { %v1507_v61 = vmax.f32 %v2851_v62, %v1457_v59  ;;  %v1483_v18 = vmax.f32 %v2853_v40, %v1408_v42  ;;  %v1530_v50 = vmax.f32 %v1480_v51, %v2686_v20  ;;  %v1311_v11 = vadd.f32 %v2259_v9, %v1204_v30 }
 0x15e   : > { %v1510_v5 = vmax.f32 %v2855_v25, %v1460_v19  ;;  %v1309_v35 = vadd.f32 %v2259_v9, %v1202_v33  ;;  %v1205_v38 = vmul.f32 %v1984_v45, %v2253_v2  ;;  %v2857_v56 = vmax.f32 %v2856_v60, 0.0 }
 0x15f   : > { %v1532_v0 = vmax.f32 %v1482_v53, %v1507_v61  ;;  %v1874_v32 = vpack.c.bf16 %v1530_v50, %v1530_v50  ;;  %v1458_v20 = vmax.f32 %v1358_v37, 0.0  ;;  %v1203_v39 = vmul.f32 %v2253_v2, %v943_v22 }
 0x160   : > { %v1481_v24 = vmax.f32 %v2857_v56, %v1406_v16  ;;  %v1411_v47 = vmax.f32 %v1311_v11, 0.0  ;;  %v1409_v10 = vmax.f32 %v1309_v35, 0.0  ;;  %v1312_v41 = vadd.f32 %v2259_v9, %v1205_v38 }
 0x161   : > { %v1876_v48 = vpack.c.bf16 %v1532_v0, %v1532_v0  ;;  %1657 = vst.msk [vmem:[%s2552_s30 + $0x4c] sm:$0xf] %vm1637_vm3, %v1874_v32  ;;  %v2859_v3 = vmax.f32 %v2858_v58, 0.0  ;;  %v1310_v45 = vadd.f32 %v2259_v9, %v1203_v39  ;;  %v1437_v23 = vmax.f32 %v2860_v26, 0.0  ;;  %v2866_v9 = vld [vmem:[#allocation11_spill] sm:$0xff] }
 0x162   : > { %v1531_v31 = vmax.f32 %v1481_v24, %v1506_v43  ;;  %v2862_v2 = vmax.f32 %v2861_v4, 0.0  ;;  %v2864_v22 = vmax.f32 %v2863_v8, 0.0  ;;  %v1412_v53 = vmax.f32 %v1312_v41, 0.0 }
 0x163   : > { %v1508_v44 = vmax.f32 %v2859_v3, %v1458_v20  ;;  %1659 = vst.msk [vmem:[%s2552_s30 + $0x54] sm:$0xf] %vm1637_vm3, %v1876_v48  ;;  %v1385_v43 = vmax.f32 %v2865_v46, 0.0  ;;  %v1410_v55 = vmax.f32 %v1310_v45, 0.0 }
 0x164   : > { %v1486_v54 = vmax.f32 %v1411_v47, %v2862_v2  ;;  %v1484_v15 = vmax.f32 %v2864_v22, %v1409_v10  ;;  %v1875_v36 = vpack.c.bf16 %v1531_v31, %v1531_v31  ;;  %v1487_v49 = vmax.f32 %v1412_v53, %v1437_v23 }
 0x165   : > { %v1533_v57 = vmax.f32 %v1483_v18, %v1508_v44  ;;  %v1485_v28 = vmax.f32 %v1385_v43, %v1410_v55 }
 0x166   : > { %v1511_v6 = vmax.f32 %v2866_v9, %v1486_v54  ;;  %v1534_v17 = vmax.f32 %v1484_v15, %v1509_v21  ;;  %1658 = vst.msk [vmem:[%s2552_s30 + $0x50] sm:$0xf] %vm1637_vm3, %v1875_v36  ;;  %v1512_v34 = vmax.f32 %v2867_v13, %v1487_v49 }
 0x167   : > { %v1877_v1 = vpack.c.bf16 %v1533_v57, %v1533_v57  ;;  %v1535_v59 = vmax.f32 %v1485_v28, %v1510_v5 }
 0x168   : > { %v1855_v7 = vpack.c.bf16 %v1511_v6, %v1511_v6  ;;  %v1878_v63 = vpack.c.bf16 %v1534_v17, %v1534_v17  ;;  %v1856_v42 = vpack.c.bf16 %v1512_v34, %v1512_v34 }
 0x169   : > { %1660 = vst.msk [vmem:[%s2552_s30 + $0x58] sm:$0xf] %vm1637_vm3, %v1877_v1  ;;  %v1879_v52 = vpack.c.bf16 %v1535_v59, %v1535_v59 }
 0x16a   : > { %1638 = vst.msk [vmem:[%s2552_s30] sm:$0xf] %vm1637_vm3, %v1855_v7  ;;  %1661 = vst.msk [vmem:[%s2552_s30 + $0x5c] sm:$0xf] %vm1637_vm3, %v1878_v63 }
 0x16b   : > { %1639 = vst.msk [vmem:[%s2552_s30 + $0x4] sm:$0xf] %vm1637_vm3, %v1856_v42  ;;  %1662 = vst.msk [vmem:[%s2552_s30 + $0x60] sm:$0xf] %vm1637_vm3, %v1879_v52 }
 0x16c PF: > { %s14_s15 = sadd.s32 1, %s2103_s15  }
 0x16d   : > { %p11_p4 = scmp.ge.s32.totalorder %s14_s15, 4  }
 0x16f   :  { %13 = sbr.rel (!%p11_p4) target bundleno = 1 (0x1), region = 66 }

// kernel: simplenet_forward.4
= control target key start
LH: loop header
LB: loop body
LE: loop exit
PB: predicated region body
PF: predicated region fallthrough
CT: control target
= control target key end

     0   :  { %s1533_s15 = smov 0   ;;  %s1802_s0 = inlined_call_operand.vmem [shape: bf16[2,224,288], index: 0, kind: input, shape index: {}]   ;;  %s1803_s1 = inlined_call_operand.vmem [shape: bf16[288,64], index: 1, kind: input, shape index: {}]   ;;  %s1804_s2 = inlined_call_operand.vmem [shape: f32[1,64], index: 2, kind: input, shape index: {}]   ;;  %s1805_s3 = inlined_call_operand.vmem [shape: f32[1,64], index: 3, kind: input, shape index: {}]   ;;  %s1806_s4 = inlined_call_operand.vmem [shape: bf16[2,56,64], index: 4, kind: output, shape index: {}]  }
   0x1 LB: > { %s1153_s16 = sadd.s32 4294967295, %s1506_s15   ;;  %p1157_p0 = scmp.ge.s32.totalorder %s1506_s15, 1  ;;  %s1506_s15 = sphi %s1533_s15, %s14_s15  }
   0x2   : > { %p162_p1 = scmp.lt.s32.totalorder %s1506_s15, 3 }
   0x4   : > { %p163_p2 = pnand %p1157_p0, %p162_p1 }
   0x5   : > { %v1426_v0 = vld [vmem:[%s1803_s1 + $0x40] sm:$0xff] (!%p163_p2)   ;;  %v1428_v2 = vld [vmem:[%s1803_s1 + $0x48] sm:$0xff] (!%p163_p2)   ;;  %p188_p3 = scmp.lt.s32.totalorder (!%p163_p2), %s1153_s16, 1  ;;  %v1430_v4 = vld [vmem:[%s1803_s1 + $0x50] sm:$0xff] (!%p163_p2)   ;;  %vm609_vm0 = vcmask (!%p163_p2), 261120   ;;  %vm1090_vm1 = vcmask (!%p163_p2), 519168  }
   0x6   : > { %166 = sbr.rel (%p163_p2) target bundleno = 350 (0x15e), region = 36  ;;  %v1427_v1 = vld [vmem:[%s1803_s1] sm:$0xff] (!%p163_p2)   ;;  %1252 = vmatprep.subr.bf16.mxu0 (!%p163_p2), %v1426_v0  ;;  %1400 = vmatprep.subr.bf16.mxu1 (!%p163_p2), %v1426_v0  ;;  %v1429_v3 = vld [vmem:[%s1803_s1 + $0x8] sm:$0xff] (!%p163_p2)   ;;  %v1431_v5 = vld [vmem:[%s1803_s1 + $0x10] sm:$0xff] (!%p163_p2)  }
   0x7   : > { %1253 = vmatpush3.bf16.msra.mxu0 (!%p163_p2), %v1427_v1  ;;  %1408 = vmatpush3.bf16.msra.mxu1 (!%p163_p2), %v1427_v1  ;;  %v1432_v6 = vld [vmem:[%s1803_s1 + $0x58] sm:$0xff] (!%p163_p2)   ;;  %v1434_v8 = vld [vmem:[%s1803_s1 + $0x60] sm:$0xff] (!%p163_p2)   ;;  %v1436_v10 = vld [vmem:[%s1803_s1 + $0x68] sm:$0xff] (!%p163_p2)  }
   0x8   : > { %1254 = vmatprep.subr.bf16.mxu0 (!%p163_p2), %v1428_v2  ;;  %1401 = vmatprep.subr.bf16.mxu1 (!%p163_p2), %v1428_v2  ;;  %v1433_v7 = vld [vmem:[%s1803_s1 + $0x18] sm:$0xff] (!%p163_p2)   ;;  %v1435_v9 = vld [vmem:[%s1803_s1 + $0x20] sm:$0xff] (!%p163_p2)   ;;  %v1437_v13 = vld [vmem:[%s1803_s1 + $0x28] sm:$0xff] (!%p163_p2)  }
   0x9   : > { %v1438_v14 = vld [vmem:[%s1803_s1 + $0x70] sm:$0xff] (!%p163_p2)   ;;  %v1440_v16 = vld [vmem:[%s1803_s1 + $0x78] sm:$0xff] (!%p163_p2)   ;;  %v1454_v18 = vld [vmem:[%s1803_s1 + $0x80] sm:$0xff] (!%p163_p2)  }
   0xa   : > { %v1439_v15 = vld [vmem:[%s1803_s1 + $0x30] sm:$0xff] (!%p163_p2)   ;;  %v1441_v17 = vld [vmem:[%s1803_s1 + $0x38] sm:$0xff] (!%p163_p2)   ;;  %v1461_v23 = vld [vmem:[%s1803_s1 + $0x88] sm:$0xff] (!%p163_p2)  }
   0xb   : > { %1255 = vmatpush3.bf16.msra.mxu0 (!%p163_p2), %v1429_v3  ;;  %1409 = vmatpush3.bf16.msra.mxu1 (!%p163_p2), %v1429_v3 }
   0xc   : > { %1256 = vmatprep.subr.bf16.mxu0 (!%p163_p2), %v1430_v4  ;;  %1402 = vmatprep.subr.bf16.mxu1 (!%p163_p2), %v1430_v4 }
   0xd   : > { %s1808_s16 = smov (!%p188_p3, %s1153_s16), 1 }
   0xe   : > { %s1416_s5 = smul.u32 336, %s1808_s16 }
   0xf   : > { %1257 = vmatpush3.bf16.msra.mxu0 %v1431_v5  ;;  %1410 = vmatpush3.bf16.msra.mxu1 %v1431_v5  ;;  %s1417_s11 = smul.u32 28, %s1808_s16 }
  0x10   : > { %1258 = vmatprep.subr.bf16.mxu0 %v1432_v6  ;;  %1403 = vmatprep.subr.bf16.mxu1 %v1432_v6  ;;  %s1574_s12 = scalar_lea.vmem %s1802_s0, %s1416_s5 }
  0x11   : > { %v1444_v11 = vld [vmem:[%s1574_s12 + $0x4] ss:$12 sps:$4 sm:$0xff]   ;;  %v1447_v12 = vld [vmem:[%s1574_s12 + $0x10c] ss:$12 sps:$4 sm:$0xff]   ;;  %v1445_v20 = vld [vmem:[%s1574_s12 + $0x108] ss:$12 sps:$4 sm:$0xff]   ;;  %s1753_s13 = scalar_lea.vmem %s1806_s4, %s1417_s11 }
  0x12   : > { %684 = vmatprep.mubr.bf16.mxu0 %v1444_v11  ;;  %772 = vmatprep.mubr.bf16.mxu1 %v1447_v12  ;;  %v1442_v19 = vld [vmem:[%s1574_s12] ss:$12 sps:$4 sm:$0xff]   ;;  %v1448_v21 = vld [vmem:[%s1574_s12 + $0x1c] ss:$12 sps:$4 sm:$0xff]   ;;  %v1450_v22 = vld [vmem:[%s1574_s12 + $0x124] ss:$12 sps:$4 sm:$0xff]  }
  0x13   : > { %1259 = vmatpush3.bf16.msra.mxu0 %v1433_v7  ;;  %1411 = vmatpush3.bf16.msra.mxu1 %v1433_v7  ;;  %v1452_v24 = vld [vmem:[%s1574_s12 + $0x18] ss:$12 sps:$4 sm:$0xff]   ;;  %v1453_v25 = vld [vmem:[%s1574_s12 + $0x120] ss:$12 sps:$4 sm:$0xff]   ;;  %v1457_v27 = vld [vmem:[%s1574_s12 + $0x13c] ss:$12 sps:$4 sm:$0xff]  }
  0x14   : > { %1260 = vmatprep.subr.bf16.mxu0 %v1434_v8  ;;  %1404 = vmatprep.subr.bf16.mxu1 %v1434_v8  ;;  %v1455_v26 = vld [vmem:[%s1574_s12 + $0x34] ss:$12 sps:$4 sm:$0xff]   ;;  %v1459_v28 = vld [vmem:[%s1574_s12 + $0x30] ss:$12 sps:$4 sm:$0xff]   ;;  %v1460_v29 = vld [vmem:[%s1574_s12 + $0x138] ss:$12 sps:$4 sm:$0xff]  }
  0x15   : > { %v1462_v30 = vld [vmem:[%s1574_s12 + $0x4c] ss:$12 sps:$4 sm:$0xff]   ;;  %v1464_v31 = vld [vmem:[%s1574_s12 + $0x8] ss:$12 sps:$4 sm:$0xff]   ;;  %v1467_v34 = vld [vmem:[%s1574_s12 + $0x64] ss:$12 sps:$4 sm:$0xff]  }
  0x16   : > { %v1465_v32 = vld [vmem:[%s1574_s12 + $0x48] ss:$12 sps:$4 sm:$0xff]   ;;  %v1466_v33 = vld [vmem:[%s1574_s12 + $0x20] ss:$12 sps:$4 sm:$0xff]   ;;  %v1469_v35 = vld [vmem:[%s1574_s12 + $0x38] ss:$12 sps:$4 sm:$0xff]  }
  0x17   : > { %1261 = vmatpush3.bf16.msra.mxu0 %v1435_v9  ;;  %1412 = vmatpush3.bf16.msra.mxu1 %v1435_v9  ;;  %v1470_v36 = vld [vmem:[%s1574_s12 + $0x60] ss:$12 sps:$4 sm:$0xff]   ;;  %v1471_v37 = vld [vmem:[%s1574_s12 + $0x50] ss:$12 sps:$4 sm:$0xff]   ;;  %v1474_v39 = vld [vmem:[%s1574_s12 + $0x68] ss:$12 sps:$4 sm:$0xff]  }
  0x18   : > { %1262 = vmatprep.subr.bf16.mxu0 %v1436_v10  ;;  %1405 = vmatprep.subr.bf16.mxu1 %v1436_v10  ;;  %v1472_v38 = vld [vmem:[%s1574_s12 + $0x7c] ss:$12 sps:$4 sm:$0xff]   ;;  %v1475_v40 = vld [vmem:[%s1574_s12 + $0x78] ss:$12 sps:$4 sm:$0xff]   ;;  %v1476_v41 = vld [vmem:[%s1574_s12 + $0x80] ss:$12 sps:$4 sm:$0xff]  }
  0x19   : > { %v1477_v42 = vld [vmem:[%s1574_s12 + $0x94] ss:$12 sps:$4 sm:$0xff]   ;;  %v1479_v43 = vld [vmem:[%s1574_s12 + $0x98] ss:$12 sps:$4 sm:$0xff]   ;;  %v1480_v44 = vld [vmem:[%s1574_s12 + $0x90] ss:$12 sps:$4 sm:$0xff]  }
  0x1a   : > { %v1481_v45 = vld [vmem:[%s1574_s12 + $0xb0] ss:$12 sps:$4 sm:$0xff]   ;;  %v1482_v46 = vld [vmem:[%s1574_s12 + $0xac] ss:$12 sps:$4 sm:$0xff]   ;;  %v1484_v47 = vld [vmem:[%s1574_s12 + $0xc8] ss:$12 sps:$4 sm:$0xff]  }
  0x1b   : > { %1263 = vmatpush3.bf16.msra.mxu0 %v1437_v13  ;;  %1413 = vmatpush3.bf16.msra.mxu1 %v1437_v13  ;;  %v1485_v48 = vld [vmem:[%s1574_s12 + $0xa8] ss:$12 sps:$4 sm:$0xff]   ;;  %v1486_v49 = vld [vmem:[%s1574_s12 + $0xe0] ss:$12 sps:$4 sm:$0xff]   ;;  %v1487_v50 = vld [vmem:[%s1574_s12 + $0xc4] ss:$12 sps:$4 sm:$0xff]  }
  0x1c   : > { %1264 = vmatprep.subr.bf16.mxu0 %v1438_v14  ;;  %1406 = vmatprep.subr.bf16.mxu1 %v1438_v14  ;;  %v1489_v51 = vld [vmem:[%s1574_s12 + $0xf8] ss:$12 sps:$4 sm:$0xff]   ;;  %v1490_v52 = vld [vmem:[%s1574_s12 + $0xc0] ss:$12 sps:$4 sm:$0xff]   ;;  %v1491_v53 = vld [vmem:[%s1574_s12 + $0x110] ss:$12 sps:$4 sm:$0xff]  }
  0x1d   : > { %v1492_v54 = vld [vmem:[%s1574_s12 + $0xdc] ss:$12 sps:$4 sm:$0xff]   ;;  %v1495_v56 = vld [vmem:[%s1574_s12 + $0xd8] ss:$12 sps:$4 sm:$0xff]   ;;  %v1496_v57 = vld [vmem:[%s1574_s12 + $0x140] ss:$12 sps:$4 sm:$0xff]  }
  0x1e   : > { %v1494_v55 = vld [vmem:[%s1574_s12 + $0x128] ss:$12 sps:$4 sm:$0xff]   ;;  %v1499_v59 = vld [vmem:[%s1574_s12 + $0xf0] ss:$12 sps:$4 sm:$0xff]  }
  0x1f   : > { %1265 = vmatpush3.bf16.msra.mxu0 %v1439_v15  ;;  %1414 = vmatpush3.bf16.msra.mxu1 %v1439_v15  ;;  %v1497_v58 = vld [vmem:[%s1574_s12 + $0xf4] ss:$12 sps:$4 sm:$0xff]  }
  0x20   : > { %1266 = vmatprep.subr.bf16.mxu0 %v1440_v16  ;;  %1407 = vmatprep.subr.bf16.mxu1 %v1440_v16 }
  0x23   : > { %1267 = vmatpush3.bf16.msra.mxu0 %v1441_v17  ;;  %1415 = vmatpush3.bf16.msra.mxu1 %v1441_v17 }
  0x24   : > { %1368 = vmatprep.subr.bf16.mxu1 %v1454_v18 }
  0x26   : > { %685 = vmatmul.mubr.bf16.vlgmr.msra.gmra.mrb[0].mxu0 %v1442_v19  ;;  %773 = vmatmul.mubr.bf16.vlgmr.msra.gmra.mrb[0].mxu1 %v1445_v20 }
  0x27   : > { %692 = vmatprep.mubr.bf16.mxu0 %v1448_v21  ;;  %780 = vmatprep.mubr.bf16.mxu1 %v1450_v22 }
  0x28   : > { %1369 = vmatpush3.bf16.msra.mxu1 %v1454_v18 }
  0x29   : > { %1370 = vmatprep.subr.bf16.mxu1 %v1461_v23 }
  0x2c   : > { %1371 = vmatpush3.bf16.msra.mxu1 %v1461_v23 }
  0x2e   : > { %693 = vmatmul.mubr.bf16.gmra.mrb[4].mxu0 %v1452_v24  ;;  %781 = vmatmul.mubr.bf16.gmra.mrb[4].mxu1 %v1453_v25 }
  0x2f   : > { %700 = vmatprep.mubr.bf16.mxu0 %v1455_v26  ;;  %788 = vmatprep.mubr.bf16.mxu1 %v1457_v27 }
  0x36   : > { %701 = vmatmul.mubr.bf16.gmra.mrb[8].mxu0 %v1459_v28  ;;  %789 = vmatmul.mubr.bf16.gmra.mrb[8].mxu1 %v1460_v29 }
  0x37   : > { %708 = vmatprep.mubr.bf16.mxu0 %v1462_v30  ;;  %1372 = vmatprep.mubr.msk.bf16.mxu1 %vm609_vm0, %v1464_v31 }
  0x3e   : > { %709 = vmatmul.mubr.bf16.gmra.mrb[12].mxu0 %v1465_v32  ;;  %1373 = vmatmul.mubr.msk.bf16.vlgmr.msra.gmra.mrb[12].mxu1 %vm609_vm0, %v1466_v33 }
  0x3f   : > { %716 = vmatprep.mubr.bf16.mxu0 %v1467_v34  ;;  %1376 = vmatprep.mubr.msk.bf16.mxu1 %vm609_vm0, %v1469_v35 }
  0x46   : > { %717 = vmatmul.mubr.bf16.gmra.mrb[16].mxu0 %v1470_v36  ;;  %1377 = vmatmul.mubr.msk.bf16.gmra.mrb[16].mxu1 %vm609_vm0, %v1471_v37 }
  0x47   : > { %724 = vmatprep.mubr.bf16.mxu0 %v1472_v38  ;;  %1380 = vmatprep.mubr.msk.bf16.mxu1 %vm609_vm0, %v1474_v39 }
  0x4e   : > { %725 = vmatmul.mubr.bf16.gmra.mrb[20].mxu0 %v1475_v40  ;;  %1381 = vmatmul.mubr.msk.bf16.gmra.mrb[20].mxu1 %vm609_vm0, %v1476_v41 }
  0x4f   : > { %732 = vmatprep.mubr.bf16.mxu0 %v1477_v42  ;;  %1384 = vmatprep.mubr.msk.bf16.mxu1 %vm609_vm0, %v1479_v43 }
  0x56   : > { %733 = vmatmul.mubr.bf16.gmra.mrb[24].mxu0 %v1480_v44  ;;  %1385 = vmatmul.mubr.msk.bf16.gmra.mrb[24].mxu1 %vm609_vm0, %v1481_v45 }
  0x57   : > { %740 = vmatprep.mubr.bf16.mxu0 %v1482_v46  ;;  %1388 = vmatprep.mubr.msk.bf16.mxu1 %vm609_vm0, %v1484_v47  ;;  %v1674_v46 = vld [vmem:[%s1804_s2] ss:$0 sm:$0xff] }
  0x5e   : > { %741 = vmatmul.mubr.bf16.gmra.mrb[28].mxu0 %v1485_v48  ;;  %1389 = vmatmul.mubr.msk.bf16.gmra.mrb[28].mxu1 %vm609_vm0, %v1486_v49 }
  0x5f   : > { %748 = vmatprep.mubr.bf16.mxu0 %v1487_v50  ;;  %1392 = vmatprep.mubr.msk.bf16.mxu1 %vm609_vm0, %v1489_v51 }
  0x66   : > { %749 = vmatmul.mubr.bf16.gmra.mrb[32].mxu0 %v1490_v52  ;;  %1393 = vmatmul.mubr.msk.bf16.gmra.mrb[32].mxu1 %vm609_vm0, %v1491_v53  ;;  %v1680_v53 = vld [vmem:[%s1805_s3] ss:$0 sm:$0xff] }
  0x67   : > { %756 = vmatprep.mubr.bf16.mxu0 %v1492_v54  ;;  %1396 = vmatprep.mubr.msk.bf16.mxu1 %vm609_vm0, %v1494_v55 }
  0x6e   : > { %757 = vmatmul.mubr.bf16.gmra.mrb[36].mxu0 %v1495_v56  ;;  %1397 = vmatmul.mubr.msk.bf16.gmra.mrb[36].mxu1 %vm609_vm0, %v1496_v57 }
  0x6f   : > { %764 = vmatprep.mubr.bf16.mxu0 %v1497_v58 }
  0x76   : > { %765 = vmatmul.mubr.bf16.gmra.mrb[40].mxu0 %v1499_v59 }
  0xf9   : > { %v1268_v60 = vpop.f32.mrb[0].mxu0  ;;  %v1334_v61 = vpop.f32.mrb[0].mxu1 }
  0xfa   : > { %v1269_v62 = vpop.f32.mrb[1].mxu0  ;;  %v1335_v63 = vpop.f32.mrb[1].mxu1 }
  0xfb   : > { %v1270_v0 = vadd.f32 %v1269_v62, %v1268_v60  ;;  %v1271_v1 = vpop.f32.mrb[2].mxu0  ;;  %v1659_v2 = vadd.f32 %v1335_v63, %v1334_v61  ;;  %v1337_v3 = vpop.f32.mrb[2].mxu1 }
  0xfc   : > { %v1272_v4 = vpop.f32.mrb[3].mxu0  ;;  %v1338_v5 = vpop.f32.mrb[3].mxu1 }
  0xfd   : > { %v1273_v6 = vadd.f32 %v1272_v4, %v1271_v1  ;;  %v1661_v7 = vadd.f32 %v1338_v5, %v1337_v3 }
 0x101   : > { %v1274_v8 = vpop.f32.mrb[4].mxu0  ;;  %v1340_v9 = vpop.f32.mrb[4].mxu1 }
 0x102   : > { %v1275_v10 = vpop.f32.mrb[5].mxu0  ;;  %v1341_v11 = vpop.f32.mrb[5].mxu1 }
 0x103   : > { %v1276_v12 = vadd.f32 %v1275_v10, %v1274_v8  ;;  %v1277_v13 = vpop.f32.mrb[6].mxu0  ;;  %v1663_v14 = vadd.f32 %v1341_v11, %v1340_v9  ;;  %v1343_v15 = vpop.f32.mrb[6].mxu1 }
 0x104   : > { %v1278_v16 = vpop.f32.mrb[7].mxu0  ;;  %v1344_v17 = vpop.f32.mrb[7].mxu1 }
 0x105   : > { %v1279_v18 = vadd.f32 %v1278_v16, %v1277_v13  ;;  %v1665_v19 = vadd.f32 %v1344_v17, %v1343_v15 }
 0x109   : > { %v1280_v20 = vpop.f32.mrb[8].mxu0  ;;  %v1346_v21 = vpop.f32.mrb[8].mxu1 }
 0x10a   : > { %v1281_v22 = vpop.f32.mrb[9].mxu0  ;;  %v1347_v23 = vpop.f32.mrb[9].mxu1 }
 0x10b   : > { %v1282_v24 = vadd.f32 %v1281_v22, %v1280_v20  ;;  %v1283_v25 = vpop.f32.mrb[10].mxu0  ;;  %v1667_v26 = vadd.f32 %v1347_v23, %v1346_v21  ;;  %v1349_v27 = vpop.f32.mrb[10].mxu1 }
 0x10c   : > { %v1284_v28 = vpop.f32.mrb[11].mxu0  ;;  %v1350_v29 = vpop.f32.mrb[11].mxu1 }
 0x10d   : > { %v1285_v30 = vadd.f32 %v1284_v28, %v1283_v25  ;;  %v1669_v31 = vadd.f32 %v1350_v29, %v1349_v27 }
 0x111   : > { %v1286_v32 = vpop.f32.mrb[12].mxu0  ;;  %v1374_v33 = vpop.f32.mrb[12].mxu1 }
 0x112   : > { %v840_v34 = vadd.f32 %v1374_v33, %v1276_v12  ;;  %v1287_v35 = vpop.f32.mrb[13].mxu0  ;;  %v831_v36 = vpop.f32.mrb[13].mxu1 }
 0x113   : > { %v1288_v37 = vadd.f32 %v1287_v35, %v1286_v32  ;;  %v832_v38 = vadd.f32 %v1270_v0, %v831_v36  ;;  %v1289_v39 = vpop.f32.mrb[14].mxu0  ;;  %v1375_v40 = vpop.f32.mrb[14].mxu1 }
 0x114   : > { %v843_v41 = vadd.f32 %v1375_v40, %v1279_v18  ;;  %v1290_v42 = vpop.f32.mrb[15].mxu0  ;;  %v834_v43 = vpop.f32.mrb[15].mxu1 }
 0x115   : > { %v1291_v44 = vadd.f32 %v1290_v42, %v1289_v39  ;;  %v835_v45 = vadd.f32 %v1273_v6, %v834_v43  ;;  %v949_v49 = vmul.f32 %v1674_v46, %v832_v38  ;;  %v951_v6 = vmul.f32 %v1674_v46, %v840_v34 }
 0x116   : > { %v952_v9 = vmul.f32 %v1674_v46, %v843_v41 }
 0x117   : > { %v984_v63 = vadd.f32 %v1680_v53, %v949_v49  ;;  %v950_v1 = vmul.f32 %v1674_v46, %v835_v45  ;;  %v986_v29 = vadd.f32 %v1680_v53, %v951_v6 }
 0x119   : > { %v1292_v47 = vpop.f32.mrb[16].mxu0  ;;  %v1378_v48 = vpop.f32.mrb[16].mxu1  ;;  %v1012_v8 = vmax.f32 %v984_v63, 0.0  ;;  %v985_v18 = vadd.f32 %v1680_v53, %v950_v1 }
 0x11a   : > { %v856_v50 = vadd.f32 %v1378_v48, %v1288_v37  ;;  %v1293_v51 = vpop.f32.mrb[17].mxu0  ;;  %v847_v52 = vpop.f32.mrb[17].mxu1 }
 0x11b   : > { %v1294_v54 = vadd.f32 %v1293_v51, %v1292_v47  ;;  %v848_v55 = vadd.f32 %v1282_v24, %v847_v52  ;;  %v1295_v56 = vpop.f32.mrb[18].mxu0  ;;  %v1379_v57 = vpop.f32.mrb[18].mxu1  ;;  %v1013_v36 = vmax.f32 %v985_v18, 0.0 }
 0x11c   : > { %v859_v58 = vadd.f32 %v1379_v57, %v1291_v44  ;;  %v1296_v59 = vpop.f32.mrb[19].mxu0  ;;  %v850_v60 = vpop.f32.mrb[19].mxu1  ;;  %v1014_v44 = vmax.f32 %v986_v29, 0.0  ;;  %v955_v57 = vmul.f32 %v1674_v46, %v856_v50 }
 0x11d   : > { %v1297_v61 = vadd.f32 %v1296_v59, %v1295_v56  ;;  %v851_v62 = vadd.f32 %v1285_v30, %v850_v60  ;;  %v953_v20 = vmul.f32 %v1674_v46, %v848_v55  ;;  %v987_v30 = vadd.f32 %v1680_v53, %v952_v9 }
 0x11e   : > { %v956_v0 = vmul.f32 %v1674_v46, %v859_v58 }
 0x11f   : > { %v988_v37 = vadd.f32 %v1680_v53, %v953_v20  ;;  %v1015_v45 = vmax.f32 %v987_v30, 0.0  ;;  %v954_v59 = vmul.f32 %v1674_v46, %v851_v62 }
 0x120   : > { %v991_v3 = vadd.f32 %v1680_v53, %v956_v0 }
 0x121   : > { %v1298_v4 = vpop.f32.mrb[20].mxu0  ;;  %v1382_v5 = vpop.f32.mrb[20].mxu1  ;;  %v1016_v58 = vmax.f32 %v988_v37, 0.0  ;;  %v989_v9 = vadd.f32 %v1680_v53, %v954_v59 }
 0x122   : > { %v1019_v10 = vmax.f32 %v991_v3, 0.0  ;;  %v1299_v11 = vpop.f32.mrb[21].mxu0  ;;  %v863_v12 = vpop.f32.mrb[21].mxu1 }
 0x123   : > { %v1300_v13 = vadd.f32 %v1299_v11, %v1298_v4  ;;  %v864_v15 = vadd.f32 %v1294_v54, %v863_v12  ;;  %v1301_v16 = vpop.f32.mrb[22].mxu0  ;;  %v1383_v17 = vpop.f32.mrb[22].mxu1 }
 0x124   : > { %v1690_v21 = vmax.f32 %v1012_v8, %v1019_v10  ;;  %v1302_v22 = vpop.f32.mrb[23].mxu0  ;;  %v866_v23 = vpop.f32.mrb[23].mxu1  ;;  %v990_v10 = vadd.f32 %v1680_v53, %v955_v57 }
 0x125   : > { %v872_v24 = vadd.f32 %v1382_v5, %v1300_v13  ;;  %v957_v25 = vmul.f32 %v1674_v46, %v864_v15  ;;  %v1303_v27 = vadd.f32 %v1302_v22, %v1301_v16  ;;  %v867_v28 = vadd.f32 %v1297_v61, %v866_v23 }
 0x126   : > { %v1017_v23 = vmax.f32 %v989_v9, 0.0 }
 0x127   : > { %v959_v32 = vmul.f32 %v1674_v46, %v872_v24  ;;  %v992_v33 = vadd.f32 %v1680_v53, %v957_v25  ;;  %v875_v34 = vadd.f32 %v1383_v17, %v1303_v27  ;;  %v958_v35 = vmul.f32 %v1674_v46, %v867_v28 }
 0x128   : > { %v1018_v28 = vmax.f32 %v990_v10, 0.0 }
 0x129   : > { %v994_v38 = vadd.f32 %v1680_v53, %v959_v32  ;;  %v1020_v39 = vmax.f32 %v992_v33, 0.0  ;;  %v960_v40 = vmul.f32 %v1674_v46, %v875_v34  ;;  %v993_v41 = vadd.f32 %v1680_v53, %v958_v35  ;;  %v1304_v42 = vpop.f32.mrb[24].mxu0  ;;  %v1386_v43 = vpop.f32.mrb[24].mxu1 }
 0x12a   : > { %v1305_v47 = vpop.f32.mrb[25].mxu0  ;;  %v879_v48 = vpop.f32.mrb[25].mxu1 }
 0x12b   : > { %v1022_v49 = vmax.f32 %v994_v38, 0.0  ;;  %v1702_v51 = vmax.f32 %v1013_v36, %v1020_v39  ;;  %v995_v52 = vadd.f32 %v1680_v53, %v960_v40  ;;  %v1021_v54 = vmax.f32 %v993_v41, 0.0  ;;  %v1307_v55 = vpop.f32.mrb[26].mxu0  ;;  %v1387_v56 = vpop.f32.mrb[26].mxu1 }
 0x12c   : > { %v1306_v60 = vadd.f32 %v1305_v47, %v1304_v42  ;;  %v1308_v61 = vpop.f32.mrb[27].mxu0  ;;  %v882_v63 = vpop.f32.mrb[27].mxu1 }
 0x12d   : > { %v1707_v0 = vmax.f32 %v1015_v45, %v1022_v49  ;;  %v1023_v1 = vmax.f32 %v995_v52, 0.0  ;;  %v1709_v3 = vmax.f32 %v1014_v44, %v1021_v54  ;;  %v1309_v4 = vadd.f32 %v1308_v61, %v1307_v55 }
 0x12e   : > { %v880_v5 = vadd.f32 %v1306_v60, %v879_v48 }
 0x12f   : > { %v1711_v6 = vmax.f32 %v1016_v58, %v1023_v1  ;;  %v883_v8 = vadd.f32 %v1309_v4, %v882_v63 }
 0x130   : > { %v961_v50 = vmul.f32 %v1674_v46, %v880_v5 }
 0x131   : > { %v962_v62 = vmul.f32 %v1674_v46, %v883_v8  ;;  %v1310_v11 = vpop.f32.mrb[28].mxu0  ;;  %v1717_v12 = vpop.f32.mrb[28].mxu1 }
 0x132   : > { %v996_v13 = vadd.f32 %v1680_v53, %v961_v50  ;;  %v1311_v15 = vpop.f32.mrb[29].mxu0  ;;  %v895_v16 = vpop.f32.mrb[29].mxu1 }
 0x133   : > { %v997_v17 = vadd.f32 %v1680_v53, %v962_v62  ;;  %v1312_v18 = vadd.f32 %v1311_v15, %v1310_v11  ;;  %v1313_v20 = vpop.f32.mrb[30].mxu0  ;;  %v1721_v22 = vpop.f32.mrb[30].mxu1 }
 0x134   : > { %v1024_v24 = vmax.f32 %v996_v13, 0.0  ;;  %v1314_v25 = vpop.f32.mrb[31].mxu0  ;;  %v898_v27 = vpop.f32.mrb[31].mxu1 }
 0x135   : > { %v1025_v29 = vmax.f32 %v997_v17, 0.0  ;;  %v1723_v30 = vadd.f32 %v1386_v43, %v1312_v18  ;;  %v1315_v32 = vadd.f32 %v1314_v25, %v1313_v20 }
 0x136   : > { %v1725_v33 = vmax.f32 %v1017_v23, %v1024_v24 }
 0x137   : > { %v1727_v34 = vmax.f32 %v1018_v28, %v1025_v29  ;;  %v891_v35 = vadd.f32 %v1387_v56, %v1315_v32 }
 0x139   : > { %v964_v36 = vmul.f32 %v1674_v46, %v891_v35  ;;  %v1316_v37 = vpop.f32.mrb[32].mxu0  ;;  %v1394_v38 = vpop.f32.mrb[32].mxu1 }
 0x13a   : > { %v920_v39 = vadd.f32 %v1394_v38, %v1659_v2  ;;  %v1317_v40 = vpop.f32.mrb[33].mxu0  ;;  %v1731_v41 = vpop.f32.mrb[33].mxu1 }
 0x13b   : > { %v1318_v42 = vadd.f32 %v1317_v40, %v1316_v37  ;;  %v1319_v44 = vpop.f32.mrb[34].mxu0  ;;  %v1395_v43 = vpop.f32.mrb[34].mxu1  ;;  %v999_v45 = vadd.f32 %v1680_v53, %v964_v36 }
 0x13c   : > { %v971_v47 = vmul.f32 %v1674_v46, %v920_v39  ;;  %v923_v48 = vadd.f32 %v1395_v43, %v1661_v7  ;;  %v1320_v49 = vpop.f32.mrb[35].mxu0  ;;  %v1736_v52 = vpop.f32.mrb[35].mxu1 }
 0x13d   : > { %v896_v54 = vadd.f32 %v1318_v42, %v895_v16  ;;  %v1321_v55 = vadd.f32 %v1320_v49, %v1319_v44  ;;  %v1027_v59 = vmax.f32 %v999_v45, 0.0 }
 0x13e   : > { %v1006_v2 = vadd.f32 %v1680_v53, %v971_v47  ;;  %v972_v56 = vmul.f32 %v1674_v46, %v923_v48 }
 0x13f   : > { %v965_v57 = vmul.f32 %v1674_v46, %v896_v54  ;;  %v899_v58 = vadd.f32 %v1321_v55, %v898_v27  ;;  %v963_v54 = vmul.f32 %v1674_v46, %v1723_v30 }
 0x140   : > { %v1034_v60 = vmax.f32 %v1006_v2, 0.0  ;;  %v1007_v61 = vadd.f32 %v1680_v53, %v972_v56 }
 0x141   : > { %v1000_v63 = vadd.f32 %v1680_v53, %v965_v57  ;;  %v966_v7 = vmul.f32 %v1674_v46, %v899_v58  ;;  %v1322_v1 = vpop.f32.mrb[36].mxu0  ;;  %v1398_v4 = vpop.f32.mrb[36].mxu1 }
 0x142   : > { %v1048_v5 = vmax.f32 %v1027_v59, %v1034_v60  ;;  %v1035_v8 = vmax.f32 %v1007_v61, 0.0  ;;  %v936_v9 = vadd.f32 %v1398_v4, %v1667_v26  ;;  %v1323_v50 = vpop.f32.mrb[37].mxu0  ;;  %v927_v10 = vpop.f32.mrb[37].mxu1 }
 0x143   : > { %v1028_v62 = vmax.f32 %v1000_v63, 0.0  ;;  %v1324_v11 = vadd.f32 %v1323_v50, %v1322_v1  ;;  %v928_v13 = vadd.f32 %v1663_v14, %v927_v10  ;;  %v1325_v15 = vpop.f32.mrb[38].mxu0  ;;  %v1399_v16 = vpop.f32.mrb[38].mxu1  ;;  %v1001_v18 = vadd.f32 %v1680_v53, %v966_v7 }
 0x144   : > { %v1055_v17 = vmax.f32 %v1702_v51, %v1048_v5  ;;  %v939_v20 = vadd.f32 %v1399_v16, %v1669_v31  ;;  %v1326_v23 = vpop.f32.mrb[39].mxu0  ;;  %v930_v24 = vpop.f32.mrb[39].mxu1  ;;  %v975_v51 = vmul.f32 %v1674_v46, %v936_v9 }
 0x145   : > { %v1049_v26 = vmax.f32 %v1028_v62, %v1035_v8  ;;  %v904_v14 = vadd.f32 %v1717_v12, %v1324_v11  ;;  %v973_v25 = vmul.f32 %v1674_v46, %v928_v13  ;;  %v1327_v28 = vadd.f32 %v1326_v23, %v1325_v15 }
 0x146   : > { %v1246_v27 = vpack.c.bf16 %v1055_v17, %v1055_v17  ;;  %v931_v35 = vadd.f32 %v1665_v19, %v930_v24  ;;  %v1029_v36 = vmax.f32 %v1001_v18, 0.0  ;;  %v976_v44 = vmul.f32 %v1674_v46, %v939_v20 }
 0x147   : > { %v1056_v31 = vmax.f32 %v1709_v3, %v1049_v26  ;;  %v967_v29 = vmul.f32 %v1674_v46, %v904_v14  ;;  %v1008_v32 = vadd.f32 %v1680_v53, %v973_v25  ;;  %v907_v12 = vadd.f32 %v1721_v22, %v1327_v28 }
 0x148   : > { %1092 = vst.msk [vmem:[%s1753_s13 + $0x4] sm:$0xf] %vm1090_vm1, %v1246_v27  ;;  %v974_v40 = vmul.f32 %v1674_v46, %v931_v35  ;;  %v1010_v3 = vadd.f32 %v1680_v53, %v975_v51  ;;  %v1011_v61 = vadd.f32 %v1680_v53, %v976_v44  ;;  %v998_v8 = vadd.f32 %v1680_v53, %v963_v54 }
 0x149   : > { %v1247_v37 = vpack.c.bf16 %v1056_v31, %v1056_v31  ;;  %v1002_v38 = vadd.f32 %v1680_v53, %v967_v29  ;;  %v1036_v39 = vmax.f32 %v1008_v32, 0.0  ;;  %v1328_v42 = vpop.f32.mrb[40].mxu0  ;;  %v968_v43 = vmul.f32 %v1674_v46, %v907_v12 }
 0x14a   : > { %v1329_v45 = vpop.f32.mrb[41].mxu0  ;;  %v1009_v22 = vadd.f32 %v1680_v53, %v974_v40  ;;  %v1038_v60 = vmax.f32 %v1010_v3, 0.0  ;;  %v1039_v10 = vmax.f32 %v1011_v61, 0.0  ;;  %v1026_v15 = vmax.f32 %v998_v8, 0.0 }
 0x14b   : > { %1093 = vst.msk [vmem:[%s1753_s13 + $0x8] sm:$0xf] %vm1090_vm1, %v1247_v37  ;;  %v1030_v19 = vmax.f32 %v1002_v38, 0.0  ;;  %v1050_v47 = vmax.f32 %v1029_v36, %v1036_v39  ;;  %v1330_v48 = vadd.f32 %v1329_v45, %v1328_v42  ;;  %v1331_v49 = vpop.f32.mrb[42].mxu0  ;;  %v1003_v55 = vadd.f32 %v1680_v53, %v968_v43 }
 0x14c   : > { %v1332_v2 = vpop.f32.mrb[43].mxu0  ;;  %v1037_v57 = vmax.f32 %v1009_v22, 0.0 }
 0x14d   : > { %v1057_v56 = vmax.f32 %v1707_v0, %v1050_v47  ;;  %v912_v58 = vadd.f32 %v1330_v48, %v1731_v41  ;;  %v1333_v59 = vadd.f32 %v1332_v2, %v1331_v49  ;;  %v1031_v63 = vmax.f32 %v1003_v55, 0.0 }
 0x14e   : > { %v1051_v1 = vmax.f32 %v1030_v19, %v1037_v57 }
 0x14f   : > { %v1248_v7 = vpack.c.bf16 %v1057_v56, %v1057_v56  ;;  %v969_v4 = vmul.f32 %v1674_v46, %v912_v58  ;;  %v915_v30 = vadd.f32 %v1333_v59, %v1736_v52  ;;  %v1052_v5 = vmax.f32 %v1031_v63, %v1038_v60 }
 0x150   : > { %v1058_v0 = vmax.f32 %v1711_v6, %v1051_v1 }
 0x151   : > { %1094 = vst.msk [vmem:[%s1753_s13 + $0xc] sm:$0xf] %vm1090_vm1, %v1248_v7  ;;  %v1004_v41 = vadd.f32 %v1680_v53, %v969_v4  ;;  %v970_v9 = vmul.f32 %v1674_v46, %v915_v30  ;;  %v1059_v50 = vmax.f32 %v1725_v33, %v1052_v5 }
 0x152   : > { %v1249_v62 = vpack.c.bf16 %v1058_v0, %v1058_v0 }
 0x153   : > { %v1032_v11 = vmax.f32 %v1004_v41, 0.0  ;;  %v1005_v52 = vadd.f32 %v1680_v53, %v970_v9  ;;  %v1250_v13 = vpack.c.bf16 %v1059_v50, %v1059_v50 }
 0x154   : > { %1095 = vst.msk [vmem:[%s1753_s13 + $0x10] sm:$0xf] %vm1090_vm1, %v1249_v62 }
 0x155   : > { %v1053_v16 = vmax.f32 %v1032_v11, %v1039_v10  ;;  %v1033_v17 = vmax.f32 %v1005_v52, 0.0  ;;  %1096 = vst.msk [vmem:[%s1753_s13 + $0x14] sm:$0xf] %vm1090_vm1, %v1250_v13 }
 0x157   : > { %v1060_v6 = vmax.f32 %v1727_v34, %v1053_v16  ;;  %v1047_v46 = vmax.f32 %v1026_v15, %v1033_v17 }
 0x159   : > { %v1251_v18 = vpack.c.bf16 %v1060_v6, %v1060_v6  ;;  %v1054_v33 = vmax.f32 %v1690_v21, %v1047_v46 }
 0x15b   : > { %1097 = vst.msk [vmem:[%s1753_s13 + $0x18] sm:$0xf] %vm1090_vm1, %v1251_v18  ;;  %v1245_v20 = vpack.c.bf16 %v1054_v33, %v1054_v33 }
 0x15d   : > { %1091 = vst.msk [vmem:[%s1753_s13] sm:$0xf] %vm1090_vm1, %v1245_v20 }
 0x15e PF: > { %s14_s15 = sadd.s32 1, %s1506_s15  }
 0x15f   : > { %p11_p4 = scmp.ge.s32.totalorder %s14_s15, 4  }
 0x161   :  { %13 = sbr.rel (!%p11_p4) target bundleno = 1 (0x1), region = 66 }

// kernel: simplenet_forward.5
= control target key start
LH: loop header
LB: loop body
LE: loop exit
PB: predicated region body
PF: predicated region fallthrough
CT: control target
= control target key end

     0   :  { %10 = vsyncpa [#allocation3], 0  ;;  %s11634_s0 = inlined_call_operand.vmem [shape: bf16[2,1,3136], index: 0, kind: input, shape index: {}]   ;;  %s11635_s1 = inlined_call_operand.vmem [shape: bf16[3136,512], index: 1, kind: input, shape index: {}]   ;;  %s11636_s2 = inlined_call_operand.vmem [shape: f32[1,512], index: 2, kind: input, shape index: {}]   ;;  %s11637_s3 = inlined_call_operand.vmem [shape: bf16[512,128], index: 3, kind: input, shape index: {}]   ;;  %s11638_s4 = inlined_call_operand.vmem [shape: f32[1,128], index: 4, kind: input, shape index: {}]   ;;  %s11639_s5 = inlined_call_operand.hbm [shape: f32[2,1,128], index: 5, kind: output, shape index: {}]  }
   0x1   :  { %12 = vsyncpa [#allocation3 + $0x1], 0  ;;  %s8945_s18 = smov 0   ;;  %s8947_s19 = smov 0  }
   0x2   :  { %s8949_s20 = smov 0   ;;  %s8951_s21 = smov 0  }
   0x3 LB: > { %s8966_s22 = sadd.s32 4294967295, %s8910_s21   ;;  %s6623_s23 = sadd.s32 4294967294, %s8910_s21   ;;  %s8910_s21 = sphi %s8951_s21, %s11645_s21   ;;  %s8906_s20 = sphi %s8949_s20, %s11644_s20   ;;  %s8902_s19 = sphi %s8947_s19, %s11643_s19   ;;  %s8898_s18 = sphi %s8945_s18, %s11642_s18  }
   0x4   : > { %s8970_s24 = sadd.s32 1, %s8910_s21   ;;  %s135_s25 = sadd.s32 1, %s8906_s20 }
   0x5   : > { %s132_s26 = ssub.s32 %s8910_s21, %s8970_s24  ;;  %p145_p0 = scmp.ne.s32.totalorder %s8906_s20, %s8902_s19 }
   0x6   : > { %p133_p1 = scmp.eq.s32.totalorder %s132_s26, 0  ;;  %p146_p2 = scmp.eq.s32.totalorder %s8966_s22, 1 }
   0x7   : > { %p151_p3 = scmp.ne.s32.totalorder %s8902_s19, %s8898_s18  ;;  %p152_p4 = scmp.eq.s32.totalorder %s6623_s23, 1 }
   0x8   : > { %s8981_s27 = scalar_select %p133_p1, %s8906_s20, %s135_s25  }
   0x9   : > { %p8983_p5 = por %p146_p2, %p145_p0  ;;  %p8987_p6 = por %p152_p4, %p151_p3 }
   0xa   : > { %p6626_p7 = scmp.ge.s32.totalorder %s8910_s21, 1  ;;  %p189_p8 = scmp.lt.s32.totalorder %s8910_s21, 3 }
   0xc   : > { %p190_p9 = pnand %p6626_p7, %p189_p8 }
   0xd   : > { %v7635_v0 = vld [vmem:[%s11635_s1 + $0x4] ss:$16 sps:$4 sm:$0xff] (!%p190_p9)   ;;  %v7637_v1 = vld [vmem:[%s11635_s1 + $0xc] ss:$16 sps:$4 sm:$0xff] (!%p190_p9)   ;;  %v7639_v2 = vld [vmem:[%s11635_s1] ss:$16 sps:$4 sm:$0xff] (!%p190_p9)   ;;  %v1017_v38 = vlaneseq (!%p190_p9) }
   0xe   : > { %193 = sbr.rel (%p190_p9) target bundleno = 1251 (0x4e3), region = 40  ;;  %5143 = vmatprep.subr.bf16.mxu0 (!%p190_p9), %v7635_v0  ;;  %v7640_v3 = vld [vmem:[%s11635_s1 + $0x8] ss:$16 sps:$4 sm:$0xff] (!%p190_p9)   ;;  %5676 = vmatprep.subr.bf16.mxu1 (!%p190_p9), %v7637_v1  ;;  %v7641_v4 = vld [vmem:[%s11635_s1 + $0x24] ss:$16 sps:$4 sm:$0xff] (!%p190_p9)   ;;  %p215_p10 = scmp.lt.s32.totalorder (!%p190_p9), %s8966_s22, 1 }
   0xf   : > { %5144 = vmatpush1.bf16.msra.mxu0 (!%p190_p9), %v7639_v2  ;;  %5677 = vmatpush1.bf16.msra.mxu1 (!%p190_p9), %v7640_v3  ;;  %v7643_v5 = vld [vmem:[%s11635_s1 + $0x2c] ss:$16 sps:$4 sm:$0xff] (!%p190_p9)   ;;  %v7645_v6 = vld [vmem:[%s11635_s1 + $0x20] ss:$16 sps:$4 sm:$0xff] (!%p190_p9)   ;;  %v7646_v7 = vld [vmem:[%s11635_s1 + $0x28] ss:$16 sps:$4 sm:$0xff] (!%p190_p9)  }
  0x10   : > { %5145 = vmatprep.subr.bf16.mxu0 (!%p190_p9), %v7641_v4  ;;  %5678 = vmatprep.subr.bf16.mxu1 (!%p190_p9), %v7643_v5  ;;  %v7647_v8 = vld [vmem:[%s11635_s1 + $0x44] ss:$16 sps:$4 sm:$0xff] (!%p190_p9)   ;;  %v7649_v9 = vld [vmem:[%s11635_s1 + $0x4c] ss:$16 sps:$4 sm:$0xff] (!%p190_p9)   ;;  %v7651_v10 = vld [vmem:[%s11635_s1 + $0x40] ss:$16 sps:$4 sm:$0xff] (!%p190_p9)  }
  0x11   : > { %v7652_v11 = vld [vmem:[%s11635_s1 + $0x48] ss:$16 sps:$4 sm:$0xff] (!%p190_p9)   ;;  %v7653_v12 = vld [vmem:[%s11635_s1 + $0x64] ss:$16 sps:$4 sm:$0xff] (!%p190_p9)   ;;  %v7655_v13 = vld [vmem:[%s11635_s1 + $0x6c] ss:$16 sps:$4 sm:$0xff] (!%p190_p9)  }
  0x12   : > { %v7657_v14 = vld [vmem:[%s11635_s1 + $0x60] ss:$16 sps:$4 sm:$0xff] (!%p190_p9)   ;;  %v7658_v15 = vld [vmem:[%s11635_s1 + $0x68] ss:$16 sps:$4 sm:$0xff] (!%p190_p9)   ;;  %v7659_v16 = vld [vmem:[%s11635_s1 + $0x84] ss:$16 sps:$4 sm:$0xff] (!%p190_p9)  }
  0x13   : > { %5146 = vmatpush1.bf16.msra.mxu0 (!%p190_p9), %v7645_v6  ;;  %5679 = vmatpush1.bf16.msra.mxu1 (!%p190_p9), %v7646_v7  ;;  %v7661_v17 = vld [vmem:[%s11635_s1 + $0x8c] ss:$16 sps:$4 sm:$0xff] (!%p190_p9)   ;;  %v7663_v18 = vld [vmem:[%s11635_s1 + $0x80] ss:$16 sps:$4 sm:$0xff] (!%p190_p9)   ;;  %v7664_v19 = vld [vmem:[%s11635_s1 + $0x88] ss:$16 sps:$4 sm:$0xff] (!%p190_p9)  }
  0x14   : > { %5147 = vmatprep.subr.bf16.mxu0 (!%p190_p9), %v7647_v8  ;;  %5680 = vmatprep.subr.bf16.mxu1 (!%p190_p9), %v7649_v9  ;;  %v7665_v20 = vld [vmem:[%s11635_s1 + $0xa4] ss:$16 sps:$4 sm:$0xff] (!%p190_p9)   ;;  %v7667_v21 = vld [vmem:[%s11635_s1 + $0xac] ss:$16 sps:$4 sm:$0xff] (!%p190_p9)   ;;  %v7669_v22 = vld [vmem:[%s11635_s1 + $0xa0] ss:$16 sps:$4 sm:$0xff] (!%p190_p9)  }
  0x15   : > { %v7670_v23 = vld [vmem:[%s11635_s1 + $0xa8] ss:$16 sps:$4 sm:$0xff]   ;;  %v7671_v24 = vld [vmem:[%s11635_s1 + $0xc4] ss:$16 sps:$4 sm:$0xff]   ;;  %v7673_v25 = vld [vmem:[%s11635_s1 + $0xcc] ss:$16 sps:$4 sm:$0xff]  }
  0x16   : > { %v7675_v26 = vld [vmem:[%s11635_s1 + $0xc0] ss:$16 sps:$4 sm:$0xff]   ;;  %v7676_v27 = vld [vmem:[%s11635_s1 + $0xc8] ss:$16 sps:$4 sm:$0xff]   ;;  %v7677_v28 = vld [vmem:[%s11635_s1 + $0xe4] ss:$16 sps:$4 sm:$0xff]  }
  0x17   : > { %5148 = vmatpush1.bf16.msra.mxu0 %v7651_v10  ;;  %5681 = vmatpush1.bf16.msra.mxu1 %v7652_v11  ;;  %v7679_v29 = vld [vmem:[%s11635_s1 + $0xec] ss:$16 sps:$4 sm:$0xff]   ;;  %v7681_v30 = vld [vmem:[%s11635_s1 + $0xe0] ss:$16 sps:$4 sm:$0xff]   ;;  %v7682_v31 = vld [vmem:[%s11635_s1 + $0xe8] ss:$16 sps:$4 sm:$0xff]  }
  0x18   : > { %5149 = vmatprep.subr.bf16.mxu0 %v7653_v12  ;;  %5682 = vmatprep.subr.bf16.mxu1 %v7655_v13  ;;  %v7683_v32 = vld [vmem:[%s11635_s1 + $0x104] ss:$16 sps:$4 sm:$0xff]   ;;  %v7685_v33 = vld [vmem:[%s11635_s1 + $0x10c] ss:$16 sps:$4 sm:$0xff]   ;;  %v7687_v34 = vld [vmem:[%s11635_s1 + $0x100] ss:$16 sps:$4 sm:$0xff]  }
  0x19   : > { %v7688_v35 = vld [vmem:[%s11635_s1 + $0x108] ss:$16 sps:$4 sm:$0xff]   ;;  %s216_s13 = scalar_select %p215_p10, %s8966_s22, 1  ;;  %v8912_v36 = vmov 1966171168   ;;  %v9112_v43 = vshrl.u32 %v1017_v38, 7 }
  0x1a   : > { %v1015_v37 = vunpack.c.l.s4 %v8912_v36  ;;  %v7689_v39 = vld [vmem:[%s11635_s1 + $0x124] ss:$16 sps:$4 sm:$0xff]   ;;  %v7691_v40 = vld [vmem:[%s11635_s1 + $0x12c] ss:$16 sps:$4 sm:$0xff]   ;;  %v7693_v41 = vld [vmem:[%s11635_s1 + $0x120] ss:$16 sps:$4 sm:$0xff]  }
  0x1b   : > { %5150 = vmatpush1.bf16.msra.mxu0 %v7657_v14  ;;  %5683 = vmatpush1.bf16.msra.mxu1 %v7658_v15  ;;  %s7593_s26 = smul.u32 25, %s216_s13  ;;  %v7694_v44 = vld [vmem:[%s11635_s1 + $0x128] ss:$16 sps:$4 sm:$0xff]   ;;  %v7695_v45 = vld [vmem:[%s11635_s1 + $0x144] ss:$16 sps:$4 sm:$0xff]   ;;  %vm5139_vm0 = vcmask 523264  }
  0x1c   : > { %5151 = vmatprep.subr.bf16.mxu0 %v7659_v16  ;;  %5684 = vmatprep.subr.bf16.mxu1 %v7661_v17  ;;  %v1016_v42 = vunpack.c.0.s8 %v1015_v37  ;;  %v7697_v46 = vld [vmem:[%s11635_s1 + $0x14c] ss:$16 sps:$4 sm:$0xff]   ;;  %v7699_v47 = vld [vmem:[%s11635_s1 + $0x140] ss:$16 sps:$4 sm:$0xff]   ;;  %v7700_v48 = vld [vmem:[%s11635_s1 + $0x148] ss:$16 sps:$4 sm:$0xff]  }
  0x1d   : > { %s9132_s17 = scalar_lea.vmem %s11634_s0, %s7593_s26  ;;  %v7701_v50 = vld [vmem:[%s11635_s1 + $0x164] ss:$16 sps:$4 sm:$0xff]   ;;  %v7703_v51 = vld [vmem:[%s11635_s1 + $0x16c] ss:$16 sps:$4 sm:$0xff]   ;;  %v7705_v53 = vld [vmem:[%s11635_s1 + $0x160] ss:$16 sps:$4 sm:$0xff]  }
  0x1e   : > { %v9135_v49 = vsub.s32 %v1016_v42, %v9112_v43  ;;  %v9144_v52 = vld [vmem:[%s9132_s17] sm:$0xff]  ;;  %v7706_v55 = vld [vmem:[%s11635_s1 + $0x168] ss:$16 sps:$4 sm:$0xff]   ;;  %v7709_v57 = vld [vmem:[%s11635_s1 + $0x18c] ss:$16 sps:$4 sm:$0xff]   ;;  %s213_s14 = sand.u32 1, %s8902_s19  }
  0x1f   : > { %5152 = vmatpush1.bf16.msra.mxu0 %v7663_v18  ;;  %5685 = vmatpush1.bf16.msra.mxu1 %v7664_v19  ;;  %v7707_v56 = vld [vmem:[%s11635_s1 + $0x184] ss:$16 sps:$4 sm:$0xff]   ;;  %v7711_v59 = vld [vmem:[%s11635_s1 + $0x180] ss:$16 sps:$4 sm:$0xff]   ;;  %v7712_v61 = vld [vmem:[%s11635_s1 + $0x188] ss:$16 sps:$4 sm:$0xff]  }
  0x20   : > { %5153 = vmatprep.subr.bf16.mxu0 %v7665_v20  ;;  %5686 = vmatprep.subr.bf16.mxu1 %v7667_v21  ;;  %v1020_v54 = vrot.slane %v9144_v52, %v9135_v49  ;;  %v7713_v62 = vld [vmem:[%s11635_s1 + $0x1a4] ss:$16 sps:$4 sm:$0xff]   ;;  %v7715_v63 = vld [vmem:[%s11635_s1 + $0x1ac] ss:$16 sps:$4 sm:$0xff]   ;;  %v7717_v0 = vld [vmem:[%s11635_s1 + $0x1a0] ss:$16 sps:$4 sm:$0xff]  }
  0x21   : > { %v7718_v1 = vld [vmem:[%s11635_s1 + $0x1a8] ss:$16 sps:$4 sm:$0xff]   ;;  %v7719_v2 = vld [vmem:[%s11635_s1 + $0x1c4] ss:$16 sps:$4 sm:$0xff]   ;;  %v7721_v3 = vld [vmem:[%s11635_s1 + $0x1cc] ss:$16 sps:$4 sm:$0xff]  }
  0x22   : > { %v1028_v58 = vcombine.high %v1020_v54, %v1020_v54  ;;  %v7723_v4 = vld [vmem:[%s11635_s1 + $0x1c0] ss:$16 sps:$4 sm:$0xff]   ;;  %v7724_v5 = vld [vmem:[%s11635_s1 + $0x1c8] ss:$16 sps:$4 sm:$0xff]   ;;  %v7725_v6 = vld [vmem:[%s11635_s1 + $0x1e4] ss:$16 sps:$4 sm:$0xff]   ;;  %v9213_v13 = vrot.slane %v1020_v54, %v9135_v49 }
  0x23   : > { %5154 = vmatpush1.bf16.msra.mxu0 %v7669_v22  ;;  %5687 = vmatpush1.bf16.msra.mxu1 %v7670_v23  ;;  %v7727_v7 = vld [vmem:[%s11635_s1 + $0x1ec] ss:$16 sps:$4 sm:$0xff]   ;;  %v7729_v8 = vld [vmem:[%s11635_s1 + $0x1e0] ss:$16 sps:$4 sm:$0xff]   ;;  %v7730_v9 = vld [vmem:[%s11635_s1 + $0x1e8] ss:$16 sps:$4 sm:$0xff]  }
  0x24   : > { %5155 = vmatprep.subr.bf16.mxu0 %v7671_v24  ;;  %5688 = vmatprep.subr.bf16.mxu1 %v7673_v25  ;;  %v1050_v60 = vrot.slane %v1028_v58, %v9135_v49  ;;  %v7733_v10 = vld [vmem:[%s11635_s1 + $0x204] ss:$16 sps:$4 sm:$0xff]   ;;  %v7736_v11 = vld [vmem:[%s11635_s1 + $0x20c] ss:$16 sps:$4 sm:$0xff]   ;;  %v7731_v12 = vld [vmem:[%s11635_s1 + $0x200] ss:$16 sps:$4 sm:$0xff]  }
  0x25   : > { %v7734_v14 = vld [vmem:[%s11635_s1 + $0x208] ss:$16 sps:$4 sm:$0xff]   ;;  %v7739_v15 = vld [vmem:[%s11635_s1 + $0x224] ss:$16 sps:$4 sm:$0xff]   ;;  %v7742_v16 = vld [vmem:[%s11635_s1 + $0x22c] ss:$16 sps:$4 sm:$0xff]  }
  0x26   : > { %5175 = vmatprep.mubr.bf16.mxu0 %v1050_v60  ;;  %5708 = vmatprep.mubr.bf16.mxu1 %v1050_v60  ;;  %v1060_v17 = vcombine.high %v1050_v60, %v1050_v60  ;;  %v7737_v18 = vld [vmem:[%s11635_s1 + $0x220] ss:$16 sps:$4 sm:$0xff]   ;;  %v7740_v19 = vld [vmem:[%s11635_s1 + $0x228] ss:$16 sps:$4 sm:$0xff]   ;;  %v7745_v20 = vld [vmem:[%s11635_s1 + $0x244] ss:$16 sps:$4 sm:$0xff]  }
  0x27   : > { %5156 = vmatpush1.bf16.msra.mxu0 %v7675_v26  ;;  %5689 = vmatpush1.bf16.msra.mxu1 %v7676_v27  ;;  %v7748_v21 = vld [vmem:[%s11635_s1 + $0x24c] ss:$16 sps:$4 sm:$0xff]   ;;  %v7743_v22 = vld [vmem:[%s11635_s1 + $0x240] ss:$16 sps:$4 sm:$0xff]   ;;  %v7746_v23 = vld [vmem:[%s11635_s1 + $0x248] ss:$16 sps:$4 sm:$0xff]  }
  0x28   : > { %5157 = vmatprep.subr.bf16.mxu0 %v7677_v28  ;;  %5690 = vmatprep.subr.bf16.mxu1 %v7679_v29  ;;  %v7751_v24 = vld [vmem:[%s11635_s1 + $0x264] ss:$16 sps:$4 sm:$0xff]   ;;  %v7754_v25 = vld [vmem:[%s11635_s1 + $0x26c] ss:$16 sps:$4 sm:$0xff]   ;;  %v7749_v26 = vld [vmem:[%s11635_s1 + $0x260] ss:$16 sps:$4 sm:$0xff]  }
  0x29   : > { %v7752_v27 = vld [vmem:[%s11635_s1 + $0x268] ss:$16 sps:$4 sm:$0xff]   ;;  %v7757_v28 = vld [vmem:[%s11635_s1 + $0x284] ss:$16 sps:$4 sm:$0xff]   ;;  %v7760_v29 = vld [vmem:[%s11635_s1 + $0x28c] ss:$16 sps:$4 sm:$0xff]  }
  0x2a   : > { %v7769_v36 = vld [vmem:[%s11635_s1 + $0x2c4] ss:$16 sps:$4 sm:$0xff]   ;;  %v7772_v37 = vld [vmem:[%s11635_s1 + $0x2cc] ss:$16 sps:$4 sm:$0xff]   ;;  %v7767_v38 = vld [vmem:[%s11635_s1 + $0x2c0] ss:$16 sps:$4 sm:$0xff]  }
  0x2b   : > { %5158 = vmatpush1.bf16.msra.mxu0 %v7681_v30  ;;  %5691 = vmatpush1.bf16.msra.mxu1 %v7682_v31  ;;  %v7755_v30 = vld [vmem:[%s11635_s1 + $0x280] ss:$16 sps:$4 sm:$0xff]   ;;  %v7758_v31 = vld [vmem:[%s11635_s1 + $0x288] ss:$16 sps:$4 sm:$0xff]   ;;  %v7802_v60 = vld [vmem:[%s11635_s1 + $0x36c] ss:$16 sps:$4 sm:$0xff]  }
  0x2c   : > { %5159 = vmatprep.subr.bf16.mxu0 %v7683_v32  ;;  %5692 = vmatprep.subr.bf16.mxu1 %v7685_v33  ;;  %v7763_v32 = vld [vmem:[%s11635_s1 + $0x2a4] ss:$16 sps:$4 sm:$0xff]   ;;  %v7766_v33 = vld [vmem:[%s11635_s1 + $0x2ac] ss:$16 sps:$4 sm:$0xff]   ;;  %v7773_v42 = vld [vmem:[%s11635_s1 + $0x2e0] ss:$16 sps:$4 sm:$0xff]  }
  0x2d   : > { %v7788_v54 = vld [vmem:[%s11635_s1 + $0x328] ss:$16 sps:$4 sm:$0xff]   ;;  %s7446_s23 = sshll.u32 %s8966_s22, 4  ;;  %s6556_s7 = scalar_lea.sflag [#allocation3], %s213_s14 }
  0x2e   : > { %v7794_v58 = vld [vmem:[%s11635_s1 + $0x348] ss:$16 sps:$4 sm:$0xff]   ;;  %s11592_s26 = scalar_lea.hbm %s11639_s5, %s7446_s23  ;;  %s8914_s22 = smov [#allocation2]  }
  0x2f   : > { %5160 = vmatpush1.bf16.msra.mxu0 %v7687_v34  ;;  %5693 = vmatpush1.bf16.msra.mxu1 %v7688_v35  ;;  %v7761_v34 = vld [vmem:[%s11635_s1 + $0x2a0] ss:$16 sps:$4 sm:$0xff]   ;;  %v7764_v35 = vld [vmem:[%s11635_s1 + $0x2a8] ss:$16 sps:$4 sm:$0xff]   ;;  %s8852_s9 = sshll.u32 %s8914_s22, 4  ;;  %s8853_s9 = int_to_ptr.vmem [resolvable:$false] %s8852_s9 }
  0x30   : > { %5161 = vmatprep.subr.bf16.mxu0 %v7689_v39  ;;  %5694 = vmatprep.subr.bf16.mxu1 %v7691_v40  ;;  %v7770_v39 = vld [vmem:[%s11635_s1 + $0x2c8] ss:$16 sps:$4 sm:$0xff]   ;;  %v7775_v40 = vld [vmem:[%s11635_s1 + $0x2e4] ss:$16 sps:$4 sm:$0xff]   ;;  %s8854_s10 = scalar_lea.vmem %s8853_s9, 32 }
  0x33   : > { %5162 = vmatpush1.bf16.msra.mxu0 %v7693_v41  ;;  %5695 = vmatpush1.bf16.msra.mxu1 %v7694_v44  ;;  %v7778_v41 = vld [vmem:[%s11635_s1 + $0x2ec] ss:$16 sps:$4 sm:$0xff]   ;;  %v7776_v44 = vld [vmem:[%s11635_s1 + $0x2e8] ss:$16 sps:$4 sm:$0xff]  }
  0x34   : > { %5163 = vmatprep.subr.bf16.mxu0 %v7695_v45  ;;  %5696 = vmatprep.subr.bf16.mxu1 %v7697_v46  ;;  %v7781_v45 = vld [vmem:[%s11635_s1 + $0x304] ss:$16 sps:$4 sm:$0xff]   ;;  %v7784_v46 = vld [vmem:[%s11635_s1 + $0x30c] ss:$16 sps:$4 sm:$0xff]  }
  0x37   : > { %5164 = vmatpush1.bf16.msra.mxu0 %v7699_v47  ;;  %5697 = vmatpush1.bf16.msra.mxu1 %v7700_v48  ;;  %v7779_v47 = vld [vmem:[%s11635_s1 + $0x300] ss:$16 sps:$4 sm:$0xff]   ;;  %v7782_v48 = vld [vmem:[%s11635_s1 + $0x308] ss:$16 sps:$4 sm:$0xff]  }
  0x38   : > { %5165 = vmatprep.subr.bf16.mxu0 %v7701_v50  ;;  %5698 = vmatprep.subr.bf16.mxu1 %v7703_v51  ;;  %v7787_v50 = vld [vmem:[%s11635_s1 + $0x324] ss:$16 sps:$4 sm:$0xff]   ;;  %v7790_v51 = vld [vmem:[%s11635_s1 + $0x32c] ss:$16 sps:$4 sm:$0xff]  }
  0x3b   : > { %5166 = vmatpush1.bf16.msra.mxu0 %v7705_v53  ;;  %5699 = vmatpush1.bf16.msra.mxu1 %v7706_v55  ;;  %v7785_v53 = vld [vmem:[%s11635_s1 + $0x320] ss:$16 sps:$4 sm:$0xff]   ;;  %v7793_v55 = vld [vmem:[%s11635_s1 + $0x344] ss:$16 sps:$4 sm:$0xff]  }
  0x3c   : > { %5167 = vmatprep.subr.bf16.mxu0 %v7707_v56  ;;  %5700 = vmatprep.subr.bf16.mxu1 %v7709_v57  ;;  %v7796_v56 = vld [vmem:[%s11635_s1 + $0x34c] ss:$16 sps:$4 sm:$0xff]   ;;  %v7791_v57 = vld [vmem:[%s11635_s1 + $0x340] ss:$16 sps:$4 sm:$0xff]  }
  0x3f   : > { %5168 = vmatpush1.bf16.msra.mxu0 %v7711_v59  ;;  %5701 = vmatpush1.bf16.msra.mxu1 %v7712_v61  ;;  %v7799_v59 = vld [vmem:[%s11635_s1 + $0x364] ss:$16 sps:$4 sm:$0xff]   ;;  %v7797_v61 = vld [vmem:[%s11635_s1 + $0x360] ss:$16 sps:$4 sm:$0xff]  }
  0x40   : > { %5169 = vmatprep.subr.bf16.mxu0 %v7713_v62  ;;  %5702 = vmatprep.subr.bf16.mxu1 %v7715_v63  ;;  %v7800_v62 = vld [vmem:[%s11635_s1 + $0x368] ss:$16 sps:$4 sm:$0xff]   ;;  %v7805_v63 = vld [vmem:[%s11635_s1 + $0x384] ss:$16 sps:$4 sm:$0xff]  }
  0x43   : > { %5170 = vmatpush1.bf16.msra.mxu0 %v7717_v0  ;;  %5703 = vmatpush1.bf16.msra.mxu1 %v7718_v1  ;;  %v7808_v0 = vld [vmem:[%s11635_s1 + $0x38c] ss:$16 sps:$4 sm:$0xff]   ;;  %v7803_v1 = vld [vmem:[%s11635_s1 + $0x380] ss:$16 sps:$4 sm:$0xff]  }
  0x44   : > { %5171 = vmatprep.subr.bf16.mxu0 %v7719_v2  ;;  %5704 = vmatprep.subr.bf16.mxu1 %v7721_v3  ;;  %v7806_v2 = vld [vmem:[%s11635_s1 + $0x388] ss:$16 sps:$4 sm:$0xff]   ;;  %v7811_v3 = vld [vmem:[%s11635_s1 + $0x3a4] ss:$16 sps:$4 sm:$0xff]  }
  0x47   : > { %5172 = vmatpush1.bf16.msra.mxu0 %v7723_v4  ;;  %5705 = vmatpush1.bf16.msra.mxu1 %v7724_v5  ;;  %v7814_v4 = vld [vmem:[%s11635_s1 + $0x3ac] ss:$16 sps:$4 sm:$0xff]   ;;  %v7809_v5 = vld [vmem:[%s11635_s1 + $0x3a0] ss:$16 sps:$4 sm:$0xff]  }
  0x48   : > { %5173 = vmatprep.subr.bf16.mxu0 %v7725_v6  ;;  %5706 = vmatprep.subr.bf16.mxu1 %v7727_v7  ;;  %v7812_v6 = vld [vmem:[%s11635_s1 + $0x3a8] ss:$16 sps:$4 sm:$0xff]   ;;  %v7817_v7 = vld [vmem:[%s11635_s1 + $0x3c4] ss:$16 sps:$4 sm:$0xff]  }
  0x4b   : > { %5174 = vmatpush1.bf16.msra.mxu0 %v7729_v8  ;;  %5707 = vmatpush1.bf16.msra.mxu1 %v7730_v9  ;;  %v7820_v8 = vld [vmem:[%s11635_s1 + $0x3cc] ss:$16 sps:$4 sm:$0xff]   ;;  %v1013_v9 = vcombine.high %v9144_v52, %v9144_v52 }
  0x4c   : > { %5184 = vmatprep.subr.bf16.mxu0 %v7733_v10  ;;  %5717 = vmatprep.subr.bf16.mxu1 %v7736_v11  ;;  %v7815_v10 = vld [vmem:[%s11635_s1 + $0x3c0] ss:$16 sps:$4 sm:$0xff]   ;;  %v7818_v11 = vld [vmem:[%s11635_s1 + $0x3c8] ss:$16 sps:$4 sm:$0xff]   ;;  %v7826_v52 = vld [vmem:[%s11635_s1 + $0x3ec] ss:$16 sps:$4 sm:$0xff]  }
  0x4e   : > { %5176 = vmatmul.mubr.bf16.vlgmr.msra.gmra.mrb[0].mxu0 %v9213_v13  ;;  %5709 = vmatmul.mubr.bf16.vlgmr.msra.gmra.mrb[0].mxu1 %v9213_v13 }
  0x4f   : > { %5185 = vmatpush1.bf16.msra.mxu0 %v7731_v12  ;;  %5718 = vmatpush1.bf16.msra.mxu1 %v7734_v14  ;;  %v7823_v12 = vld [vmem:[%s11635_s1 + $0x3e4] ss:$16 sps:$4 sm:$0xff]   ;;  %v9397_v14 = vrot.slane %v1013_v9, %v9135_v49  ;;  %v7902_v9 = vld [vmem:[%s11635_s1 + $0x588] ss:$16 sps:$4 sm:$0xff]  }
  0x50   : > { %5186 = vmatprep.subr.bf16.mxu0 %v7739_v15  ;;  %5719 = vmatprep.subr.bf16.mxu1 %v7742_v16  ;;  %v7821_v15 = vld [vmem:[%s11635_s1 + $0x3e0] ss:$16 sps:$4 sm:$0xff]   ;;  %v7824_v16 = vld [vmem:[%s11635_s1 + $0x3e8] ss:$16 sps:$4 sm:$0xff]  }
  0x51   : > { %5216 = vmatprep.mubr.bf16.mxu0 %v1060_v17  ;;  %5749 = vmatprep.mubr.bf16.mxu1 %v1060_v17  ;;  %v7829_v17 = vld [vmem:[%s11635_s1 + $0x404] ss:$16 sps:$4 sm:$0xff]  }
  0x53   : > { %5187 = vmatpush1.bf16.msra.mxu0 %v7737_v18  ;;  %5720 = vmatpush1.bf16.msra.mxu1 %v7740_v19  ;;  %v7832_v18 = vld [vmem:[%s11635_s1 + $0x40c] ss:$16 sps:$4 sm:$0xff]   ;;  %v1029_v19 = vcombine.high %v9397_v14, %v9397_v14 }
  0x54   : > { %5188 = vmatprep.subr.bf16.mxu0 %v7745_v20  ;;  %5721 = vmatprep.subr.bf16.mxu1 %v7748_v21  ;;  %v7827_v20 = vld [vmem:[%s11635_s1 + $0x400] ss:$16 sps:$4 sm:$0xff]   ;;  %v1058_v21 = vcombine.high %v9213_v13, %v9213_v13 }
  0x55   : > { %v7833_v13 = vld [vmem:[%s11635_s1 + $0x420] ss:$16 sps:$4 sm:$0xff]  }
  0x57   : > { %5189 = vmatpush1.bf16.msra.mxu0 %v7743_v22  ;;  %5722 = vmatpush1.bf16.msra.mxu1 %v7746_v23  ;;  %v7830_v22 = vld [vmem:[%s11635_s1 + $0x408] ss:$16 sps:$4 sm:$0xff]   ;;  %v7835_v23 = vld [vmem:[%s11635_s1 + $0x424] ss:$16 sps:$4 sm:$0xff]  }
  0x58   : > { %5190 = vmatprep.subr.bf16.mxu0 %v7751_v24  ;;  %5723 = vmatprep.subr.bf16.mxu1 %v7754_v25  ;;  %v7838_v24 = vld [vmem:[%s11635_s1 + $0x42c] ss:$16 sps:$4 sm:$0xff]   ;;  %v9428_v25 = vrot.slane %v1029_v19, %v9135_v49  ;;  %v7919_v19 = vld [vmem:[%s11635_s1 + $0x5e4] ss:$16 sps:$4 sm:$0xff]  }
  0x5b   : > { %5191 = vmatpush1.bf16.msra.mxu0 %v7749_v26  ;;  %5724 = vmatpush1.bf16.msra.mxu1 %v7752_v27  ;;  %v7836_v26 = vld [vmem:[%s11635_s1 + $0x428] ss:$16 sps:$4 sm:$0xff]   ;;  %v7841_v27 = vld [vmem:[%s11635_s1 + $0x444] ss:$16 sps:$4 sm:$0xff]  }
  0x5c   : > { %5192 = vmatprep.subr.bf16.mxu0 %v7757_v28  ;;  %5725 = vmatprep.subr.bf16.mxu1 %v7760_v29  ;;  %v7844_v28 = vld [vmem:[%s11635_s1 + $0x44c] ss:$16 sps:$4 sm:$0xff]   ;;  %v7839_v29 = vld [vmem:[%s11635_s1 + $0x440] ss:$16 sps:$4 sm:$0xff]  }
  0x5f   : > { %5193 = vmatpush1.bf16.msra.mxu0 %v7755_v30  ;;  %5726 = vmatpush1.bf16.msra.mxu1 %v7758_v31  ;;  %v7842_v30 = vld [vmem:[%s11635_s1 + $0x448] ss:$16 sps:$4 sm:$0xff]   ;;  %v7847_v31 = vld [vmem:[%s11635_s1 + $0x464] ss:$16 sps:$4 sm:$0xff]  }
  0x60   : > { %5194 = vmatprep.subr.bf16.mxu0 %v7763_v32  ;;  %5727 = vmatprep.subr.bf16.mxu1 %v7766_v33  ;;  %v7850_v32 = vld [vmem:[%s11635_s1 + $0x46c] ss:$16 sps:$4 sm:$0xff]   ;;  %v7845_v33 = vld [vmem:[%s11635_s1 + $0x460] ss:$16 sps:$4 sm:$0xff]  }
  0x63   : > { %5195 = vmatpush1.bf16.msra.mxu0 %v7761_v34  ;;  %5728 = vmatpush1.bf16.msra.mxu1 %v7764_v35  ;;  %v7848_v34 = vld [vmem:[%s11635_s1 + $0x468] ss:$16 sps:$4 sm:$0xff]   ;;  %v7853_v35 = vld [vmem:[%s11635_s1 + $0x484] ss:$16 sps:$4 sm:$0xff]  }
  0x64   : > { %5196 = vmatprep.subr.bf16.mxu0 %v7769_v36  ;;  %5729 = vmatprep.subr.bf16.mxu1 %v7772_v37  ;;  %v7856_v36 = vld [vmem:[%s11635_s1 + $0x48c] ss:$16 sps:$4 sm:$0xff]   ;;  %v7851_v37 = vld [vmem:[%s11635_s1 + $0x480] ss:$16 sps:$4 sm:$0xff]  }
  0x67   : > { %5197 = vmatpush1.bf16.msra.mxu0 %v7767_v38  ;;  %5730 = vmatpush1.bf16.msra.mxu1 %v7770_v39  ;;  %v7854_v38 = vld [vmem:[%s11635_s1 + $0x488] ss:$16 sps:$4 sm:$0xff]   ;;  %v7859_v39 = vld [vmem:[%s11635_s1 + $0x4a4] ss:$16 sps:$4 sm:$0xff]  }
  0x68   : > { %5198 = vmatprep.subr.bf16.mxu0 %v7775_v40  ;;  %5731 = vmatprep.subr.bf16.mxu1 %v7778_v41  ;;  %v7862_v40 = vld [vmem:[%s11635_s1 + $0x4ac] ss:$16 sps:$4 sm:$0xff]   ;;  %v7857_v41 = vld [vmem:[%s11635_s1 + $0x4a0] ss:$16 sps:$4 sm:$0xff]  }
  0x6b   : > { %5199 = vmatpush1.bf16.msra.mxu0 %v7773_v42  ;;  %5732 = vmatpush1.bf16.msra.mxu1 %v7776_v44  ;;  %v7860_v42 = vld [vmem:[%s11635_s1 + $0x4a8] ss:$16 sps:$4 sm:$0xff]   ;;  %v7865_v44 = vld [vmem:[%s11635_s1 + $0x4c4] ss:$16 sps:$4 sm:$0xff]  }
  0x6c   : > { %5200 = vmatprep.subr.bf16.mxu0 %v7781_v45  ;;  %5733 = vmatprep.subr.bf16.mxu1 %v7784_v46  ;;  %v7868_v45 = vld [vmem:[%s11635_s1 + $0x4cc] ss:$16 sps:$4 sm:$0xff]   ;;  %v7863_v46 = vld [vmem:[%s11635_s1 + $0x4c0] ss:$16 sps:$4 sm:$0xff]  }
  0x6f   : > { %5201 = vmatpush1.bf16.msra.mxu0 %v7779_v47  ;;  %5734 = vmatpush1.bf16.msra.mxu1 %v7782_v48  ;;  %v7866_v47 = vld [vmem:[%s11635_s1 + $0x4c8] ss:$16 sps:$4 sm:$0xff]   ;;  %v7871_v48 = vld [vmem:[%s11635_s1 + $0x4e4] ss:$16 sps:$4 sm:$0xff]  }
  0x70   : > { %5202 = vmatprep.subr.bf16.mxu0 %v7787_v50  ;;  %5735 = vmatprep.subr.bf16.mxu1 %v7790_v51  ;;  %v7874_v50 = vld [vmem:[%s11635_s1 + $0x4ec] ss:$16 sps:$4 sm:$0xff]   ;;  %v7869_v51 = vld [vmem:[%s11635_s1 + $0x4e0] ss:$16 sps:$4 sm:$0xff]  }
  0x73   : > { %5203 = vmatpush1.bf16.msra.mxu0 %v7785_v53  ;;  %5736 = vmatpush1.bf16.msra.mxu1 %v7788_v54  ;;  %v7872_v53 = vld [vmem:[%s11635_s1 + $0x4e8] ss:$16 sps:$4 sm:$0xff]   ;;  %v7877_v54 = vld [vmem:[%s11635_s1 + $0x504] ss:$16 sps:$4 sm:$0xff]  }
  0x74   : > { %5204 = vmatprep.subr.bf16.mxu0 %v7793_v55  ;;  %5737 = vmatprep.subr.bf16.mxu1 %v7796_v56  ;;  %v7880_v55 = vld [vmem:[%s11635_s1 + $0x50c] ss:$16 sps:$4 sm:$0xff]   ;;  %v7875_v56 = vld [vmem:[%s11635_s1 + $0x500] ss:$16 sps:$4 sm:$0xff]  }
  0x77   : > { %5205 = vmatpush1.bf16.msra.mxu0 %v7791_v57  ;;  %5738 = vmatpush1.bf16.msra.mxu1 %v7794_v58  ;;  %v7878_v57 = vld [vmem:[%s11635_s1 + $0x508] ss:$16 sps:$4 sm:$0xff]   ;;  %v7883_v58 = vld [vmem:[%s11635_s1 + $0x524] ss:$16 sps:$4 sm:$0xff]  }
  0x78   : > { %5206 = vmatprep.subr.bf16.mxu0 %v7799_v59  ;;  %5739 = vmatprep.subr.bf16.mxu1 %v7802_v60  ;;  %v7886_v59 = vld [vmem:[%s11635_s1 + $0x52c] ss:$16 sps:$4 sm:$0xff]   ;;  %v7881_v60 = vld [vmem:[%s11635_s1 + $0x520] ss:$16 sps:$4 sm:$0xff]  }
  0x7b   : > { %5207 = vmatpush1.bf16.msra.mxu0 %v7797_v61  ;;  %5740 = vmatpush1.bf16.msra.mxu1 %v7800_v62  ;;  %v7884_v61 = vld [vmem:[%s11635_s1 + $0x528] ss:$16 sps:$4 sm:$0xff]   ;;  %v7889_v62 = vld [vmem:[%s11635_s1 + $0x544] ss:$16 sps:$4 sm:$0xff]  }
  0x7c   : > { %5208 = vmatprep.subr.bf16.mxu0 %v7805_v63  ;;  %5741 = vmatprep.subr.bf16.mxu1 %v7808_v0  ;;  %v7892_v63 = vld [vmem:[%s11635_s1 + $0x54c] ss:$16 sps:$4 sm:$0xff]   ;;  %v7887_v0 = vld [vmem:[%s11635_s1 + $0x540] ss:$16 sps:$4 sm:$0xff]  }
  0x7f   : > { %5209 = vmatpush1.bf16.msra.mxu0 %v7803_v1  ;;  %5742 = vmatpush1.bf16.msra.mxu1 %v7806_v2  ;;  %v7890_v1 = vld [vmem:[%s11635_s1 + $0x548] ss:$16 sps:$4 sm:$0xff]   ;;  %v7895_v2 = vld [vmem:[%s11635_s1 + $0x564] ss:$16 sps:$4 sm:$0xff]  }
  0x80   : > { %5210 = vmatprep.subr.bf16.mxu0 %v7811_v3  ;;  %5743 = vmatprep.subr.bf16.mxu1 %v7814_v4  ;;  %v7898_v3 = vld [vmem:[%s11635_s1 + $0x56c] ss:$16 sps:$4 sm:$0xff]   ;;  %v7893_v4 = vld [vmem:[%s11635_s1 + $0x560] ss:$16 sps:$4 sm:$0xff]  }
  0x83   : > { %5211 = vmatpush1.bf16.msra.mxu0 %v7809_v5  ;;  %5744 = vmatpush1.bf16.msra.mxu1 %v7812_v6  ;;  %v7896_v5 = vld [vmem:[%s11635_s1 + $0x568] ss:$16 sps:$4 sm:$0xff]   ;;  %v7901_v6 = vld [vmem:[%s11635_s1 + $0x584] ss:$16 sps:$4 sm:$0xff]  }
  0x84   : > { %5212 = vmatprep.subr.bf16.mxu0 %v7817_v7  ;;  %5745 = vmatprep.subr.bf16.mxu1 %v7820_v8  ;;  %v7904_v7 = vld [vmem:[%s11635_s1 + $0x58c] ss:$16 sps:$4 sm:$0xff]   ;;  %v7899_v8 = vld [vmem:[%s11635_s1 + $0x580] ss:$16 sps:$4 sm:$0xff]  }
  0x87   : > { %5213 = vmatpush1.bf16.msra.mxu0 %v7815_v10  ;;  %5746 = vmatpush1.bf16.msra.mxu1 %v7818_v11  ;;  %v7907_v10 = vld [vmem:[%s11635_s1 + $0x5a4] ss:$16 sps:$4 sm:$0xff]   ;;  %v7910_v11 = vld [vmem:[%s11635_s1 + $0x5ac] ss:$16 sps:$4 sm:$0xff]  }
  0x88   : > { %5214 = vmatprep.subr.bf16.mxu0 %v7823_v12  ;;  %5747 = vmatprep.subr.bf16.mxu1 %v7826_v52  ;;  %v7905_v12 = vld [vmem:[%s11635_s1 + $0x5a0] ss:$16 sps:$4 sm:$0xff]   ;;  %v7908_v52 = vld [vmem:[%s11635_s1 + $0x5a8] ss:$16 sps:$4 sm:$0xff]  }
  0x8b   : > { %5215 = vmatpush1.bf16.msra.mxu0 %v7821_v15  ;;  %5748 = vmatpush1.bf16.msra.mxu1 %v7824_v16  ;;  %v7913_v15 = vld [vmem:[%s11635_s1 + $0x5c4] ss:$16 sps:$4 sm:$0xff]   ;;  %v7916_v16 = vld [vmem:[%s11635_s1 + $0x5cc] ss:$16 sps:$4 sm:$0xff]  }
  0x8c   : > { %5225 = vmatprep.subr.bf16.mxu0 %v7829_v17  ;;  %5758 = vmatprep.subr.bf16.mxu1 %v7832_v18  ;;  %v7911_v17 = vld [vmem:[%s11635_s1 + $0x5c0] ss:$16 sps:$4 sm:$0xff]   ;;  %v7914_v18 = vld [vmem:[%s11635_s1 + $0x5c8] ss:$16 sps:$4 sm:$0xff]  }
  0x8e   : > { %5217 = vmatmul.mubr.bf16.vlgmr.msra.gmra.mrb[0].mxu0 %v1058_v21  ;;  %5750 = vmatmul.mubr.bf16.vlgmr.msra.gmra.mrb[0].mxu1 %v1058_v21  ;;  %v7917_v21 = vld [vmem:[%s11635_s1 + $0x5e0] ss:$16 sps:$4 sm:$0xff]  }
  0x8f   : > { %5226 = vmatpush1.bf16.msra.mxu0 %v7827_v20  ;;  %5759 = vmatpush1.bf16.msra.mxu1 %v7830_v22  ;;  %v7922_v20 = vld [vmem:[%s11635_s1 + $0x5ec] ss:$16 sps:$4 sm:$0xff]   ;;  %v7920_v22 = vld [vmem:[%s11635_s1 + $0x5e8] ss:$16 sps:$4 sm:$0xff]  }
  0x90   : > { %5227 = vmatprep.subr.bf16.mxu0 %v7835_v23  ;;  %5760 = vmatprep.subr.bf16.mxu1 %v7838_v24  ;;  %v7926_v23 = vld [vmem:[%s11635_s1 + $0x604] ss:$16 sps:$4 sm:$0xff]   ;;  %v7929_v24 = vld [vmem:[%s11635_s1 + $0x60c] ss:$16 sps:$4 sm:$0xff]  }
  0x91   : > { %5257 = vmatprep.mubr.bf16.mxu0 %v9428_v25  ;;  %5790 = vmatprep.mubr.bf16.mxu1 %v9428_v25 }
  0x93   : > { %5228 = vmatpush1.bf16.msra.mxu0 %v7833_v13  ;;  %5761 = vmatpush1.bf16.msra.mxu1 %v7836_v26  ;;  %v7924_v13 = vld [vmem:[%s11635_s1 + $0x600] ss:$16 sps:$4 sm:$0xff]   ;;  %v9617_v26 = vrot.slane %v9397_v14, %v9135_v49  ;;  %v1061_v14 = vcombine.high %v9428_v25, %v9428_v25  ;;  %v7938_v25 = vld [vmem:[%s11635_s1 + $0x644] ss:$16 sps:$4 sm:$0xff]  }
  0x94   : > { %5229 = vmatprep.subr.bf16.mxu0 %v7841_v27  ;;  %5762 = vmatprep.subr.bf16.mxu1 %v7844_v28  ;;  %v7927_v27 = vld [vmem:[%s11635_s1 + $0x608] ss:$16 sps:$4 sm:$0xff]   ;;  %v7932_v28 = vld [vmem:[%s11635_s1 + $0x624] ss:$16 sps:$4 sm:$0xff]  }
  0x97   : > { %5230 = vmatpush1.bf16.msra.mxu0 %v7839_v29  ;;  %5763 = vmatpush1.bf16.msra.mxu1 %v7842_v30  ;;  %v7935_v29 = vld [vmem:[%s11635_s1 + $0x62c] ss:$16 sps:$4 sm:$0xff]   ;;  %v7930_v30 = vld [vmem:[%s11635_s1 + $0x620] ss:$16 sps:$4 sm:$0xff]  }
  0x98   : > { %5231 = vmatprep.subr.bf16.mxu0 %v7847_v31  ;;  %5764 = vmatprep.subr.bf16.mxu1 %v7850_v32  ;;  %v7933_v31 = vld [vmem:[%s11635_s1 + $0x628] ss:$16 sps:$4 sm:$0xff]   ;;  %v7941_v32 = vld [vmem:[%s11635_s1 + $0x64c] ss:$16 sps:$4 sm:$0xff]  }
  0x9b   : > { %5232 = vmatpush1.bf16.msra.mxu0 %v7845_v33  ;;  %5765 = vmatpush1.bf16.msra.mxu1 %v7848_v34  ;;  %v7936_v33 = vld [vmem:[%s11635_s1 + $0x640] ss:$16 sps:$4 sm:$0xff]   ;;  %v7939_v34 = vld [vmem:[%s11635_s1 + $0x648] ss:$16 sps:$4 sm:$0xff]  }
  0x9c   : > { %5233 = vmatprep.subr.bf16.mxu0 %v7853_v35  ;;  %5766 = vmatprep.subr.bf16.mxu1 %v7856_v36  ;;  %v7944_v35 = vld [vmem:[%s11635_s1 + $0x664] ss:$16 sps:$4 sm:$0xff]   ;;  %v7947_v36 = vld [vmem:[%s11635_s1 + $0x66c] ss:$16 sps:$4 sm:$0xff]  }
  0x9f   : > { %5234 = vmatpush1.bf16.msra.mxu0 %v7851_v37  ;;  %5767 = vmatpush1.bf16.msra.mxu1 %v7854_v38  ;;  %v7942_v37 = vld [vmem:[%s11635_s1 + $0x660] ss:$16 sps:$4 sm:$0xff]   ;;  %v7945_v38 = vld [vmem:[%s11635_s1 + $0x668] ss:$16 sps:$4 sm:$0xff]  }
  0xa0   : > { %5235 = vmatprep.subr.bf16.mxu0 %v7859_v39  ;;  %5768 = vmatprep.subr.bf16.mxu1 %v7862_v40  ;;  %v7950_v39 = vld [vmem:[%s11635_s1 + $0x684] ss:$16 sps:$4 sm:$0xff]   ;;  %v7953_v40 = vld [vmem:[%s11635_s1 + $0x68c] ss:$16 sps:$4 sm:$0xff]  }
  0xa3   : > { %5236 = vmatpush1.bf16.msra.mxu0 %v7857_v41  ;;  %5769 = vmatpush1.bf16.msra.mxu1 %v7860_v42  ;;  %v7948_v41 = vld [vmem:[%s11635_s1 + $0x680] ss:$16 sps:$4 sm:$0xff]   ;;  %v7951_v42 = vld [vmem:[%s11635_s1 + $0x688] ss:$16 sps:$4 sm:$0xff]  }
  0xa4   : > { %5237 = vmatprep.subr.bf16.mxu0 %v7865_v44  ;;  %5770 = vmatprep.subr.bf16.mxu1 %v7868_v45  ;;  %v7956_v44 = vld [vmem:[%s11635_s1 + $0x6a4] ss:$16 sps:$4 sm:$0xff]   ;;  %v7959_v45 = vld [vmem:[%s11635_s1 + $0x6ac] ss:$16 sps:$4 sm:$0xff]  }
  0xa7   : > { %5238 = vmatpush1.bf16.msra.mxu0 %v7863_v46  ;;  %5771 = vmatpush1.bf16.msra.mxu1 %v7866_v47  ;;  %v7954_v46 = vld [vmem:[%s11635_s1 + $0x6a0] ss:$16 sps:$4 sm:$0xff]   ;;  %v7957_v47 = vld [vmem:[%s11635_s1 + $0x6a8] ss:$16 sps:$4 sm:$0xff]  }
  0xa8   : > { %5239 = vmatprep.subr.bf16.mxu0 %v7871_v48  ;;  %5772 = vmatprep.subr.bf16.mxu1 %v7874_v50  ;;  %v7962_v48 = vld [vmem:[%s11635_s1 + $0x6c4] ss:$16 sps:$4 sm:$0xff]   ;;  %v7965_v50 = vld [vmem:[%s11635_s1 + $0x6cc] ss:$16 sps:$4 sm:$0xff]  }
  0xab   : > { %5240 = vmatpush1.bf16.msra.mxu0 %v7869_v51  ;;  %5773 = vmatpush1.bf16.msra.mxu1 %v7872_v53  ;;  %v7960_v51 = vld [vmem:[%s11635_s1 + $0x6c0] ss:$16 sps:$4 sm:$0xff]   ;;  %v7963_v53 = vld [vmem:[%s11635_s1 + $0x6c8] ss:$16 sps:$4 sm:$0xff]  }
  0xac   : > { %5241 = vmatprep.subr.bf16.mxu0 %v7877_v54  ;;  %5774 = vmatprep.subr.bf16.mxu1 %v7880_v55  ;;  %v7968_v54 = vld [vmem:[%s11635_s1 + $0x6e4] ss:$16 sps:$4 sm:$0xff]   ;;  %v7971_v55 = vld [vmem:[%s11635_s1 + $0x6ec] ss:$16 sps:$4 sm:$0xff]  }
  0xaf   : > { %5242 = vmatpush1.bf16.msra.mxu0 %v7875_v56  ;;  %5775 = vmatpush1.bf16.msra.mxu1 %v7878_v57  ;;  %v7966_v56 = vld [vmem:[%s11635_s1 + $0x6e0] ss:$16 sps:$4 sm:$0xff]   ;;  %v7969_v57 = vld [vmem:[%s11635_s1 + $0x6e8] ss:$16 sps:$4 sm:$0xff]  }
  0xb0   : > { %5243 = vmatprep.subr.bf16.mxu0 %v7883_v58  ;;  %5776 = vmatprep.subr.bf16.mxu1 %v7886_v59  ;;  %v7974_v58 = vld [vmem:[%s11635_s1 + $0x704] ss:$16 sps:$4 sm:$0xff]   ;;  %v7977_v59 = vld [vmem:[%s11635_s1 + $0x70c] ss:$16 sps:$4 sm:$0xff]  }
  0xb3   : > { %5244 = vmatpush1.bf16.msra.mxu0 %v7881_v60  ;;  %5777 = vmatpush1.bf16.msra.mxu1 %v7884_v61  ;;  %v7972_v60 = vld [vmem:[%s11635_s1 + $0x700] ss:$16 sps:$4 sm:$0xff]   ;;  %v7975_v61 = vld [vmem:[%s11635_s1 + $0x708] ss:$16 sps:$4 sm:$0xff]  }
  0xb4   : > { %5245 = vmatprep.subr.bf16.mxu0 %v7889_v62  ;;  %5778 = vmatprep.subr.bf16.mxu1 %v7892_v63  ;;  %v7980_v62 = vld [vmem:[%s11635_s1 + $0x724] ss:$16 sps:$4 sm:$0xff]   ;;  %v7983_v63 = vld [vmem:[%s11635_s1 + $0x72c] ss:$16 sps:$4 sm:$0xff]  }
  0xb7   : > { %5246 = vmatpush1.bf16.msra.mxu0 %v7887_v0  ;;  %5779 = vmatpush1.bf16.msra.mxu1 %v7890_v1  ;;  %v7978_v0 = vld [vmem:[%s11635_s1 + $0x720] ss:$16 sps:$4 sm:$0xff]   ;;  %v7981_v1 = vld [vmem:[%s11635_s1 + $0x728] ss:$16 sps:$4 sm:$0xff]  }
  0xb8   : > { %5247 = vmatprep.subr.bf16.mxu0 %v7895_v2  ;;  %5780 = vmatprep.subr.bf16.mxu1 %v7898_v3  ;;  %v7986_v2 = vld [vmem:[%s11635_s1 + $0x744] ss:$16 sps:$4 sm:$0xff]   ;;  %v7989_v3 = vld [vmem:[%s11635_s1 + $0x74c] ss:$16 sps:$4 sm:$0xff]  }
  0xbb   : > { %5248 = vmatpush1.bf16.msra.mxu0 %v7893_v4  ;;  %5781 = vmatpush1.bf16.msra.mxu1 %v7896_v5  ;;  %v7984_v4 = vld [vmem:[%s11635_s1 + $0x740] ss:$16 sps:$4 sm:$0xff]   ;;  %v7987_v5 = vld [vmem:[%s11635_s1 + $0x748] ss:$16 sps:$4 sm:$0xff]  }
  0xbc   : > { %5249 = vmatprep.subr.bf16.mxu0 %v7901_v6  ;;  %5782 = vmatprep.subr.bf16.mxu1 %v7904_v7  ;;  %v7992_v6 = vld [vmem:[%s11635_s1 + $0x764] ss:$16 sps:$4 sm:$0xff]   ;;  %v7995_v7 = vld [vmem:[%s11635_s1 + $0x76c] ss:$16 sps:$4 sm:$0xff]  }
  0xbf   : > { %5250 = vmatpush1.bf16.msra.mxu0 %v7899_v8  ;;  %5783 = vmatpush1.bf16.msra.mxu1 %v7902_v9  ;;  %v7990_v8 = vld [vmem:[%s11635_s1 + $0x760] ss:$16 sps:$4 sm:$0xff]   ;;  %v7993_v9 = vld [vmem:[%s11635_s1 + $0x768] ss:$16 sps:$4 sm:$0xff]  }
  0xc0   : > { %5251 = vmatprep.subr.bf16.mxu0 %v7907_v10  ;;  %5784 = vmatprep.subr.bf16.mxu1 %v7910_v11  ;;  %v7998_v10 = vld [vmem:[%s11635_s1 + $0x784] ss:$16 sps:$4 sm:$0xff]   ;;  %v8001_v11 = vld [vmem:[%s11635_s1 + $0x78c] ss:$16 sps:$4 sm:$0xff]  }
  0xc3   : > { %5252 = vmatpush1.bf16.msra.mxu0 %v7905_v12  ;;  %5785 = vmatpush1.bf16.msra.mxu1 %v7908_v52  ;;  %v7996_v12 = vld [vmem:[%s11635_s1 + $0x780] ss:$16 sps:$4 sm:$0xff]   ;;  %v7999_v52 = vld [vmem:[%s11635_s1 + $0x788] ss:$16 sps:$4 sm:$0xff]  }
  0xc4   : > { %5253 = vmatprep.subr.bf16.mxu0 %v7913_v15  ;;  %5786 = vmatprep.subr.bf16.mxu1 %v7916_v16  ;;  %v8004_v15 = vld [vmem:[%s11635_s1 + $0x7a4] ss:$16 sps:$4 sm:$0xff]   ;;  %v8007_v16 = vld [vmem:[%s11635_s1 + $0x7ac] ss:$16 sps:$4 sm:$0xff]  }
  0xc7   : > { %5254 = vmatpush1.bf16.msra.mxu0 %v7911_v17  ;;  %5787 = vmatpush1.bf16.msra.mxu1 %v7914_v18  ;;  %v8002_v17 = vld [vmem:[%s11635_s1 + $0x7a0] ss:$16 sps:$4 sm:$0xff]   ;;  %v8005_v18 = vld [vmem:[%s11635_s1 + $0x7a8] ss:$16 sps:$4 sm:$0xff]  }
  0xc8   : > { %5255 = vmatprep.subr.bf16.mxu0 %v7919_v19  ;;  %5788 = vmatprep.subr.bf16.mxu1 %v7922_v20  ;;  %v8010_v19 = vld [vmem:[%s11635_s1 + $0x7c4] ss:$16 sps:$4 sm:$0xff]   ;;  %v8013_v20 = vld [vmem:[%s11635_s1 + $0x7cc] ss:$16 sps:$4 sm:$0xff]  }
  0xcb   : > { %5256 = vmatpush1.bf16.msra.mxu0 %v7917_v21  ;;  %5789 = vmatpush1.bf16.msra.mxu1 %v7920_v22  ;;  %v9789_v21 = vld.sshfl [vmem:[%s9132_s17 + $0x8] sm:$0xff pattern:$0x75316420]  ;;  %v8008_v22 = vld [vmem:[%s11635_s1 + $0x7c0] ss:$16 sps:$4 sm:$0xff]  }
  0xcc   : > { %5266 = vmatprep.subr.bf16.mxu0 %v7926_v23  ;;  %5799 = vmatprep.subr.bf16.mxu1 %v7929_v24  ;;  %v8011_v23 = vld [vmem:[%s11635_s1 + $0x7c8] ss:$16 sps:$4 sm:$0xff]   ;;  %v8016_v24 = vld [vmem:[%s11635_s1 + $0x7e4] ss:$16 sps:$4 sm:$0xff]  }
  0xce   : > { %5258 = vmatmul.mubr.bf16.vlgmr.msra.gmra.mrb[0].mxu0 %v9617_v26  ;;  %5791 = vmatmul.mubr.bf16.vlgmr.msra.gmra.mrb[0].mxu1 %v9617_v26 }
  0xcf   : > { %5267 = vmatpush1.bf16.msra.mxu0 %v7924_v13  ;;  %5800 = vmatpush1.bf16.msra.mxu1 %v7927_v27  ;;  %v8019_v13 = vld [vmem:[%s11635_s1 + $0x7ec] ss:$16 sps:$4 sm:$0xff]   ;;  %v8014_v27 = vld [vmem:[%s11635_s1 + $0x7e0] ss:$16 sps:$4 sm:$0xff]  }
  0xd0   : > { %5268 = vmatprep.subr.bf16.mxu0 %v7932_v28  ;;  %5801 = vmatprep.subr.bf16.mxu1 %v7935_v29  ;;  %v8017_v28 = vld [vmem:[%s11635_s1 + $0x7e8] ss:$16 sps:$4 sm:$0xff]   ;;  %v8022_v29 = vld [vmem:[%s11635_s1 + $0x804] ss:$16 sps:$4 sm:$0xff]  }
  0xd1   : > { %5298 = vmatprep.mubr.bf16.mxu0 %v1061_v14  ;;  %5831 = vmatprep.mubr.bf16.mxu1 %v1061_v14  ;;  %v8025_v14 = vld [vmem:[%s11635_s1 + $0x80c] ss:$16 sps:$4 sm:$0xff]  }
  0xd3   : > { %5269 = vmatpush1.bf16.msra.mxu0 %v7930_v30  ;;  %5802 = vmatpush1.bf16.msra.mxu1 %v7933_v31  ;;  %v1077_v30 = vcombine.high %v9789_v21, %v9789_v21  ;;  %v1059_v31 = vcombine.high %v9617_v26, %v9617_v26  ;;  %v8031_v26 = vld [vmem:[%s11635_s1 + $0x82c] ss:$16 sps:$4 sm:$0xff]  }
  0xd4   : > { %5270 = vmatprep.subr.bf16.mxu0 %v7938_v25  ;;  %5803 = vmatprep.subr.bf16.mxu1 %v7941_v32  ;;  %v8020_v25 = vld [vmem:[%s11635_s1 + $0x800] ss:$16 sps:$4 sm:$0xff]   ;;  %v8023_v32 = vld [vmem:[%s11635_s1 + $0x808] ss:$16 sps:$4 sm:$0xff]  }
  0xd7   : > { %5271 = vmatpush1.bf16.msra.mxu0 %v7936_v33  ;;  %5804 = vmatpush1.bf16.msra.mxu1 %v7939_v34  ;;  %v8028_v33 = vld [vmem:[%s11635_s1 + $0x824] ss:$16 sps:$4 sm:$0xff]   ;;  %v9832_v34 = vrot.slane %v1077_v30, %v9135_v49 }
  0xd8   : > { %5272 = vmatprep.subr.bf16.mxu0 %v7944_v35  ;;  %5805 = vmatprep.subr.bf16.mxu1 %v7947_v36  ;;  %v8026_v35 = vld [vmem:[%s11635_s1 + $0x820] ss:$16 sps:$4 sm:$0xff]   ;;  %v8029_v36 = vld [vmem:[%s11635_s1 + $0x828] ss:$16 sps:$4 sm:$0xff]   ;;  %v8112_v30 = vld [vmem:[%s11635_s1 + $0x9e4] ss:$16 sps:$4 sm:$0xff]  }
  0xdb   : > { %5273 = vmatpush1.bf16.msra.mxu0 %v7942_v37  ;;  %5806 = vmatpush1.bf16.msra.mxu1 %v7945_v38  ;;  %v8034_v37 = vld [vmem:[%s11635_s1 + $0x844] ss:$16 sps:$4 sm:$0xff]   ;;  %v8037_v38 = vld [vmem:[%s11635_s1 + $0x84c] ss:$16 sps:$4 sm:$0xff]  }
  0xdc   : > { %5274 = vmatprep.subr.bf16.mxu0 %v7950_v39  ;;  %5807 = vmatprep.subr.bf16.mxu1 %v7953_v40  ;;  %v8032_v39 = vld [vmem:[%s11635_s1 + $0x840] ss:$16 sps:$4 sm:$0xff]   ;;  %v8035_v40 = vld [vmem:[%s11635_s1 + $0x848] ss:$16 sps:$4 sm:$0xff]  }
  0xdf   : > { %5275 = vmatpush1.bf16.msra.mxu0 %v7948_v41  ;;  %5808 = vmatpush1.bf16.msra.mxu1 %v7951_v42  ;;  %v8040_v41 = vld [vmem:[%s11635_s1 + $0x864] ss:$16 sps:$4 sm:$0xff]   ;;  %v8043_v42 = vld [vmem:[%s11635_s1 + $0x86c] ss:$16 sps:$4 sm:$0xff]  }
  0xe0   : > { %5276 = vmatprep.subr.bf16.mxu0 %v7956_v44  ;;  %5809 = vmatprep.subr.bf16.mxu1 %v7959_v45  ;;  %v8038_v44 = vld [vmem:[%s11635_s1 + $0x860] ss:$16 sps:$4 sm:$0xff]   ;;  %v8041_v45 = vld [vmem:[%s11635_s1 + $0x868] ss:$16 sps:$4 sm:$0xff]  }
  0xe3   : > { %5277 = vmatpush1.bf16.msra.mxu0 %v7954_v46  ;;  %5810 = vmatpush1.bf16.msra.mxu1 %v7957_v47  ;;  %v8046_v46 = vld [vmem:[%s11635_s1 + $0x884] ss:$16 sps:$4 sm:$0xff]   ;;  %v8049_v47 = vld [vmem:[%s11635_s1 + $0x88c] ss:$16 sps:$4 sm:$0xff]  }
  0xe4   : > { %5278 = vmatprep.subr.bf16.mxu0 %v7962_v48  ;;  %5811 = vmatprep.subr.bf16.mxu1 %v7965_v50  ;;  %v8044_v48 = vld [vmem:[%s11635_s1 + $0x880] ss:$16 sps:$4 sm:$0xff]   ;;  %v8047_v50 = vld [vmem:[%s11635_s1 + $0x888] ss:$16 sps:$4 sm:$0xff]  }
  0xe7   : > { %5279 = vmatpush1.bf16.msra.mxu0 %v7960_v51  ;;  %5812 = vmatpush1.bf16.msra.mxu1 %v7963_v53  ;;  %v8052_v51 = vld [vmem:[%s11635_s1 + $0x8a4] ss:$16 sps:$4 sm:$0xff]   ;;  %v8055_v53 = vld [vmem:[%s11635_s1 + $0x8ac] ss:$16 sps:$4 sm:$0xff]  }
  0xe8   : > { %5280 = vmatprep.subr.bf16.mxu0 %v7968_v54  ;;  %5813 = vmatprep.subr.bf16.mxu1 %v7971_v55  ;;  %v8050_v54 = vld [vmem:[%s11635_s1 + $0x8a0] ss:$16 sps:$4 sm:$0xff]   ;;  %v8053_v55 = vld [vmem:[%s11635_s1 + $0x8a8] ss:$16 sps:$4 sm:$0xff]  }
  0xeb   : > { %5281 = vmatpush1.bf16.msra.mxu0 %v7966_v56  ;;  %5814 = vmatpush1.bf16.msra.mxu1 %v7969_v57  ;;  %v8058_v56 = vld [vmem:[%s11635_s1 + $0x8c4] ss:$16 sps:$4 sm:$0xff]   ;;  %v8061_v57 = vld [vmem:[%s11635_s1 + $0x8cc] ss:$16 sps:$4 sm:$0xff]  }
  0xec   : > { %5282 = vmatprep.subr.bf16.mxu0 %v7974_v58  ;;  %5815 = vmatprep.subr.bf16.mxu1 %v7977_v59  ;;  %v8056_v58 = vld [vmem:[%s11635_s1 + $0x8c0] ss:$16 sps:$4 sm:$0xff]   ;;  %v8059_v59 = vld [vmem:[%s11635_s1 + $0x8c8] ss:$16 sps:$4 sm:$0xff]  }
  0xef   : > { %5283 = vmatpush1.bf16.msra.mxu0 %v7972_v60  ;;  %5816 = vmatpush1.bf16.msra.mxu1 %v7975_v61  ;;  %v8064_v60 = vld [vmem:[%s11635_s1 + $0x8e4] ss:$16 sps:$4 sm:$0xff]   ;;  %v8067_v61 = vld [vmem:[%s11635_s1 + $0x8ec] ss:$16 sps:$4 sm:$0xff]  }
  0xf0   : > { %5284 = vmatprep.subr.bf16.mxu0 %v7980_v62  ;;  %5817 = vmatprep.subr.bf16.mxu1 %v7983_v63  ;;  %v8062_v62 = vld [vmem:[%s11635_s1 + $0x8e0] ss:$16 sps:$4 sm:$0xff]   ;;  %v8065_v63 = vld [vmem:[%s11635_s1 + $0x8e8] ss:$16 sps:$4 sm:$0xff]  }
  0xf3   : > { %5285 = vmatpush1.bf16.msra.mxu0 %v7978_v0  ;;  %5818 = vmatpush1.bf16.msra.mxu1 %v7981_v1  ;;  %v8070_v0 = vld [vmem:[%s11635_s1 + $0x904] ss:$16 sps:$4 sm:$0xff]   ;;  %v8073_v1 = vld [vmem:[%s11635_s1 + $0x90c] ss:$16 sps:$4 sm:$0xff]  }
  0xf4   : > { %5286 = vmatprep.subr.bf16.mxu0 %v7986_v2  ;;  %5819 = vmatprep.subr.bf16.mxu1 %v7989_v3  ;;  %v8068_v2 = vld [vmem:[%s11635_s1 + $0x900] ss:$16 sps:$4 sm:$0xff]   ;;  %v8071_v3 = vld [vmem:[%s11635_s1 + $0x908] ss:$16 sps:$4 sm:$0xff]  }
  0xf7   : > { %5287 = vmatpush1.bf16.msra.mxu0 %v7984_v4  ;;  %5820 = vmatpush1.bf16.msra.mxu1 %v7987_v5  ;;  %v8076_v4 = vld [vmem:[%s11635_s1 + $0x924] ss:$16 sps:$4 sm:$0xff]   ;;  %v8079_v5 = vld [vmem:[%s11635_s1 + $0x92c] ss:$16 sps:$4 sm:$0xff]  }
  0xf8   : > { %5288 = vmatprep.subr.bf16.mxu0 %v7992_v6  ;;  %5821 = vmatprep.subr.bf16.mxu1 %v7995_v7  ;;  %v8074_v6 = vld [vmem:[%s11635_s1 + $0x920] ss:$16 sps:$4 sm:$0xff]   ;;  %v8077_v7 = vld [vmem:[%s11635_s1 + $0x928] ss:$16 sps:$4 sm:$0xff]  }
  0xfb   : > { %5289 = vmatpush1.bf16.msra.mxu0 %v7990_v8  ;;  %5822 = vmatpush1.bf16.msra.mxu1 %v7993_v9  ;;  %v8082_v8 = vld [vmem:[%s11635_s1 + $0x944] ss:$16 sps:$4 sm:$0xff]   ;;  %v8085_v9 = vld [vmem:[%s11635_s1 + $0x94c] ss:$16 sps:$4 sm:$0xff]  }
  0xfc   : > { %5290 = vmatprep.subr.bf16.mxu0 %v7998_v10  ;;  %5823 = vmatprep.subr.bf16.mxu1 %v8001_v11  ;;  %v8080_v10 = vld [vmem:[%s11635_s1 + $0x940] ss:$16 sps:$4 sm:$0xff]   ;;  %v8083_v11 = vld [vmem:[%s11635_s1 + $0x948] ss:$16 sps:$4 sm:$0xff]  }
  0xff   : > { %5291 = vmatpush1.bf16.msra.mxu0 %v7996_v12  ;;  %5824 = vmatpush1.bf16.msra.mxu1 %v7999_v52  ;;  %v8088_v12 = vld [vmem:[%s11635_s1 + $0x964] ss:$16 sps:$4 sm:$0xff]   ;;  %v8091_v52 = vld [vmem:[%s11635_s1 + $0x96c] ss:$16 sps:$4 sm:$0xff]  }
 0x100   : > { %5292 = vmatprep.subr.bf16.mxu0 %v8004_v15  ;;  %5825 = vmatprep.subr.bf16.mxu1 %v8007_v16  ;;  %v8086_v15 = vld [vmem:[%s11635_s1 + $0x960] ss:$16 sps:$4 sm:$0xff]   ;;  %v8089_v16 = vld [vmem:[%s11635_s1 + $0x968] ss:$16 sps:$4 sm:$0xff]  }
 0x103   : > { %5293 = vmatpush1.bf16.msra.mxu0 %v8002_v17  ;;  %5826 = vmatpush1.bf16.msra.mxu1 %v8005_v18  ;;  %v8094_v17 = vld [vmem:[%s11635_s1 + $0x984] ss:$16 sps:$4 sm:$0xff]   ;;  %v8097_v18 = vld [vmem:[%s11635_s1 + $0x98c] ss:$16 sps:$4 sm:$0xff]  }
 0x104   : > { %5294 = vmatprep.subr.bf16.mxu0 %v8010_v19  ;;  %5827 = vmatprep.subr.bf16.mxu1 %v8013_v20  ;;  %v8092_v19 = vld [vmem:[%s11635_s1 + $0x980] ss:$16 sps:$4 sm:$0xff]   ;;  %v8095_v20 = vld [vmem:[%s11635_s1 + $0x988] ss:$16 sps:$4 sm:$0xff]  }
 0x107   : > { %5295 = vmatpush1.bf16.msra.mxu0 %v8008_v22  ;;  %5828 = vmatpush1.bf16.msra.mxu1 %v8011_v23  ;;  %v8100_v22 = vld [vmem:[%s11635_s1 + $0x9a4] ss:$16 sps:$4 sm:$0xff]   ;;  %v8103_v23 = vld [vmem:[%s11635_s1 + $0x9ac] ss:$16 sps:$4 sm:$0xff]  }
 0x108   : > { %5296 = vmatprep.subr.bf16.mxu0 %v8016_v24  ;;  %5829 = vmatprep.subr.bf16.mxu1 %v8019_v13  ;;  %v8098_v24 = vld [vmem:[%s11635_s1 + $0x9a0] ss:$16 sps:$4 sm:$0xff]   ;;  %v8101_v13 = vld [vmem:[%s11635_s1 + $0x9a8] ss:$16 sps:$4 sm:$0xff]  }
 0x10b   : > { %5297 = vmatpush1.bf16.msra.mxu0 %v8014_v27  ;;  %5830 = vmatpush1.bf16.msra.mxu1 %v8017_v28  ;;  %v8106_v27 = vld [vmem:[%s11635_s1 + $0x9c4] ss:$16 sps:$4 sm:$0xff]   ;;  %v8109_v28 = vld [vmem:[%s11635_s1 + $0x9cc] ss:$16 sps:$4 sm:$0xff]  }
 0x10c   : > { %5307 = vmatprep.subr.bf16.mxu0 %v8022_v29  ;;  %5840 = vmatprep.subr.bf16.mxu1 %v8025_v14  ;;  %v8104_v29 = vld [vmem:[%s11635_s1 + $0x9c0] ss:$16 sps:$4 sm:$0xff]   ;;  %v8107_v14 = vld [vmem:[%s11635_s1 + $0x9c8] ss:$16 sps:$4 sm:$0xff]  }
 0x10e   : > { %5299 = vmatmul.mubr.bf16.vlgmr.msra.gmra.mrb[0].mxu0 %v1059_v31  ;;  %5832 = vmatmul.mubr.bf16.vlgmr.msra.gmra.mrb[0].mxu1 %v1059_v31  ;;  %v8115_v31 = vld [vmem:[%s11635_s1 + $0x9ec] ss:$16 sps:$4 sm:$0xff]  }
 0x10f   : > { %5308 = vmatpush1.bf16.msra.mxu0 %v8020_v25  ;;  %5841 = vmatpush1.bf16.msra.mxu1 %v8023_v32  ;;  %v8110_v25 = vld [vmem:[%s11635_s1 + $0x9e0] ss:$16 sps:$4 sm:$0xff]   ;;  %v8113_v32 = vld [vmem:[%s11635_s1 + $0x9e8] ss:$16 sps:$4 sm:$0xff]  }
 0x110   : > { %5309 = vmatprep.subr.bf16.mxu0 %v8028_v33  ;;  %5842 = vmatprep.subr.bf16.mxu1 %v8031_v26  ;;  %v8118_v33 = vld [vmem:[%s11635_s1 + $0xa04] ss:$16 sps:$4 sm:$0xff]   ;;  %v8121_v26 = vld [vmem:[%s11635_s1 + $0xa0c] ss:$16 sps:$4 sm:$0xff]  }
 0x111   : > { %5339 = vmatprep.mubr.bf16.mxu0 %v9832_v34  ;;  %5872 = vmatprep.mubr.bf16.mxu1 %v9832_v34 }
 0x113   : > { %5310 = vmatpush1.bf16.msra.mxu0 %v8026_v35  ;;  %5843 = vmatpush1.bf16.msra.mxu1 %v8029_v36  ;;  %v10018_v35 = vrot.slane %v9789_v21, %v9135_v49  ;;  %v8116_v36 = vld [vmem:[%s11635_s1 + $0xa00] ss:$16 sps:$4 sm:$0xff]   ;;  %v8127_v21 = vld [vmem:[%s11635_s1 + $0xa2c] ss:$16 sps:$4 sm:$0xff]  }
 0x114   : > { %5311 = vmatprep.subr.bf16.mxu0 %v8034_v37  ;;  %5844 = vmatprep.subr.bf16.mxu1 %v8037_v38  ;;  %v8119_v37 = vld [vmem:[%s11635_s1 + $0xa08] ss:$16 sps:$4 sm:$0xff]   ;;  %v8124_v38 = vld [vmem:[%s11635_s1 + $0xa24] ss:$16 sps:$4 sm:$0xff]  }
 0x117   : > { %5312 = vmatpush1.bf16.msra.mxu0 %v8032_v39  ;;  %5845 = vmatpush1.bf16.msra.mxu1 %v8035_v40  ;;  %v1109_v39 = vcombine.high %v9832_v34, %v9832_v34  ;;  %v8122_v40 = vld [vmem:[%s11635_s1 + $0xa20] ss:$16 sps:$4 sm:$0xff]   ;;  %v8130_v34 = vld [vmem:[%s11635_s1 + $0xa44] ss:$16 sps:$4 sm:$0xff]  }
 0x118   : > { %5313 = vmatprep.subr.bf16.mxu0 %v8040_v41  ;;  %5846 = vmatprep.subr.bf16.mxu1 %v8043_v42  ;;  %v8125_v41 = vld [vmem:[%s11635_s1 + $0xa28] ss:$16 sps:$4 sm:$0xff]   ;;  %v8133_v42 = vld [vmem:[%s11635_s1 + $0xa4c] ss:$16 sps:$4 sm:$0xff]  }
 0x11b   : > { %5314 = vmatpush1.bf16.msra.mxu0 %v8038_v44  ;;  %5847 = vmatpush1.bf16.msra.mxu1 %v8041_v45  ;;  %v8128_v44 = vld [vmem:[%s11635_s1 + $0xa40] ss:$16 sps:$4 sm:$0xff]   ;;  %v8131_v45 = vld [vmem:[%s11635_s1 + $0xa48] ss:$16 sps:$4 sm:$0xff]  }
 0x11c   : > { %5315 = vmatprep.subr.bf16.mxu0 %v8046_v46  ;;  %5848 = vmatprep.subr.bf16.mxu1 %v8049_v47  ;;  %v8136_v46 = vld [vmem:[%s11635_s1 + $0xa64] ss:$16 sps:$4 sm:$0xff]   ;;  %v8139_v47 = vld [vmem:[%s11635_s1 + $0xa6c] ss:$16 sps:$4 sm:$0xff]  }
 0x11f   : > { %5316 = vmatpush1.bf16.msra.mxu0 %v8044_v48  ;;  %5849 = vmatpush1.bf16.msra.mxu1 %v8047_v50  ;;  %v8134_v48 = vld [vmem:[%s11635_s1 + $0xa60] ss:$16 sps:$4 sm:$0xff]   ;;  %v8137_v50 = vld [vmem:[%s11635_s1 + $0xa68] ss:$16 sps:$4 sm:$0xff]  }
 0x120   : > { %5317 = vmatprep.subr.bf16.mxu0 %v8052_v51  ;;  %5850 = vmatprep.subr.bf16.mxu1 %v8055_v53  ;;  %v8142_v51 = vld [vmem:[%s11635_s1 + $0xa84] ss:$16 sps:$4 sm:$0xff]   ;;  %v8145_v53 = vld [vmem:[%s11635_s1 + $0xa8c] ss:$16 sps:$4 sm:$0xff]  }
 0x123   : > { %5318 = vmatpush1.bf16.msra.mxu0 %v8050_v54  ;;  %5851 = vmatpush1.bf16.msra.mxu1 %v8053_v55  ;;  %v8140_v54 = vld [vmem:[%s11635_s1 + $0xa80] ss:$16 sps:$4 sm:$0xff]   ;;  %v8143_v55 = vld [vmem:[%s11635_s1 + $0xa88] ss:$16 sps:$4 sm:$0xff]  }
 0x124   : > { %5319 = vmatprep.subr.bf16.mxu0 %v8058_v56  ;;  %5852 = vmatprep.subr.bf16.mxu1 %v8061_v57  ;;  %v8148_v56 = vld [vmem:[%s11635_s1 + $0xaa4] ss:$16 sps:$4 sm:$0xff]   ;;  %v8151_v57 = vld [vmem:[%s11635_s1 + $0xaac] ss:$16 sps:$4 sm:$0xff]  }
 0x127   : > { %5320 = vmatpush1.bf16.msra.mxu0 %v8056_v58  ;;  %5853 = vmatpush1.bf16.msra.mxu1 %v8059_v59  ;;  %v8146_v58 = vld [vmem:[%s11635_s1 + $0xaa0] ss:$16 sps:$4 sm:$0xff]   ;;  %v8149_v59 = vld [vmem:[%s11635_s1 + $0xaa8] ss:$16 sps:$4 sm:$0xff]  }
 0x128   : > { %5321 = vmatprep.subr.bf16.mxu0 %v8064_v60  ;;  %5854 = vmatprep.subr.bf16.mxu1 %v8067_v61  ;;  %v8154_v60 = vld [vmem:[%s11635_s1 + $0xac4] ss:$16 sps:$4 sm:$0xff]   ;;  %v8157_v61 = vld [vmem:[%s11635_s1 + $0xacc] ss:$16 sps:$4 sm:$0xff]  }
 0x12b   : > { %5322 = vmatpush1.bf16.msra.mxu0 %v8062_v62  ;;  %5855 = vmatpush1.bf16.msra.mxu1 %v8065_v63  ;;  %v8152_v62 = vld [vmem:[%s11635_s1 + $0xac0] ss:$16 sps:$4 sm:$0xff]   ;;  %v8155_v63 = vld [vmem:[%s11635_s1 + $0xac8] ss:$16 sps:$4 sm:$0xff]  }
 0x12c   : > { %5323 = vmatprep.subr.bf16.mxu0 %v8070_v0  ;;  %5856 = vmatprep.subr.bf16.mxu1 %v8073_v1  ;;  %v8160_v0 = vld [vmem:[%s11635_s1 + $0xae4] ss:$16 sps:$4 sm:$0xff]   ;;  %v8163_v1 = vld [vmem:[%s11635_s1 + $0xaec] ss:$16 sps:$4 sm:$0xff]  }
 0x12f   : > { %5324 = vmatpush1.bf16.msra.mxu0 %v8068_v2  ;;  %5857 = vmatpush1.bf16.msra.mxu1 %v8071_v3  ;;  %v8158_v2 = vld [vmem:[%s11635_s1 + $0xae0] ss:$16 sps:$4 sm:$0xff]   ;;  %v8161_v3 = vld [vmem:[%s11635_s1 + $0xae8] ss:$16 sps:$4 sm:$0xff]  }
 0x130   : > { %5325 = vmatprep.subr.bf16.mxu0 %v8076_v4  ;;  %5858 = vmatprep.subr.bf16.mxu1 %v8079_v5  ;;  %v8166_v4 = vld [vmem:[%s11635_s1 + $0xb04] ss:$16 sps:$4 sm:$0xff]   ;;  %v8169_v5 = vld [vmem:[%s11635_s1 + $0xb0c] ss:$16 sps:$4 sm:$0xff]  }
 0x133   : > { %5326 = vmatpush1.bf16.msra.mxu0 %v8074_v6  ;;  %5859 = vmatpush1.bf16.msra.mxu1 %v8077_v7  ;;  %v8164_v6 = vld [vmem:[%s11635_s1 + $0xb00] ss:$16 sps:$4 sm:$0xff]   ;;  %v8167_v7 = vld [vmem:[%s11635_s1 + $0xb08] ss:$16 sps:$4 sm:$0xff]  }
 0x134   : > { %5327 = vmatprep.subr.bf16.mxu0 %v8082_v8  ;;  %5860 = vmatprep.subr.bf16.mxu1 %v8085_v9  ;;  %v8172_v8 = vld [vmem:[%s11635_s1 + $0xb24] ss:$16 sps:$4 sm:$0xff]   ;;  %v8175_v9 = vld [vmem:[%s11635_s1 + $0xb2c] ss:$16 sps:$4 sm:$0xff]  }
 0x137   : > { %5328 = vmatpush1.bf16.msra.mxu0 %v8080_v10  ;;  %5861 = vmatpush1.bf16.msra.mxu1 %v8083_v11  ;;  %v8170_v10 = vld [vmem:[%s11635_s1 + $0xb20] ss:$16 sps:$4 sm:$0xff]   ;;  %v8173_v11 = vld [vmem:[%s11635_s1 + $0xb28] ss:$16 sps:$4 sm:$0xff]  }
 0x138   : > { %5329 = vmatprep.subr.bf16.mxu0 %v8088_v12  ;;  %5862 = vmatprep.subr.bf16.mxu1 %v8091_v52  ;;  %v8178_v12 = vld [vmem:[%s11635_s1 + $0xb44] ss:$16 sps:$4 sm:$0xff]   ;;  %v8181_v52 = vld [vmem:[%s11635_s1 + $0xb4c] ss:$16 sps:$4 sm:$0xff]  }
 0x13b   : > { %5330 = vmatpush1.bf16.msra.mxu0 %v8086_v15  ;;  %5863 = vmatpush1.bf16.msra.mxu1 %v8089_v16  ;;  %v8176_v15 = vld [vmem:[%s11635_s1 + $0xb40] ss:$16 sps:$4 sm:$0xff]   ;;  %v8179_v16 = vld [vmem:[%s11635_s1 + $0xb48] ss:$16 sps:$4 sm:$0xff]  }
 0x13c   : > { %5331 = vmatprep.subr.bf16.mxu0 %v8094_v17  ;;  %5864 = vmatprep.subr.bf16.mxu1 %v8097_v18  ;;  %v8184_v17 = vld [vmem:[%s11635_s1 + $0xb64] ss:$16 sps:$4 sm:$0xff]   ;;  %v8187_v18 = vld [vmem:[%s11635_s1 + $0xb6c] ss:$16 sps:$4 sm:$0xff]  }
 0x13f   : > { %5332 = vmatpush1.bf16.msra.mxu0 %v8092_v19  ;;  %5865 = vmatpush1.bf16.msra.mxu1 %v8095_v20  ;;  %v8182_v19 = vld [vmem:[%s11635_s1 + $0xb60] ss:$16 sps:$4 sm:$0xff]   ;;  %v8185_v20 = vld [vmem:[%s11635_s1 + $0xb68] ss:$16 sps:$4 sm:$0xff]  }
 0x140   : > { %5333 = vmatprep.subr.bf16.mxu0 %v8100_v22  ;;  %5866 = vmatprep.subr.bf16.mxu1 %v8103_v23  ;;  %v8190_v22 = vld [vmem:[%s11635_s1 + $0xb84] ss:$16 sps:$4 sm:$0xff]   ;;  %v8193_v23 = vld [vmem:[%s11635_s1 + $0xb8c] ss:$16 sps:$4 sm:$0xff]  }
 0x143   : > { %5334 = vmatpush1.bf16.msra.mxu0 %v8098_v24  ;;  %5867 = vmatpush1.bf16.msra.mxu1 %v8101_v13  ;;  %v8188_v24 = vld [vmem:[%s11635_s1 + $0xb80] ss:$16 sps:$4 sm:$0xff]   ;;  %v8191_v13 = vld [vmem:[%s11635_s1 + $0xb88] ss:$16 sps:$4 sm:$0xff]  }
 0x144   : > { %5335 = vmatprep.subr.bf16.mxu0 %v8106_v27  ;;  %5868 = vmatprep.subr.bf16.mxu1 %v8109_v28  ;;  %v8196_v27 = vld [vmem:[%s11635_s1 + $0xba4] ss:$16 sps:$4 sm:$0xff]   ;;  %v8199_v28 = vld [vmem:[%s11635_s1 + $0xbac] ss:$16 sps:$4 sm:$0xff]  }
 0x147   : > { %5336 = vmatpush1.bf16.msra.mxu0 %v8104_v29  ;;  %5869 = vmatpush1.bf16.msra.mxu1 %v8107_v14  ;;  %v8194_v29 = vld [vmem:[%s11635_s1 + $0xba0] ss:$16 sps:$4 sm:$0xff]   ;;  %v8197_v14 = vld [vmem:[%s11635_s1 + $0xba8] ss:$16 sps:$4 sm:$0xff]  }
 0x148   : > { %5337 = vmatprep.subr.bf16.mxu0 %v8112_v30  ;;  %5870 = vmatprep.subr.bf16.mxu1 %v8115_v31  ;;  %v8202_v30 = vld [vmem:[%s11635_s1 + $0xbc4] ss:$16 sps:$4 sm:$0xff]   ;;  %v8205_v31 = vld [vmem:[%s11635_s1 + $0xbcc] ss:$16 sps:$4 sm:$0xff]  }
 0x14b   : > { %5338 = vmatpush1.bf16.msra.mxu0 %v8110_v25  ;;  %5871 = vmatpush1.bf16.msra.mxu1 %v8113_v32  ;;  %v8846_v25 = vld [vmem:[%s9132_s17 + $0x8] sm:$0xff] }
 0x14c   : > { %5348 = vmatprep.subr.bf16.mxu0 %v8118_v33  ;;  %5881 = vmatprep.subr.bf16.mxu1 %v8121_v26  ;;  %v1062_v32 = vcombine.high %v8846_v25, %v8846_v25  ;;  %v8200_v33 = vld [vmem:[%s11635_s1 + $0xbc0] ss:$16 sps:$4 sm:$0xff]   ;;  %v8203_v26 = vld [vmem:[%s11635_s1 + $0xbc8] ss:$16 sps:$4 sm:$0xff]  }
 0x14d   : > { %v8284_v25 = vld [vmem:[%s11635_s1 + $0xd80] ss:$16 sps:$4 sm:$0xff]  }
 0x14e   : > { %5340 = vmatmul.mubr.bf16.vlgmr.msra.gmra.mrb[0].mxu0 %v10018_v35  ;;  %5873 = vmatmul.mubr.bf16.vlgmr.msra.gmra.mrb[0].mxu1 %v10018_v35 }
 0x14f   : > { %5349 = vmatpush1.bf16.msra.mxu0 %v8116_v36  ;;  %5882 = vmatpush1.bf16.msra.mxu1 %v8119_v37  ;;  %v8208_v36 = vld [vmem:[%s11635_s1 + $0xbe4] ss:$16 sps:$4 sm:$0xff]   ;;  %v8211_v37 = vld [vmem:[%s11635_s1 + $0xbec] ss:$16 sps:$4 sm:$0xff]  }
 0x150   : > { %5350 = vmatprep.subr.bf16.mxu0 %v8124_v38  ;;  %5883 = vmatprep.subr.bf16.mxu1 %v8127_v21  ;;  %v10206_v38 = vrot.slane %v1062_v32, %v9135_v49  ;;  %v8206_v21 = vld [vmem:[%s11635_s1 + $0xbe0] ss:$16 sps:$4 sm:$0xff]   ;;  %v8287_v32 = vld [vmem:[%s11635_s1 + $0xd88] ss:$16 sps:$4 sm:$0xff]  }
 0x151   : > { %5380 = vmatprep.mubr.bf16.mxu0 %v1109_v39  ;;  %5913 = vmatprep.mubr.bf16.mxu1 %v1109_v39  ;;  %v8209_v39 = vld [vmem:[%s11635_s1 + $0xbe8] ss:$16 sps:$4 sm:$0xff]  }
 0x153   : > { %5351 = vmatpush1.bf16.msra.mxu0 %v8122_v40  ;;  %5884 = vmatpush1.bf16.msra.mxu1 %v8125_v41  ;;  %v8214_v40 = vld [vmem:[%s11635_s1 + $0xc04] ss:$16 sps:$4 sm:$0xff]   ;;  %v8217_v41 = vld [vmem:[%s11635_s1 + $0xc0c] ss:$16 sps:$4 sm:$0xff]  }
 0x154   : > { %5352 = vmatprep.subr.bf16.mxu0 %v8130_v34  ;;  %5885 = vmatprep.subr.bf16.mxu1 %v8133_v42  ;;  %v1078_v34 = vcombine.high %v10206_v38, %v10206_v38  ;;  %v1107_v42 = vcombine.high %v10018_v35, %v10018_v35  ;;  %v8223_v35 = vld [vmem:[%s11635_s1 + $0xc2c] ss:$16 sps:$4 sm:$0xff]  }
 0x157   : > { %5353 = vmatpush1.bf16.msra.mxu0 %v8128_v44  ;;  %5886 = vmatpush1.bf16.msra.mxu1 %v8131_v45  ;;  %v8212_v44 = vld [vmem:[%s11635_s1 + $0xc00] ss:$16 sps:$4 sm:$0xff]   ;;  %v8215_v45 = vld [vmem:[%s11635_s1 + $0xc08] ss:$16 sps:$4 sm:$0xff]  }
 0x158   : > { %5354 = vmatprep.subr.bf16.mxu0 %v8136_v46  ;;  %5887 = vmatprep.subr.bf16.mxu1 %v8139_v47  ;;  %v8220_v46 = vld [vmem:[%s11635_s1 + $0xc24] ss:$16 sps:$4 sm:$0xff]   ;;  %v10237_v47 = vrot.slane %v1078_v34, %v9135_v49 }
 0x159   : > { %v8304_v34 = vld [vmem:[%s11635_s1 + $0xde4] ss:$16 sps:$4 sm:$0xff]  }
 0x15b   : > { %5355 = vmatpush1.bf16.msra.mxu0 %v8134_v48  ;;  %5888 = vmatpush1.bf16.msra.mxu1 %v8137_v50  ;;  %v8218_v48 = vld [vmem:[%s11635_s1 + $0xc20] ss:$16 sps:$4 sm:$0xff]   ;;  %v8221_v50 = vld [vmem:[%s11635_s1 + $0xc28] ss:$16 sps:$4 sm:$0xff]  }
 0x15c   : > { %5356 = vmatprep.subr.bf16.mxu0 %v8142_v51  ;;  %5889 = vmatprep.subr.bf16.mxu1 %v8145_v53  ;;  %v8226_v51 = vld [vmem:[%s11635_s1 + $0xc44] ss:$16 sps:$4 sm:$0xff]   ;;  %v8229_v53 = vld [vmem:[%s11635_s1 + $0xc4c] ss:$16 sps:$4 sm:$0xff]  }
 0x15f   : > { %5357 = vmatpush1.bf16.msra.mxu0 %v8140_v54  ;;  %5890 = vmatpush1.bf16.msra.mxu1 %v8143_v55  ;;  %v8224_v54 = vld [vmem:[%s11635_s1 + $0xc40] ss:$16 sps:$4 sm:$0xff]   ;;  %v8227_v55 = vld [vmem:[%s11635_s1 + $0xc48] ss:$16 sps:$4 sm:$0xff]  }
 0x160   : > { %5358 = vmatprep.subr.bf16.mxu0 %v8148_v56  ;;  %5891 = vmatprep.subr.bf16.mxu1 %v8151_v57  ;;  %v8232_v56 = vld [vmem:[%s11635_s1 + $0xc64] ss:$16 sps:$4 sm:$0xff]   ;;  %v8235_v57 = vld [vmem:[%s11635_s1 + $0xc6c] ss:$16 sps:$4 sm:$0xff]  }
 0x163   : > { %5359 = vmatpush1.bf16.msra.mxu0 %v8146_v58  ;;  %5892 = vmatpush1.bf16.msra.mxu1 %v8149_v59  ;;  %v8230_v58 = vld [vmem:[%s11635_s1 + $0xc60] ss:$16 sps:$4 sm:$0xff]   ;;  %v8233_v59 = vld [vmem:[%s11635_s1 + $0xc68] ss:$16 sps:$4 sm:$0xff]  }
 0x164   : > { %5360 = vmatprep.subr.bf16.mxu0 %v8154_v60  ;;  %5893 = vmatprep.subr.bf16.mxu1 %v8157_v61  ;;  %v8238_v60 = vld [vmem:[%s11635_s1 + $0xc84] ss:$16 sps:$4 sm:$0xff]   ;;  %v8241_v61 = vld [vmem:[%s11635_s1 + $0xc8c] ss:$16 sps:$4 sm:$0xff]  }
 0x167   : > { %5361 = vmatpush1.bf16.msra.mxu0 %v8152_v62  ;;  %5894 = vmatpush1.bf16.msra.mxu1 %v8155_v63  ;;  %v8236_v62 = vld [vmem:[%s11635_s1 + $0xc80] ss:$16 sps:$4 sm:$0xff]   ;;  %v8239_v63 = vld [vmem:[%s11635_s1 + $0xc88] ss:$16 sps:$4 sm:$0xff]  }
 0x168   : > { %5362 = vmatprep.subr.bf16.mxu0 %v8160_v0  ;;  %5895 = vmatprep.subr.bf16.mxu1 %v8163_v1  ;;  %v8244_v0 = vld [vmem:[%s11635_s1 + $0xca4] ss:$16 sps:$4 sm:$0xff]   ;;  %v8247_v1 = vld [vmem:[%s11635_s1 + $0xcac] ss:$16 sps:$4 sm:$0xff]  }
 0x16b   : > { %5363 = vmatpush1.bf16.msra.mxu0 %v8158_v2  ;;  %5896 = vmatpush1.bf16.msra.mxu1 %v8161_v3  ;;  %v8242_v2 = vld [vmem:[%s11635_s1 + $0xca0] ss:$16 sps:$4 sm:$0xff]   ;;  %v8245_v3 = vld [vmem:[%s11635_s1 + $0xca8] ss:$16 sps:$4 sm:$0xff]  }
 0x16c   : > { %5364 = vmatprep.subr.bf16.mxu0 %v8166_v4  ;;  %5897 = vmatprep.subr.bf16.mxu1 %v8169_v5  ;;  %v8250_v4 = vld [vmem:[%s11635_s1 + $0xcc4] ss:$16 sps:$4 sm:$0xff]   ;;  %v8253_v5 = vld [vmem:[%s11635_s1 + $0xccc] ss:$16 sps:$4 sm:$0xff]  }
 0x16f   : > { %5365 = vmatpush1.bf16.msra.mxu0 %v8164_v6  ;;  %5898 = vmatpush1.bf16.msra.mxu1 %v8167_v7  ;;  %v8248_v6 = vld [vmem:[%s11635_s1 + $0xcc0] ss:$16 sps:$4 sm:$0xff]   ;;  %v8251_v7 = vld [vmem:[%s11635_s1 + $0xcc8] ss:$16 sps:$4 sm:$0xff]  }
 0x170   : > { %5366 = vmatprep.subr.bf16.mxu0 %v8172_v8  ;;  %5899 = vmatprep.subr.bf16.mxu1 %v8175_v9  ;;  %v8256_v8 = vld [vmem:[%s11635_s1 + $0xce4] ss:$16 sps:$4 sm:$0xff]   ;;  %v8259_v9 = vld [vmem:[%s11635_s1 + $0xcec] ss:$16 sps:$4 sm:$0xff]  }
 0x173   : > { %5367 = vmatpush1.bf16.msra.mxu0 %v8170_v10  ;;  %5900 = vmatpush1.bf16.msra.mxu1 %v8173_v11  ;;  %v8254_v10 = vld [vmem:[%s11635_s1 + $0xce0] ss:$16 sps:$4 sm:$0xff]   ;;  %v8257_v11 = vld [vmem:[%s11635_s1 + $0xce8] ss:$16 sps:$4 sm:$0xff]  }
 0x174   : > { %5368 = vmatprep.subr.bf16.mxu0 %v8178_v12  ;;  %5901 = vmatprep.subr.bf16.mxu1 %v8181_v52  ;;  %v8262_v12 = vld [vmem:[%s11635_s1 + $0xd04] ss:$16 sps:$4 sm:$0xff]   ;;  %v8265_v52 = vld [vmem:[%s11635_s1 + $0xd0c] ss:$16 sps:$4 sm:$0xff]  }
 0x177   : > { %5369 = vmatpush1.bf16.msra.mxu0 %v8176_v15  ;;  %5902 = vmatpush1.bf16.msra.mxu1 %v8179_v16  ;;  %v8260_v15 = vld [vmem:[%s11635_s1 + $0xd00] ss:$16 sps:$4 sm:$0xff]   ;;  %v8263_v16 = vld [vmem:[%s11635_s1 + $0xd08] ss:$16 sps:$4 sm:$0xff]  }
 0x178   : > { %5370 = vmatprep.subr.bf16.mxu0 %v8184_v17  ;;  %5903 = vmatprep.subr.bf16.mxu1 %v8187_v18  ;;  %v8268_v17 = vld [vmem:[%s11635_s1 + $0xd24] ss:$16 sps:$4 sm:$0xff]   ;;  %v8271_v18 = vld [vmem:[%s11635_s1 + $0xd2c] ss:$16 sps:$4 sm:$0xff]  }
 0x17b   : > { %5371 = vmatpush1.bf16.msra.mxu0 %v8182_v19  ;;  %5904 = vmatpush1.bf16.msra.mxu1 %v8185_v20  ;;  %v8266_v19 = vld [vmem:[%s11635_s1 + $0xd20] ss:$16 sps:$4 sm:$0xff]   ;;  %v8269_v20 = vld [vmem:[%s11635_s1 + $0xd28] ss:$16 sps:$4 sm:$0xff]  }
 0x17c   : > { %5372 = vmatprep.subr.bf16.mxu0 %v8190_v22  ;;  %5905 = vmatprep.subr.bf16.mxu1 %v8193_v23  ;;  %v8274_v22 = vld [vmem:[%s11635_s1 + $0xd44] ss:$16 sps:$4 sm:$0xff]   ;;  %v8277_v23 = vld [vmem:[%s11635_s1 + $0xd4c] ss:$16 sps:$4 sm:$0xff]  }
 0x17f   : > { %5373 = vmatpush1.bf16.msra.mxu0 %v8188_v24  ;;  %5906 = vmatpush1.bf16.msra.mxu1 %v8191_v13  ;;  %v8272_v24 = vld [vmem:[%s11635_s1 + $0xd40] ss:$16 sps:$4 sm:$0xff]   ;;  %v8275_v13 = vld [vmem:[%s11635_s1 + $0xd48] ss:$16 sps:$4 sm:$0xff]  }
 0x180   : > { %5374 = vmatprep.subr.bf16.mxu0 %v8196_v27  ;;  %5907 = vmatprep.subr.bf16.mxu1 %v8199_v28  ;;  %v8280_v27 = vld [vmem:[%s11635_s1 + $0xd64] ss:$16 sps:$4 sm:$0xff]   ;;  %v8283_v28 = vld [vmem:[%s11635_s1 + $0xd6c] ss:$16 sps:$4 sm:$0xff]  }
 0x183   : > { %5375 = vmatpush1.bf16.msra.mxu0 %v8194_v29  ;;  %5908 = vmatpush1.bf16.msra.mxu1 %v8197_v14  ;;  %v8278_v29 = vld [vmem:[%s11635_s1 + $0xd60] ss:$16 sps:$4 sm:$0xff]   ;;  %v8281_v14 = vld [vmem:[%s11635_s1 + $0xd68] ss:$16 sps:$4 sm:$0xff]  }
 0x184   : > { %5376 = vmatprep.subr.bf16.mxu0 %v8202_v30  ;;  %5909 = vmatprep.subr.bf16.mxu1 %v8205_v31  ;;  %v8286_v30 = vld [vmem:[%s11635_s1 + $0xd84] ss:$16 sps:$4 sm:$0xff]   ;;  %v8289_v31 = vld [vmem:[%s11635_s1 + $0xd8c] ss:$16 sps:$4 sm:$0xff]  }
 0x187   : > { %5377 = vmatpush1.bf16.msra.mxu0 %v8200_v33  ;;  %5910 = vmatpush1.bf16.msra.mxu1 %v8203_v26  ;;  %v8292_v33 = vld [vmem:[%s11635_s1 + $0xda4] ss:$16 sps:$4 sm:$0xff]   ;;  %v8295_v26 = vld [vmem:[%s11635_s1 + $0xdac] ss:$16 sps:$4 sm:$0xff]  }
 0x188   : > { %5378 = vmatprep.subr.bf16.mxu0 %v8208_v36  ;;  %5911 = vmatprep.subr.bf16.mxu1 %v8211_v37  ;;  %v8290_v36 = vld [vmem:[%s11635_s1 + $0xda0] ss:$16 sps:$4 sm:$0xff]   ;;  %v8293_v37 = vld [vmem:[%s11635_s1 + $0xda8] ss:$16 sps:$4 sm:$0xff]  }
 0x18b   : > { %5379 = vmatpush1.bf16.msra.mxu0 %v8206_v21  ;;  %5912 = vmatpush1.bf16.msra.mxu1 %v8209_v39  ;;  %v8298_v21 = vld [vmem:[%s11635_s1 + $0xdc4] ss:$16 sps:$4 sm:$0xff]   ;;  %v8301_v39 = vld [vmem:[%s11635_s1 + $0xdcc] ss:$16 sps:$4 sm:$0xff]  }
 0x18c   : > { %5389 = vmatprep.subr.bf16.mxu0 %v8214_v40  ;;  %5922 = vmatprep.subr.bf16.mxu1 %v8217_v41  ;;  %v8296_v40 = vld [vmem:[%s11635_s1 + $0xdc0] ss:$16 sps:$4 sm:$0xff]   ;;  %v8299_v41 = vld [vmem:[%s11635_s1 + $0xdc8] ss:$16 sps:$4 sm:$0xff]  }
 0x18e   : > { %5381 = vmatmul.mubr.bf16.vlgmr.msra.gmra.mrb[0].mxu0 %v1107_v42  ;;  %5914 = vmatmul.mubr.bf16.vlgmr.msra.gmra.mrb[0].mxu1 %v1107_v42  ;;  %v8307_v42 = vld [vmem:[%s11635_s1 + $0xdec] ss:$16 sps:$4 sm:$0xff]  }
 0x18f   : > { %5390 = vmatpush1.bf16.msra.mxu0 %v8212_v44  ;;  %5923 = vmatpush1.bf16.msra.mxu1 %v8215_v45  ;;  %v8302_v44 = vld [vmem:[%s11635_s1 + $0xde0] ss:$16 sps:$4 sm:$0xff]   ;;  %v8305_v45 = vld [vmem:[%s11635_s1 + $0xde8] ss:$16 sps:$4 sm:$0xff]  }
 0x190   : > { %5391 = vmatprep.subr.bf16.mxu0 %v8220_v46  ;;  %5924 = vmatprep.subr.bf16.mxu1 %v8223_v35  ;;  %v8311_v46 = vld [vmem:[%s11635_s1 + $0xe04] ss:$16 sps:$4 sm:$0xff]   ;;  %v8314_v35 = vld [vmem:[%s11635_s1 + $0xe0c] ss:$16 sps:$4 sm:$0xff]  }
 0x191   : > { %5421 = vmatprep.mubr.bf16.mxu0 %v10237_v47  ;;  %5954 = vmatprep.mubr.bf16.mxu1 %v10237_v47 }
 0x193   : > { %5392 = vmatpush1.bf16.msra.mxu0 %v8218_v48  ;;  %5925 = vmatpush1.bf16.msra.mxu1 %v8221_v50  ;;  %v10423_v48 = vrot.slane %v10206_v38, %v9135_v49  ;;  %v8309_v50 = vld [vmem:[%s11635_s1 + $0xe00] ss:$16 sps:$4 sm:$0xff]   ;;  %v8320_v38 = vld [vmem:[%s11635_s1 + $0xe2c] ss:$16 sps:$4 sm:$0xff]  }
 0x194   : > { %5393 = vmatprep.subr.bf16.mxu0 %v8226_v51  ;;  %5926 = vmatprep.subr.bf16.mxu1 %v8229_v53  ;;  %v8312_v51 = vld [vmem:[%s11635_s1 + $0xe08] ss:$16 sps:$4 sm:$0xff]   ;;  %v8317_v53 = vld [vmem:[%s11635_s1 + $0xe24] ss:$16 sps:$4 sm:$0xff]  }
 0x197   : > { %5394 = vmatpush1.bf16.msra.mxu0 %v8224_v54  ;;  %5927 = vmatpush1.bf16.msra.mxu1 %v8227_v55  ;;  %v1110_v54 = vcombine.high %v10237_v47, %v10237_v47  ;;  %v8315_v55 = vld [vmem:[%s11635_s1 + $0xe20] ss:$16 sps:$4 sm:$0xff]   ;;  %v8323_v47 = vld [vmem:[%s11635_s1 + $0xe44] ss:$16 sps:$4 sm:$0xff]  }
 0x198   : > { %5395 = vmatprep.subr.bf16.mxu0 %v8232_v56  ;;  %5928 = vmatprep.subr.bf16.mxu1 %v8235_v57  ;;  %v8318_v56 = vld [vmem:[%s11635_s1 + $0xe28] ss:$16 sps:$4 sm:$0xff]   ;;  %v8326_v57 = vld [vmem:[%s11635_s1 + $0xe4c] ss:$16 sps:$4 sm:$0xff]  }
 0x19b   : > { %5396 = vmatpush1.bf16.msra.mxu0 %v8230_v58  ;;  %5929 = vmatpush1.bf16.msra.mxu1 %v8233_v59  ;;  %v8321_v58 = vld [vmem:[%s11635_s1 + $0xe40] ss:$16 sps:$4 sm:$0xff]   ;;  %v8324_v59 = vld [vmem:[%s11635_s1 + $0xe48] ss:$16 sps:$4 sm:$0xff]  }
 0x19c   : > { %5397 = vmatprep.subr.bf16.mxu0 %v8238_v60  ;;  %5930 = vmatprep.subr.bf16.mxu1 %v8241_v61  ;;  %v8329_v60 = vld [vmem:[%s11635_s1 + $0xe64] ss:$16 sps:$4 sm:$0xff]   ;;  %v8332_v61 = vld [vmem:[%s11635_s1 + $0xe6c] ss:$16 sps:$4 sm:$0xff]  }
 0x19f   : > { %5398 = vmatpush1.bf16.msra.mxu0 %v8236_v62  ;;  %5931 = vmatpush1.bf16.msra.mxu1 %v8239_v63  ;;  %v8327_v62 = vld [vmem:[%s11635_s1 + $0xe60] ss:$16 sps:$4 sm:$0xff]   ;;  %v8330_v63 = vld [vmem:[%s11635_s1 + $0xe68] ss:$16 sps:$4 sm:$0xff]  }
 0x1a0   : > { %5399 = vmatprep.subr.bf16.mxu0 %v8244_v0  ;;  %5932 = vmatprep.subr.bf16.mxu1 %v8247_v1  ;;  %v8335_v0 = vld [vmem:[%s11635_s1 + $0xe84] ss:$16 sps:$4 sm:$0xff]   ;;  %v8338_v1 = vld [vmem:[%s11635_s1 + $0xe8c] ss:$16 sps:$4 sm:$0xff]  }
 0x1a3   : > { %5400 = vmatpush1.bf16.msra.mxu0 %v8242_v2  ;;  %5933 = vmatpush1.bf16.msra.mxu1 %v8245_v3  ;;  %v8333_v2 = vld [vmem:[%s11635_s1 + $0xe80] ss:$16 sps:$4 sm:$0xff]   ;;  %v8336_v3 = vld [vmem:[%s11635_s1 + $0xe88] ss:$16 sps:$4 sm:$0xff]  }
 0x1a4   : > { %5401 = vmatprep.subr.bf16.mxu0 %v8250_v4  ;;  %5934 = vmatprep.subr.bf16.mxu1 %v8253_v5  ;;  %v8341_v4 = vld [vmem:[%s11635_s1 + $0xea4] ss:$16 sps:$4 sm:$0xff]   ;;  %v8344_v5 = vld [vmem:[%s11635_s1 + $0xeac] ss:$16 sps:$4 sm:$0xff]  }
 0x1a7   : > { %5402 = vmatpush1.bf16.msra.mxu0 %v8248_v6  ;;  %5935 = vmatpush1.bf16.msra.mxu1 %v8251_v7  ;;  %v8339_v6 = vld [vmem:[%s11635_s1 + $0xea0] ss:$16 sps:$4 sm:$0xff]   ;;  %v8342_v7 = vld [vmem:[%s11635_s1 + $0xea8] ss:$16 sps:$4 sm:$0xff]  }
 0x1a8   : > { %5403 = vmatprep.subr.bf16.mxu0 %v8256_v8  ;;  %5936 = vmatprep.subr.bf16.mxu1 %v8259_v9  ;;  %v8347_v8 = vld [vmem:[%s11635_s1 + $0xec4] ss:$16 sps:$4 sm:$0xff]   ;;  %v8350_v9 = vld [vmem:[%s11635_s1 + $0xecc] ss:$16 sps:$4 sm:$0xff]  }
 0x1ab   : > { %5404 = vmatpush1.bf16.msra.mxu0 %v8254_v10  ;;  %5937 = vmatpush1.bf16.msra.mxu1 %v8257_v11  ;;  %v8345_v10 = vld [vmem:[%s11635_s1 + $0xec0] ss:$16 sps:$4 sm:$0xff]   ;;  %v8348_v11 = vld [vmem:[%s11635_s1 + $0xec8] ss:$16 sps:$4 sm:$0xff]  }
 0x1ac   : > { %5405 = vmatprep.subr.bf16.mxu0 %v8262_v12  ;;  %5938 = vmatprep.subr.bf16.mxu1 %v8265_v52  ;;  %v8353_v12 = vld [vmem:[%s11635_s1 + $0xee4] ss:$16 sps:$4 sm:$0xff]   ;;  %v8356_v52 = vld [vmem:[%s11635_s1 + $0xeec] ss:$16 sps:$4 sm:$0xff]  }
 0x1af   : > { %5406 = vmatpush1.bf16.msra.mxu0 %v8260_v15  ;;  %5939 = vmatpush1.bf16.msra.mxu1 %v8263_v16  ;;  %v8351_v15 = vld [vmem:[%s11635_s1 + $0xee0] ss:$16 sps:$4 sm:$0xff]   ;;  %v8354_v16 = vld [vmem:[%s11635_s1 + $0xee8] ss:$16 sps:$4 sm:$0xff]  }
 0x1b0   : > { %5407 = vmatprep.subr.bf16.mxu0 %v8268_v17  ;;  %5940 = vmatprep.subr.bf16.mxu1 %v8271_v18  ;;  %v8359_v17 = vld [vmem:[%s11635_s1 + $0xf04] ss:$16 sps:$4 sm:$0xff]   ;;  %v8362_v18 = vld [vmem:[%s11635_s1 + $0xf0c] ss:$16 sps:$4 sm:$0xff]  }
 0x1b3   : > { %5408 = vmatpush1.bf16.msra.mxu0 %v8266_v19  ;;  %5941 = vmatpush1.bf16.msra.mxu1 %v8269_v20  ;;  %v8357_v19 = vld [vmem:[%s11635_s1 + $0xf00] ss:$16 sps:$4 sm:$0xff]   ;;  %v8360_v20 = vld [vmem:[%s11635_s1 + $0xf08] ss:$16 sps:$4 sm:$0xff]  }
 0x1b4   : > { %5409 = vmatprep.subr.bf16.mxu0 %v8274_v22  ;;  %5942 = vmatprep.subr.bf16.mxu1 %v8277_v23  ;;  %v8365_v22 = vld [vmem:[%s11635_s1 + $0xf24] ss:$16 sps:$4 sm:$0xff]   ;;  %v8368_v23 = vld [vmem:[%s11635_s1 + $0xf2c] ss:$16 sps:$4 sm:$0xff]  }
 0x1b7   : > { %5410 = vmatpush1.bf16.msra.mxu0 %v8272_v24  ;;  %5943 = vmatpush1.bf16.msra.mxu1 %v8275_v13  ;;  %v8363_v24 = vld [vmem:[%s11635_s1 + $0xf20] ss:$16 sps:$4 sm:$0xff]   ;;  %v8366_v13 = vld [vmem:[%s11635_s1 + $0xf28] ss:$16 sps:$4 sm:$0xff]  }
 0x1b8   : > { %5411 = vmatprep.subr.bf16.mxu0 %v8280_v27  ;;  %5944 = vmatprep.subr.bf16.mxu1 %v8283_v28  ;;  %v8371_v27 = vld [vmem:[%s11635_s1 + $0xf44] ss:$16 sps:$4 sm:$0xff]   ;;  %v8374_v28 = vld [vmem:[%s11635_s1 + $0xf4c] ss:$16 sps:$4 sm:$0xff]  }
 0x1bb   : > { %5412 = vmatpush1.bf16.msra.mxu0 %v8278_v29  ;;  %5945 = vmatpush1.bf16.msra.mxu1 %v8281_v14  ;;  %v8369_v29 = vld [vmem:[%s11635_s1 + $0xf40] ss:$16 sps:$4 sm:$0xff]   ;;  %v8372_v14 = vld [vmem:[%s11635_s1 + $0xf48] ss:$16 sps:$4 sm:$0xff]  }
 0x1bc   : > { %5413 = vmatprep.subr.bf16.mxu0 %v8286_v30  ;;  %5946 = vmatprep.subr.bf16.mxu1 %v8289_v31  ;;  %v8377_v30 = vld [vmem:[%s11635_s1 + $0xf64] ss:$16 sps:$4 sm:$0xff]   ;;  %v8380_v31 = vld [vmem:[%s11635_s1 + $0xf6c] ss:$16 sps:$4 sm:$0xff]  }
 0x1bf   : > { %5414 = vmatpush1.bf16.msra.mxu0 %v8284_v25  ;;  %5947 = vmatpush1.bf16.msra.mxu1 %v8287_v32  ;;  %v8375_v25 = vld [vmem:[%s11635_s1 + $0xf60] ss:$16 sps:$4 sm:$0xff]   ;;  %v8378_v32 = vld [vmem:[%s11635_s1 + $0xf68] ss:$16 sps:$4 sm:$0xff]  }
 0x1c0   : > { %5415 = vmatprep.subr.bf16.mxu0 %v8292_v33  ;;  %5948 = vmatprep.subr.bf16.mxu1 %v8295_v26  ;;  %v8383_v33 = vld [vmem:[%s11635_s1 + $0xf84] ss:$16 sps:$4 sm:$0xff]   ;;  %v8386_v26 = vld [vmem:[%s11635_s1 + $0xf8c] ss:$16 sps:$4 sm:$0xff]  }
 0x1c3   : > { %5416 = vmatpush1.bf16.msra.mxu0 %v8290_v36  ;;  %5949 = vmatpush1.bf16.msra.mxu1 %v8293_v37  ;;  %v8381_v36 = vld [vmem:[%s11635_s1 + $0xf80] ss:$16 sps:$4 sm:$0xff]   ;;  %v8384_v37 = vld [vmem:[%s11635_s1 + $0xf88] ss:$16 sps:$4 sm:$0xff]  }
 0x1c4   : > { %5417 = vmatprep.subr.bf16.mxu0 %v8298_v21  ;;  %5950 = vmatprep.subr.bf16.mxu1 %v8301_v39  ;;  %v8389_v21 = vld [vmem:[%s11635_s1 + $0xfa4] ss:$16 sps:$4 sm:$0xff]   ;;  %v8392_v39 = vld [vmem:[%s11635_s1 + $0xfac] ss:$16 sps:$4 sm:$0xff]  }
 0x1c7   : > { %5418 = vmatpush1.bf16.msra.mxu0 %v8296_v40  ;;  %5951 = vmatpush1.bf16.msra.mxu1 %v8299_v41  ;;  %v8387_v40 = vld [vmem:[%s11635_s1 + $0xfa0] ss:$16 sps:$4 sm:$0xff]   ;;  %v8390_v41 = vld [vmem:[%s11635_s1 + $0xfa8] ss:$16 sps:$4 sm:$0xff]  }
 0x1c8   : > { %5419 = vmatprep.subr.bf16.mxu0 %v8304_v34  ;;  %5952 = vmatprep.subr.bf16.mxu1 %v8307_v42  ;;  %v8395_v34 = vld [vmem:[%s11635_s1 + $0xfc4] ss:$16 sps:$4 sm:$0xff]   ;;  %v8398_v42 = vld [vmem:[%s11635_s1 + $0xfcc] ss:$16 sps:$4 sm:$0xff]  }
 0x1cb   : > { %5420 = vmatpush1.bf16.msra.mxu0 %v8302_v44  ;;  %5953 = vmatpush1.bf16.msra.mxu1 %v8305_v45  ;;  %v10598_v44 = vld [vmem:[%s9132_s17 + $0x10] sm:$0xff] }
 0x1cc   : > { %5430 = vmatprep.subr.bf16.mxu0 %v8311_v46  ;;  %5963 = vmatprep.subr.bf16.mxu1 %v8314_v35  ;;  %v8393_v45 = vld [vmem:[%s11635_s1 + $0xfc0] ss:$16 sps:$4 sm:$0xff]   ;;  %v8396_v46 = vld [vmem:[%s11635_s1 + $0xfc8] ss:$16 sps:$4 sm:$0xff]   ;;  %v8401_v35 = vld [vmem:[%s11635_s1 + $0xfe4] ss:$16 sps:$4 sm:$0xff]  }
 0x1ce   : > { %5422 = vmatmul.mubr.bf16.vlgmr.msra.gmra.mrb[0].mxu0 %v10423_v48  ;;  %5955 = vmatmul.mubr.bf16.vlgmr.msra.gmra.mrb[0].mxu1 %v10423_v48 }
 0x1cf   : > { %5431 = vmatpush1.bf16.msra.mxu0 %v8309_v50  ;;  %5964 = vmatpush1.bf16.msra.mxu1 %v8312_v51  ;;  %v8404_v50 = vld [vmem:[%s11635_s1 + $0xfec] ss:$16 sps:$4 sm:$0xff]   ;;  %v10614_v51 = vrot.slane %v10598_v44, %v9135_v49 }
 0x1d0   : > { %5432 = vmatprep.subr.bf16.mxu0 %v8317_v53  ;;  %5965 = vmatprep.subr.bf16.mxu1 %v8320_v38  ;;  %v8399_v53 = vld [vmem:[%s11635_s1 + $0xfe0] ss:$16 sps:$4 sm:$0xff]   ;;  %v8402_v38 = vld [vmem:[%s11635_s1 + $0xfe8] ss:$16 sps:$4 sm:$0xff]  }
 0x1d1   : > { %5462 = vmatprep.mubr.bf16.mxu0 %v1110_v54  ;;  %5995 = vmatprep.mubr.bf16.mxu1 %v1110_v54  ;;  %v8407_v54 = vld [vmem:[%s11635_s1 + $0x1004] ss:$16 sps:$4 sm:$0xff]  }
 0x1d3   : > { %5433 = vmatpush1.bf16.msra.mxu0 %v8315_v55  ;;  %5966 = vmatpush1.bf16.msra.mxu1 %v8318_v56  ;;  %v8410_v55 = vld [vmem:[%s11635_s1 + $0x100c] ss:$16 sps:$4 sm:$0xff]   ;;  %v1126_v56 = vcombine.high %v10614_v51, %v10614_v51 }
 0x1d4   : > { %5434 = vmatprep.subr.bf16.mxu0 %v8323_v47  ;;  %5967 = vmatprep.subr.bf16.mxu1 %v8326_v57  ;;  %v1108_v47 = vcombine.high %v10423_v48, %v10423_v48  ;;  %v8405_v57 = vld [vmem:[%s11635_s1 + $0x1000] ss:$16 sps:$4 sm:$0xff]   ;;  %v8416_v48 = vld [vmem:[%s11635_s1 + $0x102c] ss:$16 sps:$4 sm:$0xff]  }
 0x1d7   : > { %5435 = vmatpush1.bf16.msra.mxu0 %v8321_v58  ;;  %5968 = vmatpush1.bf16.msra.mxu1 %v8324_v59  ;;  %v8408_v58 = vld [vmem:[%s11635_s1 + $0x1008] ss:$16 sps:$4 sm:$0xff]   ;;  %v8413_v59 = vld [vmem:[%s11635_s1 + $0x1024] ss:$16 sps:$4 sm:$0xff]  }
 0x1d8   : > { %5436 = vmatprep.subr.bf16.mxu0 %v8329_v60  ;;  %5969 = vmatprep.subr.bf16.mxu1 %v8332_v61  ;;  %v10645_v60 = vrot.slane %v1126_v56, %v9135_v49  ;;  %v8411_v61 = vld [vmem:[%s11635_s1 + $0x1020] ss:$16 sps:$4 sm:$0xff]   ;;  %v8492_v56 = vld [vmem:[%s11635_s1 + $0x11c8] ss:$16 sps:$4 sm:$0xff]  }
 0x1db   : > { %5437 = vmatpush1.bf16.msra.mxu0 %v8327_v62  ;;  %5970 = vmatpush1.bf16.msra.mxu1 %v8330_v63  ;;  %v8414_v62 = vld [vmem:[%s11635_s1 + $0x1028] ss:$16 sps:$4 sm:$0xff]   ;;  %v8419_v63 = vld [vmem:[%s11635_s1 + $0x1044] ss:$16 sps:$4 sm:$0xff]  }
 0x1dc   : > { %5438 = vmatprep.subr.bf16.mxu0 %v8335_v0  ;;  %5971 = vmatprep.subr.bf16.mxu1 %v8338_v1  ;;  %v8422_v0 = vld [vmem:[%s11635_s1 + $0x104c] ss:$16 sps:$4 sm:$0xff]   ;;  %v8417_v1 = vld [vmem:[%s11635_s1 + $0x1040] ss:$16 sps:$4 sm:$0xff]  }
 0x1df   : > { %5439 = vmatpush1.bf16.msra.mxu0 %v8333_v2  ;;  %5972 = vmatpush1.bf16.msra.mxu1 %v8336_v3  ;;  %v8420_v2 = vld [vmem:[%s11635_s1 + $0x1048] ss:$16 sps:$4 sm:$0xff]   ;;  %v8425_v3 = vld [vmem:[%s11635_s1 + $0x1064] ss:$16 sps:$4 sm:$0xff]  }
 0x1e0   : > { %5440 = vmatprep.subr.bf16.mxu0 %v8341_v4  ;;  %5973 = vmatprep.subr.bf16.mxu1 %v8344_v5  ;;  %v8428_v4 = vld [vmem:[%s11635_s1 + $0x106c] ss:$16 sps:$4 sm:$0xff]   ;;  %v8423_v5 = vld [vmem:[%s11635_s1 + $0x1060] ss:$16 sps:$4 sm:$0xff]  }
 0x1e3   : > { %5441 = vmatpush1.bf16.msra.mxu0 %v8339_v6  ;;  %5974 = vmatpush1.bf16.msra.mxu1 %v8342_v7  ;;  %v8426_v6 = vld [vmem:[%s11635_s1 + $0x1068] ss:$16 sps:$4 sm:$0xff]   ;;  %v8431_v7 = vld [vmem:[%s11635_s1 + $0x1084] ss:$16 sps:$4 sm:$0xff]  }
 0x1e4   : > { %5442 = vmatprep.subr.bf16.mxu0 %v8347_v8  ;;  %5975 = vmatprep.subr.bf16.mxu1 %v8350_v9  ;;  %v8434_v8 = vld [vmem:[%s11635_s1 + $0x108c] ss:$16 sps:$4 sm:$0xff]   ;;  %v8429_v9 = vld [vmem:[%s11635_s1 + $0x1080] ss:$16 sps:$4 sm:$0xff]  }
 0x1e7   : > { %5443 = vmatpush1.bf16.msra.mxu0 %v8345_v10  ;;  %5976 = vmatpush1.bf16.msra.mxu1 %v8348_v11  ;;  %v8432_v10 = vld [vmem:[%s11635_s1 + $0x1088] ss:$16 sps:$4 sm:$0xff]   ;;  %v8437_v11 = vld [vmem:[%s11635_s1 + $0x10a4] ss:$16 sps:$4 sm:$0xff]  }
 0x1e8   : > { %5444 = vmatprep.subr.bf16.mxu0 %v8353_v12  ;;  %5977 = vmatprep.subr.bf16.mxu1 %v8356_v52  ;;  %v8440_v12 = vld [vmem:[%s11635_s1 + $0x10ac] ss:$16 sps:$4 sm:$0xff]   ;;  %v8435_v52 = vld [vmem:[%s11635_s1 + $0x10a0] ss:$16 sps:$4 sm:$0xff]  }
 0x1eb   : > { %5445 = vmatpush1.bf16.msra.mxu0 %v8351_v15  ;;  %5978 = vmatpush1.bf16.msra.mxu1 %v8354_v16  ;;  %v8438_v15 = vld [vmem:[%s11635_s1 + $0x10a8] ss:$16 sps:$4 sm:$0xff]   ;;  %v8443_v16 = vld [vmem:[%s11635_s1 + $0x10c4] ss:$16 sps:$4 sm:$0xff]  }
 0x1ec   : > { %5446 = vmatprep.subr.bf16.mxu0 %v8359_v17  ;;  %5979 = vmatprep.subr.bf16.mxu1 %v8362_v18  ;;  %v8446_v17 = vld [vmem:[%s11635_s1 + $0x10cc] ss:$16 sps:$4 sm:$0xff]   ;;  %v8441_v18 = vld [vmem:[%s11635_s1 + $0x10c0] ss:$16 sps:$4 sm:$0xff]  }
 0x1ef   : > { %5447 = vmatpush1.bf16.msra.mxu0 %v8357_v19  ;;  %5980 = vmatpush1.bf16.msra.mxu1 %v8360_v20  ;;  %v8444_v19 = vld [vmem:[%s11635_s1 + $0x10c8] ss:$16 sps:$4 sm:$0xff]   ;;  %v8449_v20 = vld [vmem:[%s11635_s1 + $0x10e4] ss:$16 sps:$4 sm:$0xff]  }
 0x1f0   : > { %5448 = vmatprep.subr.bf16.mxu0 %v8365_v22  ;;  %5981 = vmatprep.subr.bf16.mxu1 %v8368_v23  ;;  %v8452_v22 = vld [vmem:[%s11635_s1 + $0x10ec] ss:$16 sps:$4 sm:$0xff]   ;;  %v8447_v23 = vld [vmem:[%s11635_s1 + $0x10e0] ss:$16 sps:$4 sm:$0xff]  }
 0x1f3   : > { %5449 = vmatpush1.bf16.msra.mxu0 %v8363_v24  ;;  %5982 = vmatpush1.bf16.msra.mxu1 %v8366_v13  ;;  %v8450_v24 = vld [vmem:[%s11635_s1 + $0x10e8] ss:$16 sps:$4 sm:$0xff]   ;;  %v8455_v13 = vld [vmem:[%s11635_s1 + $0x1104] ss:$16 sps:$4 sm:$0xff]  }
 0x1f4   : > { %5450 = vmatprep.subr.bf16.mxu0 %v8371_v27  ;;  %5983 = vmatprep.subr.bf16.mxu1 %v8374_v28  ;;  %v8458_v27 = vld [vmem:[%s11635_s1 + $0x110c] ss:$16 sps:$4 sm:$0xff]   ;;  %v8453_v28 = vld [vmem:[%s11635_s1 + $0x1100] ss:$16 sps:$4 sm:$0xff]  }
 0x1f7   : > { %5451 = vmatpush1.bf16.msra.mxu0 %v8369_v29  ;;  %5984 = vmatpush1.bf16.msra.mxu1 %v8372_v14  ;;  %v8456_v29 = vld [vmem:[%s11635_s1 + $0x1108] ss:$16 sps:$4 sm:$0xff]   ;;  %v8461_v14 = vld [vmem:[%s11635_s1 + $0x1124] ss:$16 sps:$4 sm:$0xff]  }
 0x1f8   : > { %5452 = vmatprep.subr.bf16.mxu0 %v8377_v30  ;;  %5985 = vmatprep.subr.bf16.mxu1 %v8380_v31  ;;  %v8464_v30 = vld [vmem:[%s11635_s1 + $0x112c] ss:$16 sps:$4 sm:$0xff]   ;;  %v8459_v31 = vld [vmem:[%s11635_s1 + $0x1120] ss:$16 sps:$4 sm:$0xff]  }
 0x1fb   : > { %5453 = vmatpush1.bf16.msra.mxu0 %v8375_v25  ;;  %5986 = vmatpush1.bf16.msra.mxu1 %v8378_v32  ;;  %v8462_v25 = vld [vmem:[%s11635_s1 + $0x1128] ss:$16 sps:$4 sm:$0xff]   ;;  %v8467_v32 = vld [vmem:[%s11635_s1 + $0x1144] ss:$16 sps:$4 sm:$0xff]  }
 0x1fc   : > { %5454 = vmatprep.subr.bf16.mxu0 %v8383_v33  ;;  %5987 = vmatprep.subr.bf16.mxu1 %v8386_v26  ;;  %v8470_v33 = vld [vmem:[%s11635_s1 + $0x114c] ss:$16 sps:$4 sm:$0xff]   ;;  %v8465_v26 = vld [vmem:[%s11635_s1 + $0x1140] ss:$16 sps:$4 sm:$0xff]  }
 0x1ff   : > { %5455 = vmatpush1.bf16.msra.mxu0 %v8381_v36  ;;  %5988 = vmatpush1.bf16.msra.mxu1 %v8384_v37  ;;  %v8468_v36 = vld [vmem:[%s11635_s1 + $0x1148] ss:$16 sps:$4 sm:$0xff]   ;;  %v8473_v37 = vld [vmem:[%s11635_s1 + $0x1164] ss:$16 sps:$4 sm:$0xff]  }
 0x200   : > { %5456 = vmatprep.subr.bf16.mxu0 %v8389_v21  ;;  %5989 = vmatprep.subr.bf16.mxu1 %v8392_v39  ;;  %v8476_v21 = vld [vmem:[%s11635_s1 + $0x116c] ss:$16 sps:$4 sm:$0xff]   ;;  %v8471_v39 = vld [vmem:[%s11635_s1 + $0x1160] ss:$16 sps:$4 sm:$0xff]  }
 0x203   : > { %5457 = vmatpush1.bf16.msra.mxu0 %v8387_v40  ;;  %5990 = vmatpush1.bf16.msra.mxu1 %v8390_v41  ;;  %v8474_v40 = vld [vmem:[%s11635_s1 + $0x1168] ss:$16 sps:$4 sm:$0xff]   ;;  %v8479_v41 = vld [vmem:[%s11635_s1 + $0x1184] ss:$16 sps:$4 sm:$0xff]  }
 0x204   : > { %5458 = vmatprep.subr.bf16.mxu0 %v8395_v34  ;;  %5991 = vmatprep.subr.bf16.mxu1 %v8398_v42  ;;  %v8482_v34 = vld [vmem:[%s11635_s1 + $0x118c] ss:$16 sps:$4 sm:$0xff]   ;;  %v8477_v42 = vld [vmem:[%s11635_s1 + $0x1180] ss:$16 sps:$4 sm:$0xff]  }
 0x207   : > { %5459 = vmatpush1.bf16.msra.mxu0 %v8393_v45  ;;  %5992 = vmatpush1.bf16.msra.mxu1 %v8396_v46  ;;  %v8480_v45 = vld [vmem:[%s11635_s1 + $0x1188] ss:$16 sps:$4 sm:$0xff]   ;;  %v8485_v46 = vld [vmem:[%s11635_s1 + $0x11a4] ss:$16 sps:$4 sm:$0xff]  }
 0x208   : > { %5460 = vmatprep.subr.bf16.mxu0 %v8401_v35  ;;  %5993 = vmatprep.subr.bf16.mxu1 %v8404_v50  ;;  %v8488_v35 = vld [vmem:[%s11635_s1 + $0x11ac] ss:$16 sps:$4 sm:$0xff]   ;;  %v8483_v50 = vld [vmem:[%s11635_s1 + $0x11a0] ss:$16 sps:$4 sm:$0xff]  }
 0x20b   : > { %5461 = vmatpush1.bf16.msra.mxu0 %v8399_v53  ;;  %5994 = vmatpush1.bf16.msra.mxu1 %v8402_v38  ;;  %v8486_v53 = vld [vmem:[%s11635_s1 + $0x11a8] ss:$16 sps:$4 sm:$0xff]   ;;  %v8491_v38 = vld [vmem:[%s11635_s1 + $0x11c4] ss:$16 sps:$4 sm:$0xff]  }
 0x20c   : > { %5471 = vmatprep.subr.bf16.mxu0 %v8407_v54  ;;  %6004 = vmatprep.subr.bf16.mxu1 %v8410_v55  ;;  %v8494_v54 = vld [vmem:[%s11635_s1 + $0x11cc] ss:$16 sps:$4 sm:$0xff]   ;;  %v8489_v55 = vld [vmem:[%s11635_s1 + $0x11c0] ss:$16 sps:$4 sm:$0xff]  }
 0x20e   : > { %5463 = vmatmul.mubr.bf16.vlgmr.msra.gmra.mrb[0].mxu0 %v1108_v47  ;;  %5996 = vmatmul.mubr.bf16.vlgmr.msra.gmra.mrb[0].mxu1 %v1108_v47  ;;  %v8497_v47 = vld [vmem:[%s11635_s1 + $0x11e4] ss:$16 sps:$4 sm:$0xff]  }
 0x20f   : > { %5472 = vmatpush1.bf16.msra.mxu0 %v8405_v57  ;;  %6005 = vmatpush1.bf16.msra.mxu1 %v8408_v58  ;;  %v8500_v57 = vld [vmem:[%s11635_s1 + $0x11ec] ss:$16 sps:$4 sm:$0xff]   ;;  %v8495_v58 = vld [vmem:[%s11635_s1 + $0x11e0] ss:$16 sps:$4 sm:$0xff]  }
 0x210   : > { %5473 = vmatprep.subr.bf16.mxu0 %v8413_v59  ;;  %6006 = vmatprep.subr.bf16.mxu1 %v8416_v48  ;;  %v8498_v59 = vld [vmem:[%s11635_s1 + $0x11e8] ss:$16 sps:$4 sm:$0xff]   ;;  %v8503_v48 = vld [vmem:[%s11635_s1 + $0x1204] ss:$16 sps:$4 sm:$0xff]  }
 0x211   : > { %5503 = vmatprep.mubr.bf16.mxu0 %v10645_v60  ;;  %6036 = vmatprep.mubr.bf16.mxu1 %v10645_v60 }
 0x213   : > { %5474 = vmatpush1.bf16.msra.mxu0 %v8411_v61  ;;  %6007 = vmatpush1.bf16.msra.mxu1 %v8414_v62  ;;  %v8506_v61 = vld [vmem:[%s11635_s1 + $0x120c] ss:$16 sps:$4 sm:$0xff]   ;;  %v10831_v62 = vrot.slane %v10614_v51, %v9135_v49 }
 0x214   : > { %5475 = vmatprep.subr.bf16.mxu0 %v8419_v63  ;;  %6008 = vmatprep.subr.bf16.mxu1 %v8422_v0  ;;  %v8501_v63 = vld [vmem:[%s11635_s1 + $0x1200] ss:$16 sps:$4 sm:$0xff]   ;;  %v8504_v0 = vld [vmem:[%s11635_s1 + $0x1208] ss:$16 sps:$4 sm:$0xff]   ;;  %v8512_v51 = vld [vmem:[%s11635_s1 + $0x122c] ss:$16 sps:$4 sm:$0xff]  }
 0x217   : > { %5476 = vmatpush1.bf16.msra.mxu0 %v8417_v1  ;;  %6009 = vmatpush1.bf16.msra.mxu1 %v8420_v2  ;;  %v8509_v1 = vld [vmem:[%s11635_s1 + $0x1224] ss:$16 sps:$4 sm:$0xff]   ;;  %v1158_v2 = vcombine.high %v10645_v60, %v10645_v60 }
 0x218   : > { %5477 = vmatprep.subr.bf16.mxu0 %v8425_v3  ;;  %6010 = vmatprep.subr.bf16.mxu1 %v8428_v4  ;;  %v8507_v3 = vld [vmem:[%s11635_s1 + $0x1220] ss:$16 sps:$4 sm:$0xff]   ;;  %v8510_v4 = vld [vmem:[%s11635_s1 + $0x1228] ss:$16 sps:$4 sm:$0xff]   ;;  %v8515_v60 = vld [vmem:[%s11635_s1 + $0x1244] ss:$16 sps:$4 sm:$0xff]  }
 0x21b   : > { %5478 = vmatpush1.bf16.msra.mxu0 %v8423_v5  ;;  %6011 = vmatpush1.bf16.msra.mxu1 %v8426_v6  ;;  %v8518_v5 = vld [vmem:[%s11635_s1 + $0x124c] ss:$16 sps:$4 sm:$0xff]   ;;  %v8513_v6 = vld [vmem:[%s11635_s1 + $0x1240] ss:$16 sps:$4 sm:$0xff]  }
 0x21c   : > { %5479 = vmatprep.subr.bf16.mxu0 %v8431_v7  ;;  %6012 = vmatprep.subr.bf16.mxu1 %v8434_v8  ;;  %v8516_v7 = vld [vmem:[%s11635_s1 + $0x1248] ss:$16 sps:$4 sm:$0xff]   ;;  %v8521_v8 = vld [vmem:[%s11635_s1 + $0x1264] ss:$16 sps:$4 sm:$0xff]  }
 0x21f   : > { %5480 = vmatpush1.bf16.msra.mxu0 %v8429_v9  ;;  %6013 = vmatpush1.bf16.msra.mxu1 %v8432_v10  ;;  %v8524_v9 = vld [vmem:[%s11635_s1 + $0x126c] ss:$16 sps:$4 sm:$0xff]   ;;  %v8519_v10 = vld [vmem:[%s11635_s1 + $0x1260] ss:$16 sps:$4 sm:$0xff]  }
 0x220   : > { %5481 = vmatprep.subr.bf16.mxu0 %v8437_v11  ;;  %6014 = vmatprep.subr.bf16.mxu1 %v8440_v12  ;;  %v8522_v11 = vld [vmem:[%s11635_s1 + $0x1268] ss:$16 sps:$4 sm:$0xff]   ;;  %v8527_v12 = vld [vmem:[%s11635_s1 + $0x1284] ss:$16 sps:$4 sm:$0xff]  }
 0x223   : > { %5482 = vmatpush1.bf16.msra.mxu0 %v8435_v52  ;;  %6015 = vmatpush1.bf16.msra.mxu1 %v8438_v15  ;;  %v8530_v52 = vld [vmem:[%s11635_s1 + $0x128c] ss:$16 sps:$4 sm:$0xff]   ;;  %v8525_v15 = vld [vmem:[%s11635_s1 + $0x1280] ss:$16 sps:$4 sm:$0xff]  }
 0x224   : > { %5483 = vmatprep.subr.bf16.mxu0 %v8443_v16  ;;  %6016 = vmatprep.subr.bf16.mxu1 %v8446_v17  ;;  %v8528_v16 = vld [vmem:[%s11635_s1 + $0x1288] ss:$16 sps:$4 sm:$0xff]   ;;  %v8533_v17 = vld [vmem:[%s11635_s1 + $0x12a4] ss:$16 sps:$4 sm:$0xff]  }
 0x227   : > { %5484 = vmatpush1.bf16.msra.mxu0 %v8441_v18  ;;  %6017 = vmatpush1.bf16.msra.mxu1 %v8444_v19  ;;  %v8536_v18 = vld [vmem:[%s11635_s1 + $0x12ac] ss:$16 sps:$4 sm:$0xff]   ;;  %v8531_v19 = vld [vmem:[%s11635_s1 + $0x12a0] ss:$16 sps:$4 sm:$0xff]  }
 0x228   : > { %5485 = vmatprep.subr.bf16.mxu0 %v8449_v20  ;;  %6018 = vmatprep.subr.bf16.mxu1 %v8452_v22  ;;  %v8534_v20 = vld [vmem:[%s11635_s1 + $0x12a8] ss:$16 sps:$4 sm:$0xff]   ;;  %v8539_v22 = vld [vmem:[%s11635_s1 + $0x12c4] ss:$16 sps:$4 sm:$0xff]  }
 0x22b   : > { %5486 = vmatpush1.bf16.msra.mxu0 %v8447_v23  ;;  %6019 = vmatpush1.bf16.msra.mxu1 %v8450_v24  ;;  %v8542_v23 = vld [vmem:[%s11635_s1 + $0x12cc] ss:$16 sps:$4 sm:$0xff]   ;;  %v8537_v24 = vld [vmem:[%s11635_s1 + $0x12c0] ss:$16 sps:$4 sm:$0xff]  }
 0x22c   : > { %5487 = vmatprep.subr.bf16.mxu0 %v8455_v13  ;;  %6020 = vmatprep.subr.bf16.mxu1 %v8458_v27  ;;  %v8540_v13 = vld [vmem:[%s11635_s1 + $0x12c8] ss:$16 sps:$4 sm:$0xff]   ;;  %v8545_v27 = vld [vmem:[%s11635_s1 + $0x12e4] ss:$16 sps:$4 sm:$0xff]  }
 0x22f   : > { %5488 = vmatpush1.bf16.msra.mxu0 %v8453_v28  ;;  %6021 = vmatpush1.bf16.msra.mxu1 %v8456_v29  ;;  %v8548_v28 = vld [vmem:[%s11635_s1 + $0x12ec] ss:$16 sps:$4 sm:$0xff]   ;;  %v8543_v29 = vld [vmem:[%s11635_s1 + $0x12e0] ss:$16 sps:$4 sm:$0xff]  }
 0x230   : > { %5489 = vmatprep.subr.bf16.mxu0 %v8461_v14  ;;  %6022 = vmatprep.subr.bf16.mxu1 %v8464_v30  ;;  %v8546_v14 = vld [vmem:[%s11635_s1 + $0x12e8] ss:$16 sps:$4 sm:$0xff]   ;;  %v8551_v30 = vld [vmem:[%s11635_s1 + $0x1304] ss:$16 sps:$4 sm:$0xff]  }
 0x233   : > { %5490 = vmatpush1.bf16.msra.mxu0 %v8459_v31  ;;  %6023 = vmatpush1.bf16.msra.mxu1 %v8462_v25  ;;  %v8554_v31 = vld [vmem:[%s11635_s1 + $0x130c] ss:$16 sps:$4 sm:$0xff]   ;;  %v8549_v25 = vld [vmem:[%s11635_s1 + $0x1300] ss:$16 sps:$4 sm:$0xff]  }
 0x234   : > { %5491 = vmatprep.subr.bf16.mxu0 %v8467_v32  ;;  %6024 = vmatprep.subr.bf16.mxu1 %v8470_v33  ;;  %v8552_v32 = vld [vmem:[%s11635_s1 + $0x1308] ss:$16 sps:$4 sm:$0xff]   ;;  %v8557_v33 = vld [vmem:[%s11635_s1 + $0x1324] ss:$16 sps:$4 sm:$0xff]  }
 0x237   : > { %5492 = vmatpush1.bf16.msra.mxu0 %v8465_v26  ;;  %6025 = vmatpush1.bf16.msra.mxu1 %v8468_v36  ;;  %v8560_v26 = vld [vmem:[%s11635_s1 + $0x132c] ss:$16 sps:$4 sm:$0xff]   ;;  %v8555_v36 = vld [vmem:[%s11635_s1 + $0x1320] ss:$16 sps:$4 sm:$0xff]  }
 0x238   : > { %5493 = vmatprep.subr.bf16.mxu0 %v8473_v37  ;;  %6026 = vmatprep.subr.bf16.mxu1 %v8476_v21  ;;  %v8558_v37 = vld [vmem:[%s11635_s1 + $0x1328] ss:$16 sps:$4 sm:$0xff]   ;;  %v8563_v21 = vld [vmem:[%s11635_s1 + $0x1344] ss:$16 sps:$4 sm:$0xff]  }
 0x23b   : > { %5494 = vmatpush1.bf16.msra.mxu0 %v8471_v39  ;;  %6027 = vmatpush1.bf16.msra.mxu1 %v8474_v40  ;;  %v8566_v39 = vld [vmem:[%s11635_s1 + $0x134c] ss:$16 sps:$4 sm:$0xff]   ;;  %v8561_v40 = vld [vmem:[%s11635_s1 + $0x1340] ss:$16 sps:$4 sm:$0xff]  }
 0x23c   : > { %5495 = vmatprep.subr.bf16.mxu0 %v8479_v41  ;;  %6028 = vmatprep.subr.bf16.mxu1 %v8482_v34  ;;  %v8564_v41 = vld [vmem:[%s11635_s1 + $0x1348] ss:$16 sps:$4 sm:$0xff]   ;;  %v8569_v34 = vld [vmem:[%s11635_s1 + $0x1364] ss:$16 sps:$4 sm:$0xff]  }
 0x23f   : > { %5496 = vmatpush1.bf16.msra.mxu0 %v8477_v42  ;;  %6029 = vmatpush1.bf16.msra.mxu1 %v8480_v45  ;;  %v8572_v42 = vld [vmem:[%s11635_s1 + $0x136c] ss:$16 sps:$4 sm:$0xff]   ;;  %v8567_v45 = vld [vmem:[%s11635_s1 + $0x1360] ss:$16 sps:$4 sm:$0xff]  }
 0x240   : > { %5497 = vmatprep.subr.bf16.mxu0 %v8485_v46  ;;  %6030 = vmatprep.subr.bf16.mxu1 %v8488_v35  ;;  %v8570_v46 = vld [vmem:[%s11635_s1 + $0x1368] ss:$16 sps:$4 sm:$0xff]   ;;  %v8575_v35 = vld [vmem:[%s11635_s1 + $0x1384] ss:$16 sps:$4 sm:$0xff]  }
 0x243   : > { %5498 = vmatpush1.bf16.msra.mxu0 %v8483_v50  ;;  %6031 = vmatpush1.bf16.msra.mxu1 %v8486_v53  ;;  %v8578_v50 = vld [vmem:[%s11635_s1 + $0x138c] ss:$16 sps:$4 sm:$0xff]   ;;  %v8573_v53 = vld [vmem:[%s11635_s1 + $0x1380] ss:$16 sps:$4 sm:$0xff]  }
 0x244   : > { %5499 = vmatprep.subr.bf16.mxu0 %v8491_v38  ;;  %6032 = vmatprep.subr.bf16.mxu1 %v8494_v54  ;;  %v8576_v38 = vld [vmem:[%s11635_s1 + $0x1388] ss:$16 sps:$4 sm:$0xff]   ;;  %v8581_v54 = vld [vmem:[%s11635_s1 + $0x13a4] ss:$16 sps:$4 sm:$0xff]  }
 0x247   : > { %5500 = vmatpush1.bf16.msra.mxu0 %v8489_v55  ;;  %6033 = vmatpush1.bf16.msra.mxu1 %v8492_v56  ;;  %v8584_v55 = vld [vmem:[%s11635_s1 + $0x13ac] ss:$16 sps:$4 sm:$0xff]   ;;  %v8579_v56 = vld [vmem:[%s11635_s1 + $0x13a0] ss:$16 sps:$4 sm:$0xff]  }
 0x248   : > { %5501 = vmatprep.subr.bf16.mxu0 %v8497_v47  ;;  %6034 = vmatprep.subr.bf16.mxu1 %v8500_v57  ;;  %v8582_v47 = vld [vmem:[%s11635_s1 + $0x13a8] ss:$16 sps:$4 sm:$0xff]   ;;  %v8587_v57 = vld [vmem:[%s11635_s1 + $0x13c4] ss:$16 sps:$4 sm:$0xff]  }
 0x24b   : > { %5502 = vmatpush1.bf16.msra.mxu0 %v8495_v58  ;;  %6035 = vmatpush1.bf16.msra.mxu1 %v8498_v59  ;;  %v8590_v58 = vld [vmem:[%s11635_s1 + $0x13cc] ss:$16 sps:$4 sm:$0xff]   ;;  %v1111_v59 = vcombine.high %v10598_v44, %v10598_v44 }
 0x24c   : > { %5512 = vmatprep.subr.bf16.mxu0 %v8503_v48  ;;  %6045 = vmatprep.subr.bf16.mxu1 %v8506_v61  ;;  %v8585_v48 = vld [vmem:[%s11635_s1 + $0x13c0] ss:$16 sps:$4 sm:$0xff]   ;;  %v8588_v61 = vld [vmem:[%s11635_s1 + $0x13c8] ss:$16 sps:$4 sm:$0xff]   ;;  %v8596_v44 = vld [vmem:[%s11635_s1 + $0x13ec] ss:$16 sps:$4 sm:$0xff]  }
 0x24e   : > { %5504 = vmatmul.mubr.bf16.vlgmr.msra.gmra.mrb[0].mxu0 %v10831_v62  ;;  %6037 = vmatmul.mubr.bf16.vlgmr.msra.gmra.mrb[0].mxu1 %v10831_v62 }
 0x24f   : > { %5513 = vmatpush1.bf16.msra.mxu0 %v8501_v63  ;;  %6046 = vmatpush1.bf16.msra.mxu1 %v8504_v0  ;;  %v8593_v63 = vld [vmem:[%s11635_s1 + $0x13e4] ss:$16 sps:$4 sm:$0xff]   ;;  %v11020_v0 = vrot.slane %v1111_v59, %v9135_v49  ;;  %v8672_v59 = vld [vmem:[%s11635_s1 + $0x1588] ss:$16 sps:$4 sm:$0xff]  }
 0x250   : > { %5514 = vmatprep.subr.bf16.mxu0 %v8509_v1  ;;  %6047 = vmatprep.subr.bf16.mxu1 %v8512_v51  ;;  %v8591_v1 = vld [vmem:[%s11635_s1 + $0x13e0] ss:$16 sps:$4 sm:$0xff]   ;;  %v8594_v51 = vld [vmem:[%s11635_s1 + $0x13e8] ss:$16 sps:$4 sm:$0xff]  }
 0x251   : > { %5544 = vmatprep.mubr.bf16.mxu0 %v1158_v2  ;;  %6077 = vmatprep.mubr.bf16.mxu1 %v1158_v2  ;;  %v8599_v2 = vld [vmem:[%s11635_s1 + $0x1404] ss:$16 sps:$4 sm:$0xff]  }
 0x253   : > { %5515 = vmatpush1.bf16.msra.mxu0 %v8507_v3  ;;  %6048 = vmatpush1.bf16.msra.mxu1 %v8510_v4  ;;  %v8602_v3 = vld [vmem:[%s11635_s1 + $0x140c] ss:$16 sps:$4 sm:$0xff]   ;;  %v1127_v4 = vcombine.high %v11020_v0, %v11020_v0 }
 0x254   : > { %5516 = vmatprep.subr.bf16.mxu0 %v8515_v60  ;;  %6049 = vmatprep.subr.bf16.mxu1 %v8518_v5  ;;  %v1156_v60 = vcombine.high %v10831_v62, %v10831_v62  ;;  %v8597_v5 = vld [vmem:[%s11635_s1 + $0x1400] ss:$16 sps:$4 sm:$0xff]   ;;  %v8608_v62 = vld [vmem:[%s11635_s1 + $0x142c] ss:$16 sps:$4 sm:$0xff]  }
 0x257   : > { %5517 = vmatpush1.bf16.msra.mxu0 %v8513_v6  ;;  %6050 = vmatpush1.bf16.msra.mxu1 %v8516_v7  ;;  %v8600_v6 = vld [vmem:[%s11635_s1 + $0x1408] ss:$16 sps:$4 sm:$0xff]   ;;  %v8605_v7 = vld [vmem:[%s11635_s1 + $0x1424] ss:$16 sps:$4 sm:$0xff]  }
 0x258   : > { %5518 = vmatprep.subr.bf16.mxu0 %v8521_v8  ;;  %6051 = vmatprep.subr.bf16.mxu1 %v8524_v9  ;;  %v11051_v8 = vrot.slane %v1127_v4, %v9135_v49  ;;  %v8603_v9 = vld [vmem:[%s11635_s1 + $0x1420] ss:$16 sps:$4 sm:$0xff]   ;;  %v8689_v4 = vld [vmem:[%s11635_s1 + $0x15e4] ss:$16 sps:$4 sm:$0xff]  }
 0x25b   : > { %5519 = vmatpush1.bf16.msra.mxu0 %v8519_v10  ;;  %6052 = vmatpush1.bf16.msra.mxu1 %v8522_v11  ;;  %v8606_v10 = vld [vmem:[%s11635_s1 + $0x1428] ss:$16 sps:$4 sm:$0xff]   ;;  %v8611_v11 = vld [vmem:[%s11635_s1 + $0x1444] ss:$16 sps:$4 sm:$0xff]  }
 0x25c   : > { %5520 = vmatprep.subr.bf16.mxu0 %v8527_v12  ;;  %6053 = vmatprep.subr.bf16.mxu1 %v8530_v52  ;;  %v8614_v12 = vld [vmem:[%s11635_s1 + $0x144c] ss:$16 sps:$4 sm:$0xff]   ;;  %v8609_v52 = vld [vmem:[%s11635_s1 + $0x1440] ss:$16 sps:$4 sm:$0xff]  }
 0x25f   : > { %5521 = vmatpush1.bf16.msra.mxu0 %v8525_v15  ;;  %6054 = vmatpush1.bf16.msra.mxu1 %v8528_v16  ;;  %v8612_v15 = vld [vmem:[%s11635_s1 + $0x1448] ss:$16 sps:$4 sm:$0xff]   ;;  %v8617_v16 = vld [vmem:[%s11635_s1 + $0x1464] ss:$16 sps:$4 sm:$0xff]  }
 0x260   : > { %5522 = vmatprep.subr.bf16.mxu0 %v8533_v17  ;;  %6055 = vmatprep.subr.bf16.mxu1 %v8536_v18  ;;  %v8620_v17 = vld [vmem:[%s11635_s1 + $0x146c] ss:$16 sps:$4 sm:$0xff]   ;;  %v8615_v18 = vld [vmem:[%s11635_s1 + $0x1460] ss:$16 sps:$4 sm:$0xff]  }
 0x263   : > { %5523 = vmatpush1.bf16.msra.mxu0 %v8531_v19  ;;  %6056 = vmatpush1.bf16.msra.mxu1 %v8534_v20  ;;  %v8618_v19 = vld [vmem:[%s11635_s1 + $0x1468] ss:$16 sps:$4 sm:$0xff]   ;;  %v8623_v20 = vld [vmem:[%s11635_s1 + $0x1484] ss:$16 sps:$4 sm:$0xff]  }
 0x264   : > { %5524 = vmatprep.subr.bf16.mxu0 %v8539_v22  ;;  %6057 = vmatprep.subr.bf16.mxu1 %v8542_v23  ;;  %v8626_v22 = vld [vmem:[%s11635_s1 + $0x148c] ss:$16 sps:$4 sm:$0xff]   ;;  %v8621_v23 = vld [vmem:[%s11635_s1 + $0x1480] ss:$16 sps:$4 sm:$0xff]  }
 0x267   : > { %5525 = vmatpush1.bf16.msra.mxu0 %v8537_v24  ;;  %6058 = vmatpush1.bf16.msra.mxu1 %v8540_v13  ;;  %v8624_v24 = vld [vmem:[%s11635_s1 + $0x1488] ss:$16 sps:$4 sm:$0xff]   ;;  %v8629_v13 = vld [vmem:[%s11635_s1 + $0x14a4] ss:$16 sps:$4 sm:$0xff]  }
 0x268   : > { %5526 = vmatprep.subr.bf16.mxu0 %v8545_v27  ;;  %6059 = vmatprep.subr.bf16.mxu1 %v8548_v28  ;;  %v8632_v27 = vld [vmem:[%s11635_s1 + $0x14ac] ss:$16 sps:$4 sm:$0xff]   ;;  %v8627_v28 = vld [vmem:[%s11635_s1 + $0x14a0] ss:$16 sps:$4 sm:$0xff]  }
 0x26b   : > { %5527 = vmatpush1.bf16.msra.mxu0 %v8543_v29  ;;  %6060 = vmatpush1.bf16.msra.mxu1 %v8546_v14  ;;  %v8630_v29 = vld [vmem:[%s11635_s1 + $0x14a8] ss:$16 sps:$4 sm:$0xff]   ;;  %v8635_v14 = vld [vmem:[%s11635_s1 + $0x14c4] ss:$16 sps:$4 sm:$0xff]  }
 0x26c   : > { %5528 = vmatprep.subr.bf16.mxu0 %v8551_v30  ;;  %6061 = vmatprep.subr.bf16.mxu1 %v8554_v31  ;;  %v8638_v30 = vld [vmem:[%s11635_s1 + $0x14cc] ss:$16 sps:$4 sm:$0xff]   ;;  %v8633_v31 = vld [vmem:[%s11635_s1 + $0x14c0] ss:$16 sps:$4 sm:$0xff]  }
 0x26f   : > { %5529 = vmatpush1.bf16.msra.mxu0 %v8549_v25  ;;  %6062 = vmatpush1.bf16.msra.mxu1 %v8552_v32  ;;  %v8636_v25 = vld [vmem:[%s11635_s1 + $0x14c8] ss:$16 sps:$4 sm:$0xff]   ;;  %v8641_v32 = vld [vmem:[%s11635_s1 + $0x14e4] ss:$16 sps:$4 sm:$0xff]  }
 0x270   : > { %5530 = vmatprep.subr.bf16.mxu0 %v8557_v33  ;;  %6063 = vmatprep.subr.bf16.mxu1 %v8560_v26  ;;  %v8644_v33 = vld [vmem:[%s11635_s1 + $0x14ec] ss:$16 sps:$4 sm:$0xff]   ;;  %v8639_v26 = vld [vmem:[%s11635_s1 + $0x14e0] ss:$16 sps:$4 sm:$0xff]  }
 0x273   : > { %5531 = vmatpush1.bf16.msra.mxu0 %v8555_v36  ;;  %6064 = vmatpush1.bf16.msra.mxu1 %v8558_v37  ;;  %v8642_v36 = vld [vmem:[%s11635_s1 + $0x14e8] ss:$16 sps:$4 sm:$0xff]   ;;  %v8647_v37 = vld [vmem:[%s11635_s1 + $0x1504] ss:$16 sps:$4 sm:$0xff]  }
 0x274   : > { %5532 = vmatprep.subr.bf16.mxu0 %v8563_v21  ;;  %6065 = vmatprep.subr.bf16.mxu1 %v8566_v39  ;;  %v8650_v21 = vld [vmem:[%s11635_s1 + $0x150c] ss:$16 sps:$4 sm:$0xff]   ;;  %v8645_v39 = vld [vmem:[%s11635_s1 + $0x1500] ss:$16 sps:$4 sm:$0xff]  }
 0x277   : > { %5533 = vmatpush1.bf16.msra.mxu0 %v8561_v40  ;;  %6066 = vmatpush1.bf16.msra.mxu1 %v8564_v41  ;;  %v8648_v40 = vld [vmem:[%s11635_s1 + $0x1508] ss:$16 sps:$4 sm:$0xff]   ;;  %v8653_v41 = vld [vmem:[%s11635_s1 + $0x1524] ss:$16 sps:$4 sm:$0xff]  }
 0x278   : > { %5534 = vmatprep.subr.bf16.mxu0 %v8569_v34  ;;  %6067 = vmatprep.subr.bf16.mxu1 %v8572_v42  ;;  %v8656_v34 = vld [vmem:[%s11635_s1 + $0x152c] ss:$16 sps:$4 sm:$0xff]   ;;  %v8651_v42 = vld [vmem:[%s11635_s1 + $0x1520] ss:$16 sps:$4 sm:$0xff]  }
 0x27b   : > { %5535 = vmatpush1.bf16.msra.mxu0 %v8567_v45  ;;  %6068 = vmatpush1.bf16.msra.mxu1 %v8570_v46  ;;  %v8654_v45 = vld [vmem:[%s11635_s1 + $0x1528] ss:$16 sps:$4 sm:$0xff]   ;;  %v8659_v46 = vld [vmem:[%s11635_s1 + $0x1544] ss:$16 sps:$4 sm:$0xff]  }
 0x27c   : > { %5536 = vmatprep.subr.bf16.mxu0 %v8575_v35  ;;  %6069 = vmatprep.subr.bf16.mxu1 %v8578_v50  ;;  %v8662_v35 = vld [vmem:[%s11635_s1 + $0x154c] ss:$16 sps:$4 sm:$0xff]   ;;  %v8657_v50 = vld [vmem:[%s11635_s1 + $0x1540] ss:$16 sps:$4 sm:$0xff]  }
 0x27f   : > { %5537 = vmatpush1.bf16.msra.mxu0 %v8573_v53  ;;  %6070 = vmatpush1.bf16.msra.mxu1 %v8576_v38  ;;  %v8660_v53 = vld [vmem:[%s11635_s1 + $0x1548] ss:$16 sps:$4 sm:$0xff]   ;;  %v8665_v38 = vld [vmem:[%s11635_s1 + $0x1564] ss:$16 sps:$4 sm:$0xff]  }
 0x280   : > { %5538 = vmatprep.subr.bf16.mxu0 %v8581_v54  ;;  %6071 = vmatprep.subr.bf16.mxu1 %v8584_v55  ;;  %v8668_v54 = vld [vmem:[%s11635_s1 + $0x156c] ss:$16 sps:$4 sm:$0xff]   ;;  %v8663_v55 = vld [vmem:[%s11635_s1 + $0x1560] ss:$16 sps:$4 sm:$0xff]  }
 0x283   : > { %5539 = vmatpush1.bf16.msra.mxu0 %v8579_v56  ;;  %6072 = vmatpush1.bf16.msra.mxu1 %v8582_v47  ;;  %v8666_v56 = vld [vmem:[%s11635_s1 + $0x1568] ss:$16 sps:$4 sm:$0xff]   ;;  %v8671_v47 = vld [vmem:[%s11635_s1 + $0x1584] ss:$16 sps:$4 sm:$0xff]  }
 0x284   : > { %5540 = vmatprep.subr.bf16.mxu0 %v8587_v57  ;;  %6073 = vmatprep.subr.bf16.mxu1 %v8590_v58  ;;  %v8674_v57 = vld [vmem:[%s11635_s1 + $0x158c] ss:$16 sps:$4 sm:$0xff]   ;;  %v8669_v58 = vld [vmem:[%s11635_s1 + $0x1580] ss:$16 sps:$4 sm:$0xff]  }
 0x287   : > { %5541 = vmatpush1.bf16.msra.mxu0 %v8585_v48  ;;  %6074 = vmatpush1.bf16.msra.mxu1 %v8588_v61  ;;  %v8677_v48 = vld [vmem:[%s11635_s1 + $0x15a4] ss:$16 sps:$4 sm:$0xff]   ;;  %v8680_v61 = vld [vmem:[%s11635_s1 + $0x15ac] ss:$16 sps:$4 sm:$0xff]  }
 0x288   : > { %5542 = vmatprep.subr.bf16.mxu0 %v8593_v63  ;;  %6075 = vmatprep.subr.bf16.mxu1 %v8596_v44  ;;  %v8675_v63 = vld [vmem:[%s11635_s1 + $0x15a0] ss:$16 sps:$4 sm:$0xff]   ;;  %v8678_v44 = vld [vmem:[%s11635_s1 + $0x15a8] ss:$16 sps:$4 sm:$0xff]  }
 0x28b   : > { %5543 = vmatpush1.bf16.msra.mxu0 %v8591_v1  ;;  %6076 = vmatpush1.bf16.msra.mxu1 %v8594_v51  ;;  %v8683_v1 = vld [vmem:[%s11635_s1 + $0x15c4] ss:$16 sps:$4 sm:$0xff]   ;;  %v8686_v51 = vld [vmem:[%s11635_s1 + $0x15cc] ss:$16 sps:$4 sm:$0xff]  }
 0x28c   : > { %5553 = vmatprep.subr.bf16.mxu0 %v8599_v2  ;;  %6086 = vmatprep.subr.bf16.mxu1 %v8602_v3  ;;  %v8681_v2 = vld [vmem:[%s11635_s1 + $0x15c0] ss:$16 sps:$4 sm:$0xff]   ;;  %v8684_v3 = vld [vmem:[%s11635_s1 + $0x15c8] ss:$16 sps:$4 sm:$0xff]  }
 0x28e   : > { %5545 = vmatmul.mubr.bf16.vlgmr.msra.gmra.mrb[0].mxu0 %v1156_v60  ;;  %6078 = vmatmul.mubr.bf16.vlgmr.msra.gmra.mrb[0].mxu1 %v1156_v60  ;;  %v8692_v60 = vld [vmem:[%s11635_s1 + $0x15ec] ss:$16 sps:$4 sm:$0xff]  }
 0x28f   : > { %5554 = vmatpush1.bf16.msra.mxu0 %v8597_v5  ;;  %6087 = vmatpush1.bf16.msra.mxu1 %v8600_v6  ;;  %v8687_v5 = vld [vmem:[%s11635_s1 + $0x15e0] ss:$16 sps:$4 sm:$0xff]   ;;  %v8690_v6 = vld [vmem:[%s11635_s1 + $0x15e8] ss:$16 sps:$4 sm:$0xff]  }
 0x290   : > { %5555 = vmatprep.subr.bf16.mxu0 %v8605_v7  ;;  %6088 = vmatprep.subr.bf16.mxu1 %v8608_v62  ;;  %v8696_v7 = vld [vmem:[%s11635_s1 + $0x1604] ss:$16 sps:$4 sm:$0xff]   ;;  %v8699_v62 = vld [vmem:[%s11635_s1 + $0x160c] ss:$16 sps:$4 sm:$0xff]  }
 0x291   : > { %5585 = vmatprep.mubr.bf16.mxu0 %v11051_v8  ;;  %6118 = vmatprep.mubr.bf16.mxu1 %v11051_v8 }
 0x293   : > { %5556 = vmatpush1.bf16.msra.mxu0 %v8603_v9  ;;  %6089 = vmatpush1.bf16.msra.mxu1 %v8606_v10  ;;  %v11237_v9 = vrot.slane %v11020_v0, %v9135_v49  ;;  %v8694_v10 = vld [vmem:[%s11635_s1 + $0x1600] ss:$16 sps:$4 sm:$0xff]   ;;  %v8705_v0 = vld [vmem:[%s11635_s1 + $0x162c] ss:$16 sps:$4 sm:$0xff]  }
 0x294   : > { %5557 = vmatprep.subr.bf16.mxu0 %v8611_v11  ;;  %6090 = vmatprep.subr.bf16.mxu1 %v8614_v12  ;;  %v8697_v11 = vld [vmem:[%s11635_s1 + $0x1608] ss:$16 sps:$4 sm:$0xff]   ;;  %v8702_v12 = vld [vmem:[%s11635_s1 + $0x1624] ss:$16 sps:$4 sm:$0xff]  }
 0x297   : > { %5558 = vmatpush1.bf16.msra.mxu0 %v8609_v52  ;;  %6091 = vmatpush1.bf16.msra.mxu1 %v8612_v15  ;;  %v1159_v52 = vcombine.high %v11051_v8, %v11051_v8  ;;  %v8700_v15 = vld [vmem:[%s11635_s1 + $0x1620] ss:$16 sps:$4 sm:$0xff]   ;;  %v8708_v8 = vld [vmem:[%s11635_s1 + $0x1644] ss:$16 sps:$4 sm:$0xff]  }
 0x298   : > { %5559 = vmatprep.subr.bf16.mxu0 %v8617_v16  ;;  %6092 = vmatprep.subr.bf16.mxu1 %v8620_v17  ;;  %v8703_v16 = vld [vmem:[%s11635_s1 + $0x1628] ss:$16 sps:$4 sm:$0xff]   ;;  %v8711_v17 = vld [vmem:[%s11635_s1 + $0x164c] ss:$16 sps:$4 sm:$0xff]  }
 0x29b   : > { %5560 = vmatpush1.bf16.msra.mxu0 %v8615_v18  ;;  %6093 = vmatpush1.bf16.msra.mxu1 %v8618_v19  ;;  %v8706_v18 = vld [vmem:[%s11635_s1 + $0x1640] ss:$16 sps:$4 sm:$0xff]   ;;  %v8709_v19 = vld [vmem:[%s11635_s1 + $0x1648] ss:$16 sps:$4 sm:$0xff]  }
 0x29c   : > { %5561 = vmatprep.subr.bf16.mxu0 %v8623_v20  ;;  %6094 = vmatprep.subr.bf16.mxu1 %v8626_v22  ;;  %v8714_v20 = vld [vmem:[%s11635_s1 + $0x1664] ss:$16 sps:$4 sm:$0xff]   ;;  %v8717_v22 = vld [vmem:[%s11635_s1 + $0x166c] ss:$16 sps:$4 sm:$0xff]  }
 0x29f   : > { %5562 = vmatpush1.bf16.msra.mxu0 %v8621_v23  ;;  %6095 = vmatpush1.bf16.msra.mxu1 %v8624_v24  ;;  %v8712_v23 = vld [vmem:[%s11635_s1 + $0x1660] ss:$16 sps:$4 sm:$0xff]   ;;  %v8715_v24 = vld [vmem:[%s11635_s1 + $0x1668] ss:$16 sps:$4 sm:$0xff]  }
 0x2a0   : > { %5563 = vmatprep.subr.bf16.mxu0 %v8629_v13  ;;  %6096 = vmatprep.subr.bf16.mxu1 %v8632_v27  ;;  %v8720_v13 = vld [vmem:[%s11635_s1 + $0x1684] ss:$16 sps:$4 sm:$0xff]   ;;  %v8723_v27 = vld [vmem:[%s11635_s1 + $0x168c] ss:$16 sps:$4 sm:$0xff]  }
 0x2a3   : > { %5564 = vmatpush1.bf16.msra.mxu0 %v8627_v28  ;;  %6097 = vmatpush1.bf16.msra.mxu1 %v8630_v29  ;;  %v8718_v28 = vld [vmem:[%s11635_s1 + $0x1680] ss:$16 sps:$4 sm:$0xff]   ;;  %v8721_v29 = vld [vmem:[%s11635_s1 + $0x1688] ss:$16 sps:$4 sm:$0xff]  }
 0x2a4   : > { %5565 = vmatprep.subr.bf16.mxu0 %v8635_v14  ;;  %6098 = vmatprep.subr.bf16.mxu1 %v8638_v30  ;;  %v8726_v14 = vld [vmem:[%s11635_s1 + $0x16a4] ss:$16 sps:$4 sm:$0xff]   ;;  %v8729_v30 = vld [vmem:[%s11635_s1 + $0x16ac] ss:$16 sps:$4 sm:$0xff]  }
 0x2a7   : > { %5566 = vmatpush1.bf16.msra.mxu0 %v8633_v31  ;;  %6099 = vmatpush1.bf16.msra.mxu1 %v8636_v25  ;;  %v8724_v31 = vld [vmem:[%s11635_s1 + $0x16a0] ss:$16 sps:$4 sm:$0xff]   ;;  %v8727_v25 = vld [vmem:[%s11635_s1 + $0x16a8] ss:$16 sps:$4 sm:$0xff]  }
 0x2a8   : > { %5567 = vmatprep.subr.bf16.mxu0 %v8641_v32  ;;  %6100 = vmatprep.subr.bf16.mxu1 %v8644_v33  ;;  %v8732_v32 = vld [vmem:[%s11635_s1 + $0x16c4] ss:$16 sps:$4 sm:$0xff]   ;;  %v8735_v33 = vld [vmem:[%s11635_s1 + $0x16cc] ss:$16 sps:$4 sm:$0xff]  }
 0x2ab   : > { %5568 = vmatpush1.bf16.msra.mxu0 %v8639_v26  ;;  %6101 = vmatpush1.bf16.msra.mxu1 %v8642_v36  ;;  %v8730_v26 = vld [vmem:[%s11635_s1 + $0x16c0] ss:$16 sps:$4 sm:$0xff]   ;;  %v8733_v36 = vld [vmem:[%s11635_s1 + $0x16c8] ss:$16 sps:$4 sm:$0xff]  }
 0x2ac   : > { %5569 = vmatprep.subr.bf16.mxu0 %v8647_v37  ;;  %6102 = vmatprep.subr.bf16.mxu1 %v8650_v21  ;;  %v8738_v37 = vld [vmem:[%s11635_s1 + $0x16e4] ss:$16 sps:$4 sm:$0xff]   ;;  %v8741_v21 = vld [vmem:[%s11635_s1 + $0x16ec] ss:$16 sps:$4 sm:$0xff]  }
 0x2af   : > { %5570 = vmatpush1.bf16.msra.mxu0 %v8645_v39  ;;  %6103 = vmatpush1.bf16.msra.mxu1 %v8648_v40  ;;  %v8736_v39 = vld [vmem:[%s11635_s1 + $0x16e0] ss:$16 sps:$4 sm:$0xff]   ;;  %v8739_v40 = vld [vmem:[%s11635_s1 + $0x16e8] ss:$16 sps:$4 sm:$0xff]  }
 0x2b0   : > { %5571 = vmatprep.subr.bf16.mxu0 %v8653_v41  ;;  %6104 = vmatprep.subr.bf16.mxu1 %v8656_v34  ;;  %v8744_v41 = vld [vmem:[%s11635_s1 + $0x1704] ss:$16 sps:$4 sm:$0xff]   ;;  %v8747_v34 = vld [vmem:[%s11635_s1 + $0x170c] ss:$16 sps:$4 sm:$0xff]  }
 0x2b3   : > { %5572 = vmatpush1.bf16.msra.mxu0 %v8651_v42  ;;  %6105 = vmatpush1.bf16.msra.mxu1 %v8654_v45  ;;  %v8742_v42 = vld [vmem:[%s11635_s1 + $0x1700] ss:$16 sps:$4 sm:$0xff]   ;;  %v8745_v45 = vld [vmem:[%s11635_s1 + $0x1708] ss:$16 sps:$4 sm:$0xff]  }
 0x2b4   : > { %5573 = vmatprep.subr.bf16.mxu0 %v8659_v46  ;;  %6106 = vmatprep.subr.bf16.mxu1 %v8662_v35  ;;  %v8750_v46 = vld [vmem:[%s11635_s1 + $0x1724] ss:$16 sps:$4 sm:$0xff]   ;;  %v8753_v35 = vld [vmem:[%s11635_s1 + $0x172c] ss:$16 sps:$4 sm:$0xff]  }
 0x2b7   : > { %5574 = vmatpush1.bf16.msra.mxu0 %v8657_v50  ;;  %6107 = vmatpush1.bf16.msra.mxu1 %v8660_v53  ;;  %v8748_v50 = vld [vmem:[%s11635_s1 + $0x1720] ss:$16 sps:$4 sm:$0xff]   ;;  %v8751_v53 = vld [vmem:[%s11635_s1 + $0x1728] ss:$16 sps:$4 sm:$0xff]  }
 0x2b8   : > { %5575 = vmatprep.subr.bf16.mxu0 %v8665_v38  ;;  %6108 = vmatprep.subr.bf16.mxu1 %v8668_v54  ;;  %v8756_v38 = vld [vmem:[%s11635_s1 + $0x1744] ss:$16 sps:$4 sm:$0xff]   ;;  %v8759_v54 = vld [vmem:[%s11635_s1 + $0x174c] ss:$16 sps:$4 sm:$0xff]  }
 0x2bb   : > { %5576 = vmatpush1.bf16.msra.mxu0 %v8663_v55  ;;  %6109 = vmatpush1.bf16.msra.mxu1 %v8666_v56  ;;  %v8754_v55 = vld [vmem:[%s11635_s1 + $0x1740] ss:$16 sps:$4 sm:$0xff]   ;;  %v8757_v56 = vld [vmem:[%s11635_s1 + $0x1748] ss:$16 sps:$4 sm:$0xff]  }
 0x2bc   : > { %5577 = vmatprep.subr.bf16.mxu0 %v8671_v47  ;;  %6110 = vmatprep.subr.bf16.mxu1 %v8674_v57  ;;  %v8762_v47 = vld [vmem:[%s11635_s1 + $0x1764] ss:$16 sps:$4 sm:$0xff]   ;;  %v8765_v57 = vld [vmem:[%s11635_s1 + $0x176c] ss:$16 sps:$4 sm:$0xff]  }
 0x2bf   : > { %5578 = vmatpush1.bf16.msra.mxu0 %v8669_v58  ;;  %6111 = vmatpush1.bf16.msra.mxu1 %v8672_v59  ;;  %v8760_v58 = vld [vmem:[%s11635_s1 + $0x1760] ss:$16 sps:$4 sm:$0xff]   ;;  %v8763_v59 = vld [vmem:[%s11635_s1 + $0x1768] ss:$16 sps:$4 sm:$0xff]  }
 0x2c0   : > { %5579 = vmatprep.subr.bf16.mxu0 %v8677_v48  ;;  %6112 = vmatprep.subr.bf16.mxu1 %v8680_v61  ;;  %v8768_v48 = vld [vmem:[%s11635_s1 + $0x1784] ss:$16 sps:$4 sm:$0xff]   ;;  %v8771_v61 = vld [vmem:[%s11635_s1 + $0x178c] ss:$16 sps:$4 sm:$0xff]  }
 0x2c3   : > { %5580 = vmatpush1.bf16.msra.mxu0 %v8675_v63  ;;  %6113 = vmatpush1.bf16.msra.mxu1 %v8678_v44  ;;  %v8766_v63 = vld [vmem:[%s11635_s1 + $0x1780] ss:$16 sps:$4 sm:$0xff]   ;;  %v8769_v44 = vld [vmem:[%s11635_s1 + $0x1788] ss:$16 sps:$4 sm:$0xff]  }
 0x2c4   : > { %5581 = vmatprep.subr.bf16.mxu0 %v8683_v1  ;;  %6114 = vmatprep.subr.bf16.mxu1 %v8686_v51  ;;  %v8774_v1 = vld [vmem:[%s11635_s1 + $0x17a4] ss:$16 sps:$4 sm:$0xff]   ;;  %v8777_v51 = vld [vmem:[%s11635_s1 + $0x17ac] ss:$16 sps:$4 sm:$0xff]  }
 0x2c7   : > { %5582 = vmatpush1.bf16.msra.mxu0 %v8681_v2  ;;  %6115 = vmatpush1.bf16.msra.mxu1 %v8684_v3  ;;  %v8772_v2 = vld [vmem:[%s11635_s1 + $0x17a0] ss:$16 sps:$4 sm:$0xff]   ;;  %v8775_v3 = vld [vmem:[%s11635_s1 + $0x17a8] ss:$16 sps:$4 sm:$0xff]  }
 0x2c8   : > { %5583 = vmatprep.subr.bf16.mxu0 %v8689_v4  ;;  %6116 = vmatprep.subr.bf16.mxu1 %v8692_v60  ;;  %v8780_v4 = vld [vmem:[%s11635_s1 + $0x17c4] ss:$16 sps:$4 sm:$0xff]   ;;  %v8783_v60 = vld [vmem:[%s11635_s1 + $0x17cc] ss:$16 sps:$4 sm:$0xff]  }
 0x2cb   : > { %5584 = vmatpush1.bf16.msra.mxu0 %v8687_v5  ;;  %6117 = vmatpush1.bf16.msra.mxu1 %v8690_v6  ;;  %v8778_v5 = vld [vmem:[%s11635_s1 + $0x17c0] ss:$16 sps:$4 sm:$0xff]   ;;  %v8781_v6 = vld [vmem:[%s11635_s1 + $0x17c8] ss:$16 sps:$4 sm:$0xff]  }
 0x2cc   : > { %5594 = vmatprep.subr.bf16.mxu0 %v8696_v7  ;;  %6127 = vmatprep.subr.bf16.mxu1 %v8699_v62  ;;  %v8786_v7 = vld [vmem:[%s11635_s1 + $0x17e4] ss:$16 sps:$4 sm:$0xff]   ;;  %v8789_v62 = vld [vmem:[%s11635_s1 + $0x17ec] ss:$16 sps:$4 sm:$0xff]  }
 0x2ce   : > { %5586 = vmatmul.mubr.bf16.vlgmr.msra.gmra.mrb[0].mxu0 %v11237_v9  ;;  %6119 = vmatmul.mubr.bf16.vlgmr.msra.gmra.mrb[0].mxu1 %v11237_v9 }
 0x2cf   : > { %5595 = vmatpush1.bf16.msra.mxu0 %v8694_v10  ;;  %6128 = vmatpush1.bf16.msra.mxu1 %v8697_v11  ;;  %v8784_v10 = vld [vmem:[%s11635_s1 + $0x17e0] ss:$16 sps:$4 sm:$0xff]   ;;  %v8787_v11 = vld [vmem:[%s11635_s1 + $0x17e8] ss:$16 sps:$4 sm:$0xff]  }
 0x2d0   : > { %5596 = vmatprep.subr.bf16.mxu0 %v8702_v12  ;;  %6129 = vmatprep.subr.bf16.mxu1 %v8705_v0  ;;  %v8792_v12 = vld [vmem:[%s11635_s1 + $0x1804] ss:$16 sps:$4 sm:$0xff]   ;;  %v8795_v0 = vld [vmem:[%s11635_s1 + $0x180c] ss:$16 sps:$4 sm:$0xff]  }
 0x2d1   : > { %5626 = vmatprep.mubr.bf16.mxu0 %v1159_v52  ;;  %6159 = vmatprep.mubr.bf16.mxu1 %v1159_v52  ;;  %v1157_v52 = vcombine.high %v11237_v9, %v11237_v9  ;;  %v8801_v9 = vld [vmem:[%s11635_s1 + $0x182c] ss:$16 sps:$4 sm:$0xff]  }
 0x2d3   : > { %5597 = vmatpush1.bf16.msra.mxu0 %v8700_v15  ;;  %6130 = vmatpush1.bf16.msra.mxu1 %v8703_v16  ;;  %v8790_v15 = vld [vmem:[%s11635_s1 + $0x1800] ss:$16 sps:$4 sm:$0xff]   ;;  %v8793_v16 = vld [vmem:[%s11635_s1 + $0x1808] ss:$16 sps:$4 sm:$0xff]  }
 0x2d4   : > { %5598 = vmatprep.subr.bf16.mxu0 %v8708_v8  ;;  %6131 = vmatprep.subr.bf16.mxu1 %v8711_v17  ;;  %v8798_v8 = vld [vmem:[%s11635_s1 + $0x1824] ss:$16 sps:$4 sm:$0xff]   ;;  %v8796_v17 = vld [vmem:[%s11635_s1 + $0x1820] ss:$16 sps:$4 sm:$0xff]  }
 0x2d7   : > { %5599 = vmatpush1.bf16.msra.mxu0 %v8706_v18  ;;  %6132 = vmatpush1.bf16.msra.mxu1 %v8709_v19  ;;  %v8799_v18 = vld [vmem:[%s11635_s1 + $0x1828] ss:$16 sps:$4 sm:$0xff]   ;;  %v8804_v19 = vld [vmem:[%s11635_s1 + $0x1844] ss:$16 sps:$4 sm:$0xff]  }
 0x2d8   : > { %5600 = vmatprep.subr.bf16.mxu0 %v8714_v20  ;;  %6133 = vmatprep.subr.bf16.mxu1 %v8717_v22  ;;  %v8807_v20 = vld [vmem:[%s11635_s1 + $0x184c] ss:$16 sps:$4 sm:$0xff]   ;;  %v8913_v22 = vmov 0  }
 0x2db   : > { %5601 = vmatpush1.bf16.msra.mxu0 %v8712_v23  ;;  %6134 = vmatpush1.bf16.msra.mxu1 %v8715_v24  ;;  %v8802_v23 = vld [vmem:[%s11635_s1 + $0x1840] ss:$16 sps:$4 sm:$0xff]   ;;  %v8805_v24 = vld [vmem:[%s11635_s1 + $0x1848] ss:$16 sps:$4 sm:$0xff]  }
 0x2dc   : > { %5602 = vmatprep.subr.bf16.mxu0 %v8720_v13  ;;  %6135 = vmatprep.subr.bf16.mxu1 %v8723_v27  ;;  %v8810_v13 = vld [vmem:[%s11635_s1 + $0x1864] ss:$16 sps:$4 sm:$0xff]   ;;  %v8813_v27 = vld [vmem:[%s11635_s1 + $0x186c] ss:$16 sps:$4 sm:$0xff]  }
 0x2df   : > { %5603 = vmatpush1.bf16.msra.mxu0 %v8718_v28  ;;  %6136 = vmatpush1.bf16.msra.mxu1 %v8721_v29  ;;  %v8808_v28 = vld [vmem:[%s11635_s1 + $0x1860] ss:$16 sps:$4 sm:$0xff]   ;;  %v8811_v29 = vld [vmem:[%s11635_s1 + $0x1868] ss:$16 sps:$4 sm:$0xff]  }
 0x2e0   : > { %5604 = vmatprep.subr.bf16.mxu0 %v8726_v14  ;;  %6137 = vmatprep.subr.bf16.mxu1 %v8729_v30  ;;  %v6627_v14 = vld.sshfl [vmem:[%s9132_s17 + $0x18] sm:$0x1 pattern:$0x75316420]  ;;  %v8814_v30 = vld [vmem:[%s11637_s3 + $0x40] sm:$0xff]   ;;  %s214_s17 = scalar_lea.vmem [#allocation2], %s213_s14 }
 0x2e1   : > { %s6568_s25 = sshll.u32 %s214_s17, 4  ;;  %s11594_s25 = int_to_ptr.vmem [resolvable:$true] %s6568_s25 }
 0x2e2   : > { %s8848_s8 = scalar_lea.vmem %s11594_s25, 16  ;;  %p8855_p0 = scmp.lt.s32.totalorder %s11594_s25, %s8853_s9 }
 0x2e3   : > { %5605 = vmatpush1.bf16.msra.mxu0 %v8724_v31  ;;  %6138 = vmatpush1.bf16.msra.mxu1 %v8727_v25  ;;  %v8815_v31 = vld [vmem:[%s11637_s3 + $0xc0] sm:$0xff]   ;;  %v1173_v25 = vrot.slane %v6627_v14, %v9135_v49  ;;  %v8819_v49 = vld [vmem:[%s11637_s3 + $0xc8] sm:$0xff]   ;;  %p8849_p11 = scmp.ne.s32.totalorder %s11594_s25, %s8848_s8  ;;  %p8856_p1 = scmp.lt.s32.totalorder %s8854_s10, %s8848_s8 }
 0x2e4   : > { %5606 = vmatprep.subr.bf16.mxu0 %v8732_v32  ;;  %6139 = vmatprep.subr.bf16.mxu1 %v8735_v33  ;;  %v8816_v32 = vld [vmem:[%s11637_s3] sm:$0xff]  }
 0x2e5   : > { %v8817_v33 = vld [vmem:[%s11637_s3 + $0x80] sm:$0xff]   ;;  %p8850_p12 = pnand %p8849_p11, %p8983_p5  ;;  %p8857_p2 = por %p8856_p1, %p8855_p0 }
 0x2e7   : > { %5607 = vmatpush1.bf16.msra.mxu0 %v8730_v26  ;;  %6140 = vmatpush1.bf16.msra.mxu1 %v8733_v36  ;;  %v8818_v26 = vld [vmem:[%s11637_s3 + $0x48] sm:$0xff]   ;;  %p8851_p13 = pneg %p8850_p12 }
 0x2e8   : > { %5608 = vmatprep.subr.bf16.mxu0 %v8738_v37  ;;  %6141 = vmatprep.subr.bf16.mxu1 %v8741_v21  ;;  %v8820_v36 = vld [vmem:[%s11637_s3 + $0x8] sm:$0xff]   ;;  %v8822_v21 = vld [vmem:[%s11637_s3 + $0x50] sm:$0xff]  }
 0x2e9   : > { %v8821_v37 = vld [vmem:[%s11637_s3 + $0x88] sm:$0xff]   ;;  %p8858_p3 = pnand %p8857_p2, %p8851_p13 }
 0x2eb   : > { %5609 = vmatpush1.bf16.msra.mxu0 %v8736_v39  ;;  %6142 = vmatpush1.bf16.msra.mxu1 %v8739_v40  ;;  %v8823_v39 = vld [vmem:[%s11637_s3 + $0xd0] sm:$0xff]  }
 0x2ec   : > { %5610 = vmatprep.subr.bf16.mxu0 %v8744_v41  ;;  %6143 = vmatprep.subr.bf16.mxu1 %v8747_v34  ;;  %v8824_v40 = vld [vmem:[%s11637_s3 + $0x10] sm:$0xff]   ;;  %v8826_v34 = vld [vmem:[%s11637_s3 + $0x58] sm:$0xff]  }
 0x2ed   : > { %v8825_v41 = vld [vmem:[%s11637_s3 + $0x90] sm:$0xff]  }
 0x2ef   : > { %5611 = vmatpush1.bf16.msra.mxu0 %v8742_v42  ;;  %6144 = vmatpush1.bf16.msra.mxu1 %v8745_v45  ;;  %v8827_v42 = vld [vmem:[%s11637_s3 + $0xd8] sm:$0xff]  }
 0x2f0   : > { %5612 = vmatprep.subr.bf16.mxu0 %v8750_v46  ;;  %6145 = vmatprep.subr.bf16.mxu1 %v8753_v35  ;;  %v8828_v45 = vld [vmem:[%s11637_s3 + $0x18] sm:$0xff]   ;;  %v8830_v35 = vld [vmem:[%s11637_s3 + $0x60] sm:$0xff]  }
 0x2f1   : > { %v8829_v46 = vld [vmem:[%s11637_s3 + $0x98] sm:$0xff]  }
 0x2f3   : > { %5613 = vmatpush1.bf16.msra.mxu0 %v8748_v50  ;;  %6146 = vmatpush1.bf16.msra.mxu1 %v8751_v53  ;;  %v8831_v50 = vld [vmem:[%s11637_s3 + $0xe0] sm:$0xff]  }
 0x2f4   : > { %5614 = vmatprep.subr.bf16.mxu0 %v8756_v38  ;;  %6147 = vmatprep.subr.bf16.mxu1 %v8759_v54  ;;  %v8832_v53 = vld [vmem:[%s11637_s3 + $0x20] sm:$0xff]   ;;  %v8834_v54 = vld [vmem:[%s11637_s3 + $0x68] sm:$0xff]  }
 0x2f5   : > { %v8833_v38 = vld [vmem:[%s11637_s3 + $0xa0] sm:$0xff]  }
 0x2f7   : > { %5615 = vmatpush1.bf16.msra.mxu0 %v8754_v55  ;;  %6148 = vmatpush1.bf16.msra.mxu1 %v8757_v56  ;;  %v8835_v55 = vld [vmem:[%s11637_s3 + $0xe8] sm:$0xff]  }
 0x2f8   : > { %5616 = vmatprep.subr.bf16.mxu0 %v8762_v47  ;;  %6149 = vmatprep.subr.bf16.mxu1 %v8765_v57  ;;  %v8836_v56 = vld [vmem:[%s11637_s3 + $0x28] sm:$0xff]   ;;  %v8838_v57 = vld [vmem:[%s11637_s3 + $0x70] sm:$0xff]  }
 0x2f9   : > { %v8837_v47 = vld [vmem:[%s11637_s3 + $0xa8] sm:$0xff]  }
 0x2fb   : > { %5617 = vmatpush1.bf16.msra.mxu0 %v8760_v58  ;;  %6150 = vmatpush1.bf16.msra.mxu1 %v8763_v59  ;;  %v8839_v58 = vld [vmem:[%s11637_s3 + $0xf0] sm:$0xff]  }
 0x2fc   : > { %5618 = vmatprep.subr.bf16.mxu0 %v8768_v48  ;;  %6151 = vmatprep.subr.bf16.mxu1 %v8771_v61  ;;  %v8840_v59 = vld [vmem:[%s11637_s3 + $0x30] sm:$0xff]   ;;  %v8842_v61 = vld [vmem:[%s11637_s3 + $0x78] sm:$0xff]  }
 0x2fd   : > { %v8841_v48 = vld [vmem:[%s11637_s3 + $0xb0] sm:$0xff]  }
 0x2ff   : > { %5619 = vmatpush1.bf16.msra.mxu0 %v8766_v63  ;;  %6152 = vmatpush1.bf16.msra.mxu1 %v8769_v44  ;;  %v8843_v63 = vld [vmem:[%s11637_s3 + $0xf8] sm:$0xff]  }
 0x300   : > { %5620 = vmatprep.subr.bf16.mxu0 %v8774_v1  ;;  %6153 = vmatprep.subr.bf16.mxu1 %v8777_v51  ;;  %v8844_v44 = vld [vmem:[%s11637_s3 + $0x38] sm:$0xff]   ;;  %v5121_v51 = vsub.s32 0, %v9112_v43 }
 0x301   : > { %v8845_v1 = vld [vmem:[%s11637_s3 + $0xb8] sm:$0xff]  }
 0x303   : > { %5621 = vmatpush1.bf16.msra.mxu0 %v8772_v2  ;;  %6154 = vmatpush1.bf16.msra.mxu1 %v8775_v3  ;;  %v5129_v2 = vsub.s32 2, %v9112_v43  ;;  %v1008_v3 = vld [vmem:[%s11636_s2] sm:$0xf] }
 0x304   : > { %5622 = vmatprep.subr.bf16.mxu0 %v8780_v4  ;;  %6155 = vmatprep.subr.bf16.mxu1 %v8783_v60  ;;  %v5125_v4 = vsub.s32 1, %v9112_v43  ;;  %v5133_v60 = vsub.s32 3, %v9112_v43 }
 0x307   : > { %5623 = vmatpush1.bf16.msra.mxu0 %v8778_v5  ;;  %6156 = vmatpush1.bf16.msra.mxu1 %v8781_v6  ;;  %v5122_v5 = vrot.slane %v1008_v3, %v5121_v51  ;;  %v5130_v6 = vrot.slane %v1008_v3, %v5129_v2 }
 0x308   : > { %5624 = vmatprep.subr.bf16.mxu0 %v8786_v7  ;;  %6157 = vmatprep.subr.bf16.mxu1 %v8789_v62  ;;  %v5126_v7 = vrot.slane %v1008_v3, %v5125_v4  ;;  %v5134_v62 = vrot.slane %v1008_v3, %v5133_v60 }
 0x30b   : > { %5625 = vmatpush1.bf16.msra.mxu0 %v8784_v10  ;;  %6158 = vmatpush1.bf16.msra.mxu1 %v8787_v11 }
 0x30c   : > { %5635 = vmatprep.subr.bf16.mxu0 %v8792_v12  ;;  %6168 = vmatprep.subr.bf16.mxu1 %v8795_v0 }
 0x30e   : > { %5627 = vmatmul.mubr.bf16.vlgmr.msra.gmra.mrb[0].mxu0 %v1157_v52  ;;  %6160 = vmatmul.mubr.bf16.vlgmr.msra.gmra.mrb[0].mxu1 %v1157_v52 }
 0x30f   : > { %5636 = vmatpush1.bf16.msra.mxu0 %v8790_v15  ;;  %6169 = vmatpush1.bf16.msra.mxu1 %v8793_v16 }
 0x310   : > { %5637 = vmatprep.subr.bf16.mxu0 %v8798_v8  ;;  %6170 = vmatprep.subr.bf16.mxu1 %v8801_v9 }
 0x311   : > { %5667 = vmatprep.mubr.bf16.mxu0 %v8913_v22  ;;  %6200 = vmatprep.mubr.bf16.mxu1 %v8913_v22 }
 0x313   : > { %5638 = vmatpush1.bf16.msra.mxu0 %v8796_v17  ;;  %6171 = vmatpush1.bf16.msra.mxu1 %v8799_v18 }
 0x314   : > { %5639 = vmatprep.subr.bf16.mxu0 %v8804_v19  ;;  %6172 = vmatprep.subr.bf16.mxu1 %v8807_v20 }
 0x317   : > { %5640 = vmatpush1.bf16.msra.mxu0 %v8802_v23  ;;  %6173 = vmatpush1.bf16.msra.mxu1 %v8805_v24 }
 0x318   : > { %5641 = vmatprep.subr.bf16.mxu0 %v8810_v13  ;;  %6174 = vmatprep.subr.bf16.mxu1 %v8813_v27 }
 0x31b   : > { %5642 = vmatpush1.bf16.msra.mxu0 %v8808_v28  ;;  %6175 = vmatpush1.bf16.msra.mxu1 %v8811_v29 }
 0x31c   : > { %7449 = vmatprep.subr.bf16.mxu0 %v8814_v30  ;;  %7471 = vmatprep.subr.bf16.mxu1 %v8815_v31  ;;  %v6281_v30 = vld [vmem:[%s11638_s4] sm:$0x1] }
 0x31e   : > { %7412 = vmatmul.mubr.msk.bf16.vlgmr.msra.gmra.mrb[0].mxu0 %vm5139_vm0, %v1173_v25  ;;  %7413 = vmatmul.mubr.msk.bf16.vlgmr.msra.gmra.mrb[0].mxu1 %vm5139_vm0, %v1173_v25 }
 0x31f   : > { %7450 = vmatpush3.bf16.msra.mxu0 %v8816_v32  ;;  %7472 = vmatpush3.bf16.msra.mxu1 %v8817_v33 }
 0x320   : > { %7451 = vmatprep.subr.bf16.mxu0 %v8818_v26  ;;  %7473 = vmatprep.subr.bf16.mxu1 %v8819_v49 }
 0x323   : > { %7452 = vmatpush3.bf16.msra.mxu0 %v8820_v36  ;;  %7474 = vmatpush3.bf16.msra.mxu1 %v8821_v37 }
 0x324   : > { %7453 = vmatprep.subr.bf16.mxu0 %v8822_v21  ;;  %7475 = vmatprep.subr.bf16.mxu1 %v8823_v39 }
 0x327   : > { %7454 = vmatpush3.bf16.msra.mxu0 %v8824_v40  ;;  %7476 = vmatpush3.bf16.msra.mxu1 %v8825_v41 }
 0x328   : > { %7455 = vmatprep.subr.bf16.mxu0 %v8826_v34  ;;  %7477 = vmatprep.subr.bf16.mxu1 %v8827_v42 }
 0x32b   : > { %7456 = vmatpush3.bf16.msra.mxu0 %v8828_v45  ;;  %7478 = vmatpush3.bf16.msra.mxu1 %v8829_v46 }
 0x32c   : > { %7457 = vmatprep.subr.bf16.mxu0 %v8830_v35  ;;  %7479 = vmatprep.subr.bf16.mxu1 %v8831_v50 }
 0x32f   : > { %7458 = vmatpush3.bf16.msra.mxu0 %v8832_v53  ;;  %7480 = vmatpush3.bf16.msra.mxu1 %v8833_v38 }
 0x330   : > { %7459 = vmatprep.subr.bf16.mxu0 %v8834_v54  ;;  %7481 = vmatprep.subr.bf16.mxu1 %v8835_v55 }
 0x333   : > { %7460 = vmatpush3.bf16.msra.mxu0 %v8836_v56  ;;  %7482 = vmatpush3.bf16.msra.mxu1 %v8837_v47 }
 0x334   : > { %7461 = vmatprep.subr.bf16.mxu0 %v8838_v57  ;;  %7483 = vmatprep.subr.bf16.mxu1 %v8839_v58 }
 0x337   : > { %7462 = vmatpush3.bf16.msra.mxu0 %v8840_v59  ;;  %7484 = vmatpush3.bf16.msra.mxu1 %v8841_v48 }
 0x338   : > { %7463 = vmatprep.subr.bf16.mxu0 %v8842_v61  ;;  %7485 = vmatprep.subr.bf16.mxu1 %v8843_v63 }
 0x33b   : > { %7464 = vmatpush3.bf16.msra.mxu0 %v8844_v44  ;;  %7486 = vmatpush3.bf16.msra.mxu1 %v8845_v1 }
 0x3f1   : > { %v5669_v10 = vpop.f32.mrb[0].mxu0  ;;  %v6202_v11 = vpop.f32.mrb[0].mxu1 }
 0x3f2   : > { %v7493_v12 = vadd.f32 %v5669_v10, %v5122_v5  ;;  %v7495_v0 = vadd.f32 %v6202_v11, %v5130_v6  ;;  %v5671_v52 = vpop.f32.mrb[1].mxu0  ;;  %v6204_v15 = vpop.f32.mrb[1].mxu1 }
 0x3f3   : > { %v7494_v16 = vadd.f32 %v5671_v52, %v5126_v7  ;;  %v7496_v8 = vadd.f32 %v6204_v15, %v5134_v62  ;;  %v5673_v9 = vpop.f32.mrb[2].mxu0  ;;  %v6206_v17 = vpop.f32.mrb[2].mxu1 }
 0x3f4   : > { %v6209_v18 = vmax.f32 %v7493_v12, 0.0  ;;  %v6211_v19 = vmax.f32 %v7495_v0, 0.0  ;;  %v5674_v20 = vpop.f32.mrb[3].mxu0  ;;  %v6207_v22 = vpop.f32.mrb[3].mxu1 }
 0x3f5   : > { %v6210_v43 = vmax.f32 %v7494_v16, 0.0  ;;  %v6212_v23 = vmax.f32 %v7496_v8, 0.0 }
 0x3f6   : > { %v6213_v27 = vpack.c.bf16 %v6209_v18, %v6209_v18  ;;  %v6215_v28 = vpack.c.bf16 %v6211_v19, %v6211_v19 }
 0x3f7   : > { %v6214_v24 = vpack.c.bf16 %v6210_v43, %v6210_v43  ;;  %v6216_v13 = vpack.c.bf16 %v6212_v23, %v6212_v23 }
 0x3f9   : > { %6506 = vmatprep.mubr.bf16.mxu0 %v6214_v24  ;;  %6546 = vmatprep.mubr.bf16.mxu1 %v6216_v13 }
 0x3fa   : > { %6507 = vmatmul.mubr.bf16.vlgmr.msra.gmra.mrb[4].mxu0 %v6213_v27  ;;  %6547 = vmatmul.mubr.bf16.vlgmr.msra.gmra.mrb[4].mxu1 %v6215_v28 }
 0x4cd   : > { %v7465_v29 = vpop.f32.mrb[4].mxu0  ;;  %v7487_v14 = vpop.f32.mrb[4].mxu1 }
 0x4ce   : > { %v7466_v31 = vpop.f32.mrb[5].mxu0  ;;  %v7488_v25 = vpop.f32.mrb[5].mxu1 }
 0x4cf   : > { %v7467_v32 = vadd.f32 %v7466_v31, %v7465_v29  ;;  %v7489_v33 = vadd.f32 %v7488_v25, %v7487_v14  ;;  %v7468_v26 = vpop.f32.mrb[6].mxu0  ;;  %v7490_v49 = vpop.f32.mrb[6].mxu1 }
 0x4d0   : > { %v7469_v36 = vpop.f32.mrb[7].mxu0  ;;  %v7491_v37 = vpop.f32.mrb[7].mxu1 }
 0x4d1   : > { %v6509_v21 = vadd.f32 %v7467_v32, %v6281_v30 }
 0x4d3   : > { %v6549_v39 = vadd.f32 %v7489_v33, %v6509_v21 }
 0x4d5   : > { %6554 = vst [vmem:[%s214_s17] sm:$0x1] %v6549_v39 }
 0x4d6   : > { %8861 = shalt.err (!%p8858_p3)
}
 0x4d7   : > { %s8862_s11 = scalar_lea.hbm %s11592_s26, 16  ;;  %s8866_s14 = scalar_lea.hbm %s11639_s5, 32 }
 0x4d8   : > { %p8863_p4 = scmp.ne.s32.totalorder %s11592_s26, %s8862_s11  ;;  %p8867_p9 = scmp.lt.u32.totalorder %s11592_s26, %s11639_s5 }
 0x4d9   : > { %p8868_p10 = scmp.lt.u32.totalorder %s8866_s14, %s8862_s11  ;;  %p8870_p12 = scmp.lt.u32.totalorder %s8862_s11, %s11592_s26 }
 0x4da   : > { %p8864_p7 = pnand %p8863_p4, %p8983_p5 }
 0x4db   : > { %p8869_p11 = por %p8868_p10, %p8867_p9 }
 0x4dc   : > { %p8865_p8 = pneg %p8864_p7 }
 0x4dd   : > { %p8871_p13 = por %p8870_p12, %p8869_p11 }
 0x4df   : > { %p8872_p0 = pnand %p8871_p13, %p8865_p8 }
 0x4e1   : > { %8875 = shalt.err (!%p8872_p0)
}
 0x4e2   : > { %7594 = dma.vmem_to_hbm [thread:$0]  (%p8983_p5), %s11594_s25, 16, %s11592_s26, %s6556_s7  }
 0x4e3 PF: > { %p7600_p1 = scmp.ge.s32.totalorder %s8910_s21, 2  ;;  %s6580_s23 = sand.u32 1, %s8898_s18  }
 0x4e4   : > { %s6581_s17 = scalar_lea.sflag [#allocation3], %s6580_s23 }
 0x4e5   : > { %p7597_p2 = pnand %p7600_p1, %p8987_p6 }
 0x4e7   : > { %8893 = dma.done.wait (!%p7597_p2), %s6581_s17, 16  }
 0x4e8   : > { %8895 = vsyncadd (!%p7597_p2), %s6581_s17, 4294967280  ;;  %p15_p3 = scmp.ge.s32.totalorder %s8970_s24, 4   ;;  %s11642_s18 = smov %s8902_s19 }
 0x4e9   : > { %s11643_s19 = smov %s8906_s20  ;;  %s11644_s20 = smov %s8981_s27 }
 0x4ea   : > { %s11645_s21 = smov %s8970_s24  ;;  %17 = sbr.rel (!%p15_p3) target bundleno = 3 (0x3), region = 75 }
 0x4f1   :  { %6585 = vsyncpa [#allocation3], 1 }
 0x4f2   :  { %6587 = vsyncpa [#allocation3 + $0x1], 1 }

</bundles_post_ra>
